<compile_context>
chip_gen: v6e
topology: v6e:2x2x1
jax: 0.10.0
libtpu: 0.0.40
codegen_flags: <defaults>
</compile_context>

<pallas_src>
import jax
import jax.numpy as jnp
from jax.experimental import pallas as pl
from jax.experimental.pallas import tpu as pltpu

EPS = 1e-5


# --------------------------------------------------------------------------- #
# Kernels
# --------------------------------------------------------------------------- #
def _conv1x1_stats_kernel(x_ref, w_ref, o_ref, s_ref):
    """h = x @ w1 (bf16 MXU, f32 acc); emit per-tile BN partial stats."""
    h = jnp.dot(x_ref[...].astype(jnp.bfloat16), w_ref[...],
                preferred_element_type=jnp.float32)           # (TM, P)
    o_ref[...] = h
    s_ref[0] = jnp.concatenate(
        [jnp.sum(h, axis=0, keepdims=True),
         jnp.sum(h * h, axis=0, keepdims=True)], axis=0)      # (2, P)


def _conv3x3_stats_kernel(h_ref, w_ref, sc_ref, sh_ref, o_ref, s_ref, pad_ref):
    """relu(bn1(h1)) -> 3x3 conv via im2col (single matmul); emit BN2 partial stats."""
    _, H, W, P = h_ref.shape
    a = jnp.maximum(h_ref[0].reshape(H * W, P) * sc_ref[...] + sh_ref[...], 0.0)
    a = a.astype(jnp.bfloat16)

    # Zero only the 1-pixel halo (scratch is per-core / uninitialized; the thin
    # border rewrite per step is cheap and megacore-safe).
    zrow = jnp.zeros((1, W + 2, P), jnp.bfloat16)
    zcol = jnp.zeros((H + 2, 1, P), jnp.bfloat16)
    pad_ref[0:1, :, :] = zrow
    pad_ref[H + 1:H + 2, :, :] = zrow
    pad_ref[:, 0:1, :] = zcol
    pad_ref[:, W + 1:W + 2, :] = zcol
    pad_ref[1:H + 1, 1:W + 1, :] = a.reshape(H, W, P)

    # im2col: (H*W, 9*P) patches, one K=9*P matmul on the MXU.
    patches = jnp.concatenate(
        [pad_ref[dy:dy + H, dx:dx + W, :] for dy in range(3) for dx in range(3)],
        axis=-1).reshape(H * W, 9 * P)
    o = jnp.dot(patches, w_ref[...], preferred_element_type=jnp.float32)  # (H*W, P)

    o_ref[0] = o.reshape(H, W, P)
    s_ref[0] = jnp.concatenate(
        [jnp.sum(o, axis=0, keepdims=True),
         jnp.sum(o * o, axis=0, keepdims=True)], axis=0)


def _bn_relu_conv1x1_stats_kernel(h_ref, w_ref, sc_ref, sh_ref, o_ref, s_ref):
    """relu(bn2(h2)) -> 1x1 conv (bf16 MXU, f32 acc); emit BN3 partial stats."""
    a = jnp.maximum(h_ref[...] * sc_ref[...] + sh_ref[...], 0.0)
    o = jnp.dot(a.astype(jnp.bfloat16), w_ref[...],
                preferred_element_type=jnp.float32)           # (TM, Cout)
    o_ref[...] = o
    s_ref[0] = jnp.concatenate(
        [jnp.sum(o, axis=0, keepdims=True),
         jnp.sum(o * o, axis=0, keepdims=True)], axis=0)


def _bn_residual_relu_kernel(h_ref, x_ref, sc_ref, sh_ref, o_ref):
    """out = relu(bn3(h3) + x). Residual x is re-read here, not kept live."""
    y = h_ref[...] * sc_ref[...] + sh_ref[...] + x_ref[...]
    o_ref[...] = jnp.maximum(y, 0.0).astype(o_ref.dtype)


# --------------------------------------------------------------------------- #
# Wrapper
# --------------------------------------------------------------------------- #
def _round_up(n, m=128):
    return ((n + m - 1) // m) * m


def _pick_tile_m(M, target):
    target = min(target, M)
    for t in range(target, 0, -1):
        if M % t == 0 and t % 8 == 0:
            return t
    return M


def _bn_fold(partial_stats, gamma, beta, count, cpad):
    """Reduce per-tile (sum, sumsq) -> per-channel (scale, shift) for y = h*scale + shift."""
    s = jnp.sum(partial_stats, axis=0)                    # (2, cpad)
    mean = s[0] / count
    var = jnp.maximum(s[1] / count - mean * mean, 0.0)    # biased variance
    inv = jax.lax.rsqrt(var + EPS)
    g = jnp.pad(gamma, (0, cpad - gamma.shape[0]))
    b = jnp.pad(beta, (0, cpad - beta.shape[0]))
    scale = (g * inv).astype(jnp.float32)
    shift = (b - mean * scale).astype(jnp.float32)
    return scale.reshape(1, cpad), shift.reshape(1, cpad)


def bottleneck_forward(x_nchw, params, *, tile_m=256):
    """x_nchw: (N, C, H, W) like PyTorch. Returns (N, C, H, W)."""
    w1, w2, w3, g1, b1, g2, b2, g3, b3 = params
    N, C, H, W = x_nchw.shape
    P = w1.shape[1]
    Cout = w3.shape[1]
    assert Cout == C, "stride=1, downsample=None requires inplanes == planes*4"

    Cp, Pp = _round_up(C), _round_up(P)    # lane-dense channel padding
    M = N * H * W
    TM = _pick_tile_m(M, tile_m)
    GM = M // TM

    # NCHW -> NHWC -> (M, Cp).
    # TODO(synk): keep the surrounding model NHWC end-to-end to drop this transpose.
    x_nhwc = jnp.transpose(x_nchw, (0, 2, 3, 1)).astype(jnp.float32)
    x2d = jnp.pad(x_nhwc.reshape(M, C), ((0, 0), (0, Cp - C)))

    # Weights: zero-padded to lane multiples, bf16 for the MXU.
    w1p = jnp.pad(w1, ((0, Cp - C), (0, Pp - P))).astype(jnp.bfloat16)
    w2p = jnp.pad(w2, ((0, 0), (0, 0), (0, Pp - P), (0, Pp - P)))         # HWIO
    w2col = w2p.reshape(9 * Pp, Pp).astype(jnp.bfloat16)
    w3p = jnp.pad(w3, ((0, Pp - P), (0, Cp - C))).astype(jnp.bfloat16)

    cparams = pltpu.CompilerParams(
        dimension_semantics=("parallel",),            # v7x: shard grid over both TCs
        vmem_limit_bytes=48 * 1024 * 1024)            # stays below v7x's 64 MiB VMEM

    # ---- stage 1: conv1 (1x1) + bn1 partial stats --------------------------
    h1, st1 = pl.pallas_call(
        _conv1x1_stats_kernel,
        grid=(GM,),
        in_specs=[pl.BlockSpec((TM, Cp), lambda i: (i, 0)),
                  pl.BlockSpec((Cp, Pp), lambda i: (0, 0))],
        out_specs=(pl.BlockSpec((TM, Pp), lambda i: (i, 0)),
                   pl.BlockSpec((1, 2, Pp), lambda i: (i, 0, 0))),
        out_shape=(jax.ShapeDtypeStruct((M, Pp), jnp.float32),
                   jax.ShapeDtypeStruct((GM, 2, Pp), jnp.float32)),
        compiler_params=cparams,
    )(x2d, w1p)
    sc1, sh1 = _bn_fold(st1, g1, b1, float(M), Pp)

    # ---- stage 2: bn1+relu -> conv2 (3x3, im2col) + bn2 partial stats -------
    h2, st2 = pl.pallas_call(
        _conv3x3_stats_kernel,
        grid=(N,),
        in_specs=[pl.BlockSpec((1, H, W, Pp), lambda n: (n, 0, 0, 0)),
                  pl.BlockSpec((9 * Pp, Pp), lambda n: (0, 0)),
                  pl.BlockSpec((1, Pp), lambda n: (0, 0)),
                  pl.BlockSpec((1, Pp), lambda n: (0, 0))],
        out_specs=(pl.BlockSpec((1, H, W, Pp), lambda n: (n, 0, 0, 0)),
                   pl.BlockSpec((1, 2, Pp), lambda n: (n, 0, 0))),
        out_shape=(jax.ShapeDtypeStruct((N, H, W, Pp), jnp.float32),
                   jax.ShapeDtypeStruct((N, 2, Pp), jnp.float32)),
        scratch_shapes=[pltpu.VMEM((H + 2, W + 2, Pp), jnp.bfloat16)],
        compiler_params=cparams,
    )(h1.reshape(N, H, W, Pp), w2col, sc1, sh1)
    sc2, sh2 = _bn_fold(st2, g2, b2, float(M), Pp)

    # ---- stage 3: bn2+relu -> conv3 (1x1) + bn3 partial stats ---------------
    h3, st3 = pl.pallas_call(
        _bn_relu_conv1x1_stats_kernel,
        grid=(GM,),
        in_specs=[pl.BlockSpec((TM, Pp), lambda i: (i, 0)),
                  pl.BlockSpec((Pp, Cp), lambda i: (0, 0)),
                  pl.BlockSpec((1, Pp), lambda i: (0, 0)),
                  pl.BlockSpec((1, Pp), lambda i: (0, 0))],
        out_specs=(pl.BlockSpec((TM, Cp), lambda i: (i, 0)),
                   pl.BlockSpec((1, 2, Cp), lambda i: (i, 0, 0))),
        out_shape=(jax.ShapeDtypeStruct((M, Cp), jnp.float32),
                   jax.ShapeDtypeStruct((GM, 2, Cp), jnp.float32)),
        compiler_params=cparams,
    )(h2.reshape(M, Pp), w3p, sc2, sh2)
    sc3, sh3 = _bn_fold(st3, g3, b3, float(M), Cp)

    # ---- stage 4: bn3 + residual add + relu ---------------------------------
    out2d = pl.pallas_call(
        _bn_residual_relu_kernel,
        grid=(GM,),
        in_specs=[pl.BlockSpec((TM, Cp), lambda i: (i, 0)),
                  pl.BlockSpec((TM, Cp), lambda i: (i, 0)),
                  pl.BlockSpec((1, Cp), lambda i: (0, 0)),
                  pl.BlockSpec((1, Cp), lambda i: (0, 0))],
        out_specs=pl.BlockSpec((TM, Cp), lambda i: (i, 0)),
        out_shape=jax.ShapeDtypeStruct((M, Cp), x_nchw.dtype),
        compiler_params=cparams,
    )(h3, x2d, sc3, sh3)

    out = out2d[:, :C].reshape(N, H, W, C)
    return jnp.transpose(out, (0, 3, 1, 2))   # back to NCHW (PyTorch layout)


# --------------------------------------------------------------------------- #
# Pure-JAX reference (mirrors the bf16-into-MXU / f32-accumulate policy)
# --------------------------------------------------------------------------- #
def ref_forward(x_nchw, params):
    w1, w2, w3, g1, b1, g2, b2, g3, b3 = params
    x = jnp.transpose(x_nchw, (0, 2, 3, 1)).astype(jnp.float32)
    N, H, W, C = x.shape
    bf = jnp.bfloat16

    def bn(h, g, b):
        m = h.mean(axis=(0, 1, 2), keepdims=True)
        v = ((h - m) ** 2).mean(axis=(0, 1, 2), keepdims=True)
        return (h - m) * jax.lax.rsqrt(v + EPS) * g.reshape(1, 1, 1, -1) \
            + b.reshape(1, 1, 1, -1)

    h = jnp.dot(x.reshape(-1, C).astype(bf), w1.astype(bf),
                preferred_element_type=jnp.float32).reshape(N, H, W, -1)
    h = jnp.maximum(bn(h, g1, b1), 0.0)
    h = jax.lax.conv_general_dilated(
        h.astype(bf), w2.astype(bf), (1, 1), 'SAME',
        dimension_numbers=('NHWC', 'HWIO', 'NHWC'),
        preferred_element_type=jnp.float32)
    h = jnp.maximum(bn(h, g2, b2), 0.0)
    P = h.shape[-1]
    h = jnp.dot(h.reshape(-1, P).astype(bf), w3.astype(bf),
                preferred_element_type=jnp.float32).reshape(N, H, W, -1)
    h = bn(h, g3, b3)
    out = jnp.maximum(h + x, 0.0)
    return jnp.transpose(out, (0, 3, 1, 2))


# --------------------------------------------------------------------------- #
# Init + test
# --------------------------------------------------------------------------- #
def init_params(key, inplanes, planes):
    expansion = 4
    ks = jax.random.split(key, 9)
    scale = 0.1
    # conv weights in matmul-friendly layouts:
    #   w1: (Cin, P)         (PyTorch (P, Cin, 1, 1) transposed)
    #   w2: (3, 3, P, P)     HWIO
    #   w3: (P, 4P)          (PyTorch (4P, P, 1, 1) transposed)
    w1 = scale * jax.random.normal(ks[0], (inplanes, planes), jnp.float32)
    w2 = scale * jax.random.normal(ks[1], (3, 3, planes, planes), jnp.float32)
    w3 = scale * jax.random.normal(ks[2], (planes, planes * expansion), jnp.float32)
    g1 = 1.0 + 0.1 * jax.random.normal(ks[3], (planes,), jnp.float32)
    b1 = 0.1 * jax.random.normal(ks[4], (planes,), jnp.float32)
    g2 = 1.0 + 0.1 * jax.random.normal(ks[5], (planes,), jnp.float32)
    b2 = 0.1 * jax.random.normal(ks[6], (planes,), jnp.float32)
    g3 = 1.0 + 0.1 * jax.random.normal(ks[7], (planes * expansion,), jnp.float32)
    b3 = 0.1 * jax.random.normal(ks[8], (planes * expansion,), jnp.float32)
    return (w1, w2, w3, g1, b1, g2, b2, g3, b3)


if __name__ == "__main__":
    # Small shapes; inplanes must equal planes*4 since downsample=None and stride=1.
    N, inplanes, planes, H, W = 2, 16, 4, 16, 16
    key = jax.random.PRNGKey(0)
    kx, kp = jax.random.split(key)
    x = jax.random.normal(kx, (N, inplanes, H, W), jnp.float32)   # NCHW like PyTorch
    params = init_params(kp, inplanes, planes)

    fwd = jax.jit(lambda xx: bottleneck_forward(xx, params, tile_m=128))
    out = jax.block_until_ready(fwd(x))
    ref = jax.block_until_ready(ref_forward(x, params))

    assert out.shape == (N, planes * 4, H, W), out.shape
    max_err = float(jnp.max(jnp.abs(out - ref)))
    assert jnp.allclose(out, ref, atol=2e-2, rtol=2e-2), max_err
    print("KERNEL_OK")
</pallas_src>

<mosaic_0001>
module attributes {stable_mosaic.version = 11 : i64} {
  func.func @_conv1x1_stats_kernel(%arg0: i32, %arg1: memref<128x128xf32, #tpu.memory_space<vmem>>, %arg2: memref<128x128xbf16, #tpu.memory_space<vmem>>, %arg3: memref<128x128xf32, #tpu.memory_space<vmem>>, %arg4: memref<1x2x128xf32, #tpu.memory_space<vmem>>) attributes {dimension_semantics = [#tpu.dimension_semantics<parallel>], iteration_bounds = array<i64: 4>, scalar_prefetch = 0 : i64, scratch_operands = 0 : i64, tpu.core_type = #tpu.core_type<tc>, window_params = [{transform_indices = @transform_0, window_bounds = array<i64: 128, 128>}, {pipeline_mode = #tpu.pipeline_mode<synchronous>, transform_indices = @transform_1, window_bounds = array<i64: 128, 128>}, {transform_indices = @transform_2, window_bounds = array<i64: 128, 128>}, {transform_indices = @transform_3, window_bounds = array<i64: 1, 2, 128>}]} {
    %c0 = arith.constant 0 : index
    %c0_0 = arith.constant 0 : index
    %0 = vector.load %arg1[%c0, %c0_0] : memref<128x128xf32, #tpu.memory_space<vmem>>, vector<128x128xf32>
    %1 = arith.truncf %0 : vector<128x128xf32> to vector<128x128xbf16>
    %c0_1 = arith.constant 0 : index
    %c0_2 = arith.constant 0 : index
    %2 = vector.load %arg2[%c0_1, %c0_2] : memref<128x128xbf16, #tpu.memory_space<vmem>>, vector<128x128xbf16>
    %cst = arith.constant dense<0.000000e+00> : vector<128x128xf32>
    %3 = tpu.matmul %1, %2, %cst {dimension_numbers = #tpu.dot_dimension_numbers<[1], [0], [0], [1], [0, 0, 1, 1], [], []>} : vector<128x128xbf16>, vector<128x128xbf16>, vector<128x128xf32> -> vector<128x128xf32>
    %c0_3 = arith.constant 0 : index
    %c0_4 = arith.constant 0 : index
    %4 = vector.load %arg3[%c0_3, %c0_4] : memref<128x128xf32, #tpu.memory_space<vmem>>, vector<128x128xf32>
    tpu.vector_store %arg3[%c0_3, %c0_4], %3 {strides = array<i32>} : memref<128x128xf32, #tpu.memory_space<vmem>>, vector<128x128xf32>,
    %cst_5 = arith.constant dense<0.000000e+00> : vector<128xf32>
    %5 = vector.multi_reduction <add>, %3, %cst_5 [0] : vector<128x128xf32> to vector<128xf32>
    %6 = vector.shape_cast %5 : vector<128xf32> to vector<1x128xf32>
    %7 = arith.mulf %3, %3 : vector<128x128xf32>
    %cst_6 = arith.constant dense<0.000000e+00> : vector<128xf32>
    %8 = vector.multi_reduction <add>, %7, %cst_6 [0] : vector<128x128xf32> to vector<128xf32>
    %9 = vector.shape_cast %8 : vector<128xf32> to vector<1x128xf32>
    %10 = tpu.concatenate %6, %9 in 0 : vector<1x128xf32>, vector<1x128xf32> -> vector<2x128xf32>
    %c0_7 = arith.constant 0 : index
    %c0_8 = arith.constant 0 : index
    %c0_9 = arith.constant 0 : index
    %11 = vector.load %arg4[%c0_7, %c0_8, %c0_9] : memref<1x2x128xf32, #tpu.memory_space<vmem>>, vector<1x2x128xf32>
    %12 = vector.shape_cast %11 : vector<1x2x128xf32> to vector<2x128xf32>
    %13 = vector.shape_cast %10 : vector<2x128xf32> to vector<1x2x128xf32>
    tpu.vector_store %arg4[%c0_7, %c0_8, %c0_9], %13 {strides = array<i32>} : memref<1x2x128xf32, #tpu.memory_space<vmem>>, vector<1x2x128xf32>,
    return
  }
  func.func @transform_0(%arg0: i32) -> (i32, i32) {
    %c0_i32 = arith.constant 0 : i32
    %c0_i32_0 = arith.constant 0 : i32
    return %arg0, %c0_i32 : i32, i32
  }
  func.func @transform_1(%arg0: i32) -> (i32, i32) {
    %c0_i32 = arith.constant 0 : i32
    %c0_i32_0 = arith.constant 0 : i32
    %c0_i32_1 = arith.constant 0 : i32
    return %c0_i32, %c0_i32_0 : i32, i32
  }
  func.func @transform_2(%arg0: i32) -> (i32, i32) {
    %c0_i32 = arith.constant 0 : i32
    %c0_i32_0 = arith.constant 0 : i32
    return %arg0, %c0_i32 : i32, i32
  }
  func.func @transform_3(%arg0: i32) -> (i32, i32, i32) {
    %c0_i32 = arith.constant 0 : i32
    %c0_i32_0 = arith.constant 0 : i32
    %c0_i32_1 = arith.constant 0 : i32
    return %arg0, %c0_i32, %c0_i32_0 : i32, i32, i32
  }
}

module attributes {stable_mosaic.version = 11 : i64} {
  func.func @_conv3x3_stats_kernel(%arg0: i32, %arg1: memref<1x16x16x128xf32, #tpu.memory_space<vmem>>, %arg2: memref<1152x128xbf16, #tpu.memory_space<vmem>>, %arg3: memref<1x128xf32, #tpu.memory_space<vmem>>, %arg4: memref<1x128xf32, #tpu.memory_space<vmem>>, %arg5: memref<1x16x16x128xf32, #tpu.memory_space<vmem>>, %arg6: memref<1x2x128xf32, #tpu.memory_space<vmem>>, %arg7: memref<18x18x128xbf16, #tpu.memory_space<vmem>>) attributes {dimension_semantics = [#tpu.dimension_semantics<parallel>], iteration_bounds = array<i64: 2>, scalar_prefetch = 0 : i64, scratch_operands = 1 : i64, tpu.core_type = #tpu.core_type<tc>, window_params = [{transform_indices = @transform_0, window_bounds = array<i64: 1, 16, 16, 128>}, {pipeline_mode = #tpu.pipeline_mode<synchronous>, transform_indices = @transform_1, window_bounds = array<i64: 1152, 128>}, {pipeline_mode = #tpu.pipeline_mode<synchronous>, transform_indices = @transform_2, window_bounds = array<i64: 1, 128>}, {pipeline_mode = #tpu.pipeline_mode<synchronous>, transform_indices = @transform_3, window_bounds = array<i64: 1, 128>}, {transform_indices = @transform_4, window_bounds = array<i64: 1, 16, 16, 128>}, {transform_indices = @transform_5, window_bounds = array<i64: 1, 2, 128>}]} {
    %c0 = arith.constant 0 : index
    %c0_0 = arith.constant 0 : index
    %c0_1 = arith.constant 0 : index
    %c0_2 = arith.constant 0 : index
    %0 = vector.load %arg1[%c0, %c0_0, %c0_1, %c0_2] : memref<1x16x16x128xf32, #tpu.memory_space<vmem>>, vector<1x16x16x128xf32>
    %1 = vector.shape_cast %0 : vector<1x16x16x128xf32> to vector<16x16x128xf32>
    %2 = vector.shape_cast %1 : vector<16x16x128xf32> to vector<256x128xf32>
    %c0_3 = arith.constant 0 : index
    %c0_4 = arith.constant 0 : index
    %3 = vector.load %arg3[%c0_3, %c0_4] : memref<1x128xf32, #tpu.memory_space<vmem>>, vector<1x128xf32>
    %4 = vector.broadcast %3 : vector<1x128xf32> to vector<256x128xf32>
    %5 = arith.mulf %2, %4 : vector<256x128xf32>
    %c0_5 = arith.constant 0 : index
    %c0_6 = arith.constant 0 : index
    %6 = vector.load %arg4[%c0_5, %c0_6] : memref<1x128xf32, #tpu.memory_space<vmem>>, vector<1x128xf32>
    %7 = vector.broadcast %6 : vector<1x128xf32> to vector<256x128xf32>
    %8 = arith.addf %5, %7 : vector<256x128xf32>
    %cst = arith.constant 0.000000e+00 : f32
    %9 = vector.broadcast %cst : f32 to vector<256x128xf32>
    %10 = arith.maximumf %8, %9 : vector<256x128xf32>
    %11 = arith.truncf %10 : vector<256x128xf32> to vector<256x128xbf16>
    %cst_7 = arith.constant 0.000000e+00 : bf16
    %12 = vector.broadcast %cst_7 : bf16 to vector<1x18x128xbf16>
    %cst_8 = arith.constant 0.000000e+00 : bf16
    %13 = vector.broadcast %cst_8 : bf16 to vector<18x1x128xbf16>
    %c0_9 = arith.constant 0 : index
    %c0_10 = arith.constant 0 : index
    %c0_11 = arith.constant 0 : index
    %14 = vector.load %arg7[%c0_9, %c0_10, %c0_11] : memref<18x18x128xbf16, #tpu.memory_space<vmem>>, vector<1x18x128xbf16>
    tpu.vector_store %arg7[%c0_9, %c0_10, %c0_11], %12 {strides = array<i32>} : memref<18x18x128xbf16, #tpu.memory_space<vmem>>, vector<1x18x128xbf16>,
    %c17 = arith.constant 17 : index
    %c0_12 = arith.constant 0 : index
    %c0_13 = arith.constant 0 : index
    %15 = vector.load %arg7[%c17, %c0_12, %c0_13] : memref<18x18x128xbf16, #tpu.memory_space<vmem>>, vector<1x18x128xbf16>
    tpu.vector_store %arg7[%c17, %c0_12, %c0_13], %12 {strides = array<i32>} : memref<18x18x128xbf16, #tpu.memory_space<vmem>>, vector<1x18x128xbf16>,
    %c0_14 = arith.constant 0 : index
    %c0_15 = arith.constant 0 : index
    %c0_16 = arith.constant 0 : index
    %16 = vector.load %arg7[%c0_14, %c0_15, %c0_16] : memref<18x18x128xbf16, #tpu.memory_space<vmem>>, vector<18x1x128xbf16>
    tpu.vector_store %arg7[%c0_14, %c0_15, %c0_16], %13 {strides = array<i32>} : memref<18x18x128xbf16, #tpu.memory_space<vmem>>, vector<18x1x128xbf16>,
    %c0_17 = arith.constant 0 : index
    %c17_18 = arith.constant 17 : index
    %c0_19 = arith.constant 0 : index
    %17 = vector.load %arg7[%c0_17, %c17_18, %c0_19] : memref<18x18x128xbf16, #tpu.memory_space<vmem>>, vector<18x1x128xbf16>
    tpu.vector_store %arg7[%c0_17, %c17_18, %c0_19], %13 {strides = array<i32>} : memref<18x18x128xbf16, #tpu.memory_space<vmem>>, vector<18x1x128xbf16>,
    %18 = vector.shape_cast %11 : vector<256x128xbf16> to vector<16x16x128xbf16>
    %c1 = arith.constant 1 : index
    %c1_20 = arith.constant 1 : index
    %c0_21 = arith.constant 0 : index
    %19 = vector.load %arg7[%c1, %c1_20, %c0_21] : memref<18x18x128xbf16, #tpu.memory_space<vmem>>, vector<16x16x128xbf16>
    tpu.vector_store %arg7[%c1, %c1_20, %c0_21], %18 {strides = array<i32>} : memref<18x18x128xbf16, #tpu.memory_space<vmem>>, vector<16x16x128xbf16>,
    %c0_22 = arith.constant 0 : index
    %c0_23 = arith.constant 0 : index
    %c0_24 = arith.constant 0 : index
    %20 = vector.load %arg7[%c0_22, %c0_23, %c0_24] : memref<18x18x128xbf16, #tpu.memory_space<vmem>>, vector<16x16x128xbf16>
    %c0_25 = arith.constant 0 : index
    %c1_26 = arith.constant 1 : index
    %c0_27 = arith.constant 0 : index
    %21 = vector.load %arg7[%c0_25, %c1_26, %c0_27] : memref<18x18x128xbf16, #tpu.memory_space<vmem>>, vector<16x16x128xbf16>
    %c0_28 = arith.constant 0 : index
    %c2 = arith.constant 2 : index
    %c0_29 = arith.constant 0 : index
    %22 = vector.load %arg7[%c0_28, %c2, %c0_29] : memref<18x18x128xbf16, #tpu.memory_space<vmem>>, vector<16x16x128xbf16>
    %c1_30 = arith.constant 1 : index
    %c0_31 = arith.constant 0 : index
    %c0_32 = arith.constant 0 : index
    %23 = vector.load %arg7[%c1_30, %c0_31, %c0_32] : memref<18x18x128xbf16, #tpu.memory_space<vmem>>, vector<16x16x128xbf16>
    %c1_33 = arith.constant 1 : index
    %c1_34 = arith.constant 1 : index
    %c0_35 = arith.constant 0 : index
    %24 = vector.load %arg7[%c1_33, %c1_34, %c0_35] : memref<18x18x128xbf16, #tpu.memory_space<vmem>>, vector<16x16x128xbf16>
    %c1_36 = arith.constant 1 : index
    %c2_37 = arith.constant 2 : index
    %c0_38 = arith.constant 0 : index
    %25 = vector.load %arg7[%c1_36, %c2_37, %c0_38] : memref<18x18x128xbf16, #tpu.memory_space<vmem>>, vector<16x16x128xbf16>
    %c2_39 = arith.constant 2 : index
    %c0_40 = arith.constant 0 : index
    %c0_41 = arith.constant 0 : index
    %26 = vector.load %arg7[%c2_39, %c0_40, %c0_41] : memref<18x18x128xbf16, #tpu.memory_space<vmem>>, vector<16x16x128xbf16>
    %c2_42 = arith.constant 2 : index
    %c1_43 = arith.constant 1 : index
    %c0_44 = arith.constant 0 : index
    %27 = vector.load %arg7[%c2_42, %c1_43, %c0_44] : memref<18x18x128xbf16, #tpu.memory_space<vmem>>, vector<16x16x128xbf16>
    %c2_45 = arith.constant 2 : index
    %c2_46 = arith.constant 2 : index
    %c0_47 = arith.constant 0 : index
    %28 = vector.load %arg7[%c2_45, %c2_46, %c0_47] : memref<18x18x128xbf16, #tpu.memory_space<vmem>>, vector<16x16x128xbf16>
    %29 = tpu.concatenate %20, %21, %22, %23, %24, %25, %26, %27, %28 in 2 : vector<16x16x128xbf16>, vector<16x16x128xbf16>, vector<16x16x128xbf16>, vector<16x16x128xbf16>, vector<16x16x128xbf16>, vector<16x16x128xbf16>, vector<16x16x128xbf16>, vector<16x16x128xbf16>, vector<16x16x128xbf16> -> vector<16x16x1152xbf16>
    %30 = vector.shape_cast %29 : vector<16x16x1152xbf16> to vector<256x1152xbf16>
    %c0_48 = arith.constant 0 : index
    %c0_49 = arith.constant 0 : index
    %31 = vector.load %arg2[%c0_48, %c0_49] : memref<1152x128xbf16, #tpu.memory_space<vmem>>, vector<1152x128xbf16>
    %cst_50 = arith.constant dense<0.000000e+00> : vector<256x128xf32>
    %32 = tpu.matmul %30, %31, %cst_50 {dimension_numbers = #tpu.dot_dimension_numbers<[1], [0], [0], [1], [0, 0, 1, 1], [], []>} : vector<256x1152xbf16>, vector<1152x128xbf16>, vector<256x128xf32> -> vector<256x128xf32>
    %33 = vector.shape_cast %32 : vector<256x128xf32> to vector<16x16x128xf32>
    %c0_51 = arith.constant 0 : index
    %c0_52 = arith.constant 0 : index
    %c0_53 = arith.constant 0 : index
    %c0_54 = arith.constant 0 : index
    %34 = vector.load %arg5[%c0_51, %c0_52, %c0_53, %c0_54] : memref<1x16x16x128xf32, #tpu.memory_space<vmem>>, vector<1x16x16x128xf32>
    %35 = vector.shape_cast %34 : vector<1x16x16x128xf32> to vector<16x16x128xf32>
    %36 = vector.shape_cast %33 : vector<16x16x128xf32> to vector<1x16x16x128xf32>
    tpu.vector_store %arg5[%c0_51, %c0_52, %c0_53, %c0_54], %36 {strides = array<i32>} : memref<1x16x16x128xf32, #tpu.memory_space<vmem>>, vector<1x16x16x128xf32>,
    %cst_55 = arith.constant dense<0.000000e+00> : vector<128xf32>
    %37 = vector.multi_reduction <add>, %32, %cst_55 [0] : vector<256x128xf32> to vector<128xf32>
    %38 = vector.shape_cast %37 : vector<128xf32> to vector<1x128xf32>
    %39 = arith.mulf %32, %32 : vector<256x128xf32>
    %cst_56 = arith.constant dense<0.000000e+00> : vector<128xf32>
    %40 = vector.multi_reduction <add>, %39, %cst_56 [0] : vector<256x128xf32> to vector<128xf32>
    %41 = vector.shape_cast %40 : vector<128xf32> to vector<1x128xf32>
    %42 = tpu.concatenate %38, %41 in 0 : vector<1x128xf32>, vector<1x128xf32> -> vector<2x128xf32>
    %c0_57 = arith.constant 0 : index
    %c0_58 = arith.constant 0 : index
    %c0_59 = arith.constant 0 : index
    %43 = vector.load %arg6[%c0_57, %c0_58, %c0_59] : memref<1x2x128xf32, #tpu.memory_space<vmem>>, vector<1x2x128xf32>
    %44 = vector.shape_cast %43 : vector<1x2x128xf32> to vector<2x128xf32>
    %45 = vector.shape_cast %42 : vector<2x128xf32> to vector<1x2x128xf32>
    tpu.vector_store %arg6[%c0_57, %c0_58, %c0_59], %45 {strides = array<i32>} : memref<1x2x128xf32, #tpu.memory_space<vmem>>, vector<1x2x128xf32>,
    return
  }
  func.func @transform_0(%arg0: i32) -> (i32, i32, i32, i32) {
    %c0_i32 = arith.constant 0 : i32
    %c0_i32_0 = arith.constant 0 : i32
    %c0_i32_1 = arith.constant 0 : i32
    %c0_i32_2 = arith.constant 0 : i32
    return %arg0, %c0_i32, %c0_i32_0, %c0_i32_1 : i32, i32, i32, i32
  }
  func.func @transform_1(%arg0: i32) -> (i32, i32) {
    %c0_i32 = arith.constant 0 : i32
    %c0_i32_0 = arith.constant 0 : i32
    %c0_i32_1 = arith.constant 0 : i32
    return %c0_i32, %c0_i32_0 : i32, i32
  }
  func.func @transform_2(%arg0: i32) -> (i32, i32) {
    %c0_i32 = arith.constant 0 : i32
    %c0_i32_0 = arith.constant 0 : i32
    %c0_i32_1 = arith.constant 0 : i32
    return %c0_i32, %c0_i32_0 : i32, i32
  }
  func.func @transform_3(%arg0: i32) -> (i32, i32) {
    %c0_i32 = arith.constant 0 : i32
    %c0_i32_0 = arith.constant 0 : i32
    %c0_i32_1 = arith.constant 0 : i32
    return %c0_i32, %c0_i32_0 : i32, i32
  }
  func.func @transform_4(%arg0: i32) -> (i32, i32, i32, i32) {
    %c0_i32 = arith.constant 0 : i32
    %c0_i32_0 = arith.constant 0 : i32
    %c0_i32_1 = arith.constant 0 : i32
    %c0_i32_2 = arith.constant 0 : i32
    return %arg0, %c0_i32, %c0_i32_0, %c0_i32_1 : i32, i32, i32, i32
  }
  func.func @transform_5(%arg0: i32) -> (i32, i32, i32) {
    %c0_i32 = arith.constant 0 : i32
    %c0_i32_0 = arith.constant 0 : i32
    %c0_i32_1 = arith.constant 0 : i32
    return %arg0, %c0_i32, %c0_i32_0 : i32, i32, i32
  }
}

module attributes {stable_mosaic.version = 11 : i64} {
  func.func @_bn_relu_conv1x1_stats_kernel(%arg0: i32, %arg1: memref<128x128xf32, #tpu.memory_space<vmem>>, %arg2: memref<128x128xbf16, #tpu.memory_space<vmem>>, %arg3: memref<1x128xf32, #tpu.memory_space<vmem>>, %arg4: memref<1x128xf32, #tpu.memory_space<vmem>>, %arg5: memref<128x128xf32, #tpu.memory_space<vmem>>, %arg6: memref<1x2x128xf32, #tpu.memory_space<vmem>>) attributes {dimension_semantics = [#tpu.dimension_semantics<parallel>], iteration_bounds = array<i64: 4>, scalar_prefetch = 0 : i64, scratch_operands = 0 : i64, tpu.core_type = #tpu.core_type<tc>, window_params = [{transform_indices = @transform_0, window_bounds = array<i64: 128, 128>}, {pipeline_mode = #tpu.pipeline_mode<synchronous>, transform_indices = @transform_1, window_bounds = array<i64: 128, 128>}, {pipeline_mode = #tpu.pipeline_mode<synchronous>, transform_indices = @transform_2, window_bounds = array<i64: 1, 128>}, {pipeline_mode = #tpu.pipeline_mode<synchronous>, transform_indices = @transform_3, window_bounds = array<i64: 1, 128>}, {transform_indices = @transform_4, window_bounds = array<i64: 128, 128>}, {transform_indices = @transform_5, window_bounds = array<i64: 1, 2, 128>}]} {
    %c0 = arith.constant 0 : index
    %c0_0 = arith.constant 0 : index
    %0 = vector.load %arg1[%c0, %c0_0] : memref<128x128xf32, #tpu.memory_space<vmem>>, vector<128x128xf32>
    %c0_1 = arith.constant 0 : index
    %c0_2 = arith.constant 0 : index
    %1 = vector.load %arg3[%c0_1, %c0_2] : memref<1x128xf32, #tpu.memory_space<vmem>>, vector<1x128xf32>
    %2 = vector.broadcast %1 : vector<1x128xf32> to vector<128x128xf32>
    %3 = arith.mulf %0, %2 : vector<128x128xf32>
    %c0_3 = arith.constant 0 : index
    %c0_4 = arith.constant 0 : index
    %4 = vector.load %arg4[%c0_3, %c0_4] : memref<1x128xf32, #tpu.memory_space<vmem>>, vector<1x128xf32>
    %5 = vector.broadcast %4 : vector<1x128xf32> to vector<128x128xf32>
    %6 = arith.addf %3, %5 : vector<128x128xf32>
    %cst = arith.constant 0.000000e+00 : f32
    %7 = vector.broadcast %cst : f32 to vector<128x128xf32>
    %8 = arith.maximumf %6, %7 : vector<128x128xf32>
    %9 = arith.truncf %8 : vector<128x128xf32> to vector<128x128xbf16>
    %c0_5 = arith.constant 0 : index
    %c0_6 = arith.constant 0 : index
    %10 = vector.load %arg2[%c0_5, %c0_6] : memref<128x128xbf16, #tpu.memory_space<vmem>>, vector<128x128xbf16>
    %cst_7 = arith.constant dense<0.000000e+00> : vector<128x128xf32>
    %11 = tpu.matmul %9, %10, %cst_7 {dimension_numbers = #tpu.dot_dimension_numbers<[1], [0], [0], [1], [0, 0, 1, 1], [], []>} : vector<128x128xbf16>, vector<128x128xbf16>, vector<128x128xf32> -> vector<128x128xf32>
    %c0_8 = arith.constant 0 : index
    %c0_9 = arith.constant 0 : index
    %12 = vector.load %arg5[%c0_8, %c0_9] : memref<128x128xf32, #tpu.memory_space<vmem>>, vector<128x128xf32>
    tpu.vector_store %arg5[%c0_8, %c0_9], %11 {strides = array<i32>} : memref<128x128xf32, #tpu.memory_space<vmem>>, vector<128x128xf32>,
    %cst_10 = arith.constant dense<0.000000e+00> : vector<128xf32>
    %13 = vector.multi_reduction <add>, %11, %cst_10 [0] : vector<128x128xf32> to vector<128xf32>
    %14 = vector.shape_cast %13 : vector<128xf32> to vector<1x128xf32>
    %15 = arith.mulf %11, %11 : vector<128x128xf32>
    %cst_11 = arith.constant dense<0.000000e+00> : vector<128xf32>
    %16 = vector.multi_reduction <add>, %15, %cst_11 [0] : vector<128x128xf32> to vector<128xf32>
    %17 = vector.shape_cast %16 : vector<128xf32> to vector<1x128xf32>
    %18 = tpu.concatenate %14, %17 in 0 : vector<1x128xf32>, vector<1x128xf32> -> vector<2x128xf32>
    %c0_12 = arith.constant 0 : index
    %c0_13 = arith.constant 0 : index
    %c0_14 = arith.constant 0 : index
    %19 = vector.load %arg6[%c0_12, %c0_13, %c0_14] : memref<1x2x128xf32, #tpu.memory_space<vmem>>, vector<1x2x128xf32>
    %20 = vector.shape_cast %19 : vector<1x2x128xf32> to vector<2x128xf32>
    %21 = vector.shape_cast %18 : vector<2x128xf32> to vector<1x2x128xf32>
    tpu.vector_store %arg6[%c0_12, %c0_13, %c0_14], %21 {strides = array<i32>} : memref<1x2x128xf32, #tpu.memory_space<vmem>>, vector<1x2x128xf32>,
    return
  }
  func.func @transform_0(%arg0: i32) -> (i32, i32) {
    %c0_i32 = arith.constant 0 : i32
    %c0_i32_0 = arith.constant 0 : i32
    return %arg0, %c0_i32 : i32, i32
  }
  func.func @transform_1(%arg0: i32) -> (i32, i32) {
    %c0_i32 = arith.constant 0 : i32
    %c0_i32_0 = arith.constant 0 : i32
    %c0_i32_1 = arith.constant 0 : i32
    return %c0_i32, %c0_i32_0 : i32, i32
  }
  func.func @transform_2(%arg0: i32) -> (i32, i32) {
    %c0_i32 = arith.constant 0 : i32
    %c0_i32_0 = arith.constant 0 : i32
    %c0_i32_1 = arith.constant 0 : i32
    return %c0_i32, %c0_i32_0 : i32, i32
  }
  func.func @transform_3(%arg0: i32) -> (i32, i32) {
    %c0_i32 = arith.constant 0 : i32
    %c0_i32_0 = arith.constant 0 : i32
    %c0_i32_1 = arith.constant 0 : i32
    return %c0_i32, %c0_i32_0 : i32, i32
  }
  func.func @transform_4(%arg0: i32) -> (i32, i32) {
    %c0_i32 = arith.constant 0 : i32
    %c0_i32_0 = arith.constant 0 : i32
    return %arg0, %c0_i32 : i32, i32
  }
  func.func @transform_5(%arg0: i32) -> (i32, i32, i32) {
    %c0_i32 = arith.constant 0 : i32
    %c0_i32_0 = arith.constant 0 : i32
    %c0_i32_1 = arith.constant 0 : i32
    return %arg0, %c0_i32, %c0_i32_0 : i32, i32, i32
  }
}

module attributes {stable_mosaic.version = 11 : i64} {
  func.func @_bn_residual_relu_kernel(%arg0: i32, %arg1: memref<128x128xf32, #tpu.memory_space<vmem>>, %arg2: memref<128x128xf32, #tpu.memory_space<vmem>>, %arg3: memref<1x128xf32, #tpu.memory_space<vmem>>, %arg4: memref<1x128xf32, #tpu.memory_space<vmem>>, %arg5: memref<128x128xf32, #tpu.memory_space<vmem>>) attributes {dimension_semantics = [#tpu.dimension_semantics<parallel>], iteration_bounds = array<i64: 4>, scalar_prefetch = 0 : i64, scratch_operands = 0 : i64, tpu.core_type = #tpu.core_type<tc>, window_params = [{transform_indices = @transform_0, window_bounds = array<i64: 128, 128>}, {transform_indices = @transform_1, window_bounds = array<i64: 128, 128>}, {pipeline_mode = #tpu.pipeline_mode<synchronous>, transform_indices = @transform_2, window_bounds = array<i64: 1, 128>}, {pipeline_mode = #tpu.pipeline_mode<synchronous>, transform_indices = @transform_3, window_bounds = array<i64: 1, 128>}, {transform_indices = @transform_4, window_bounds = array<i64: 128, 128>}]} {
    %c0 = arith.constant 0 : index
    %c0_0 = arith.constant 0 : index
    %0 = vector.load %arg1[%c0, %c0_0] : memref<128x128xf32, #tpu.memory_space<vmem>>, vector<128x128xf32>
    %c0_1 = arith.constant 0 : index
    %c0_2 = arith.constant 0 : index
    %1 = vector.load %arg3[%c0_1, %c0_2] : memref<1x128xf32, #tpu.memory_space<vmem>>, vector<1x128xf32>
    %2 = vector.broadcast %1 : vector<1x128xf32> to vector<128x128xf32>
    %3 = arith.mulf %0, %2 : vector<128x128xf32>
    %c0_3 = arith.constant 0 : index
    %c0_4 = arith.constant 0 : index
    %4 = vector.load %arg4[%c0_3, %c0_4] : memref<1x128xf32, #tpu.memory_space<vmem>>, vector<1x128xf32>
    %5 = vector.broadcast %4 : vector<1x128xf32> to vector<128x128xf32>
    %6 = arith.addf %3, %5 : vector<128x128xf32>
    %c0_5 = arith.constant 0 : index
    %c0_6 = arith.constant 0 : index
    %7 = vector.load %arg2[%c0_5, %c0_6] : memref<128x128xf32, #tpu.memory_space<vmem>>, vector<128x128xf32>
    %8 = arith.addf %6, %7 : vector<128x128xf32>
    %cst = arith.constant 0.000000e+00 : f32
    %9 = vector.broadcast %cst : f32 to vector<128x128xf32>
    %10 = arith.maximumf %8, %9 : vector<128x128xf32>
    %c0_7 = arith.constant 0 : index
    %c0_8 = arith.constant 0 : index
    %11 = vector.load %arg5[%c0_7, %c0_8] : memref<128x128xf32, #tpu.memory_space<vmem>>, vector<128x128xf32>
    tpu.vector_store %arg5[%c0_7, %c0_8], %10 {strides = array<i32>} : memref<128x128xf32, #tpu.memory_space<vmem>>, vector<128x128xf32>,
    return
  }
  func.func @transform_0(%arg0: i32) -> (i32, i32) {
    %c0_i32 = arith.constant 0 : i32
    %c0_i32_0 = arith.constant 0 : i32
    return %arg0, %c0_i32 : i32, i32
  }
  func.func @transform_1(%arg0: i32) -> (i32, i32) {
    %c0_i32 = arith.constant 0 : i32
    %c0_i32_0 = arith.constant 0 : i32
    return %arg0, %c0_i32 : i32, i32
  }
  func.func @transform_2(%arg0: i32) -> (i32, i32) {
    %c0_i32 = arith.constant 0 : i32
    %c0_i32_0 = arith.constant 0 : i32
    %c0_i32_1 = arith.constant 0 : i32
    return %c0_i32, %c0_i32_0 : i32, i32
  }
  func.func @transform_3(%arg0: i32) -> (i32, i32) {
    %c0_i32 = arith.constant 0 : i32
    %c0_i32_0 = arith.constant 0 : i32
    %c0_i32_1 = arith.constant 0 : i32
    return %c0_i32, %c0_i32_0 : i32, i32
  }
  func.func @transform_4(%arg0: i32) -> (i32, i32) {
    %c0_i32 = arith.constant 0 : i32
    %c0_i32_0 = arith.constant 0 : i32
    return %arg0, %c0_i32 : i32, i32
  }
}

</mosaic_0001>

<bundles_post_ra>
// kernel: _lambda_.4
= control target key start
LH: loop header
LB: loop body
LE: loop exit
PB: predicated region body
PF: predicated region fallthrough
CT: control target
= control target key end

     0   :  { %s663_s12 = smov 0   ;;  %s755_s0 = inlined_call_operand.vmem [shape: f32[512,128], index: 0, kind: input, shape index: {}]   ;;  %s756_s1 = inlined_call_operand.vmem [shape: bf16[128,128], index: 1, kind: input, shape index: {}]   ;;  %s757_s2 = inlined_call_operand.vmem [shape: f32[512,128], index: 2, kind: output, shape index: {0}]   ;;  %s758_s3 = inlined_call_operand.vmem [shape: f32[4,2,128], index: 3, kind: output, shape index: {1}]  }
   0x1 LB: > { %s669_s13 = sadd.s32 4294967295, %s641_s12   ;;  %p539_p0 = scmp.ge.s32.totalorder %s641_s12, 1  ;;  %s641_s12 = sphi %s663_s12, %s14_s12  }
   0x2   : > { %p141_p1 = scmp.lt.s32.totalorder %s641_s12, 5 }
   0x4   : > { %p142_p2 = pnand %p539_p0, %p141_p1 }
   0x5   : > { %s540_s16 = sshll.u32 (!%p142_p2), %s669_s13, 4  ;;  %p181_p4 = scmp.lt.s32.totalorder (!%p142_p2), %s669_s13, 3 }
   0x6   : > { %145 = sbr.rel (%p142_p2) target bundleno = 289 (0x121), region = 28  ;;  %p170_p3 = scmp.lt.s32.totalorder (!%p142_p2), %s540_s16, 63 }
   0xb   : > { %v627_v0 = vld [vmem:[%s756_s1 + $0x38] sm:$0xff]   ;;  %v628_v1 = vld [vmem:[%s756_s1 + $0x30] sm:$0xff]   ;;  %s760_s16 = smov (!%p170_p3, %s540_s16), 63  ;;  %v629_v2 = vld [vmem:[%s756_s1 + $0x28] sm:$0xff]   ;;  %s762_s13 = smov (!%p181_p4, %s669_s13), 3  ;;  %vm445_vm0 = vcmask 1040384  }
   0xc   : > { %571 = vmatprep.subr.bf16.mxu0 %v627_v0  ;;  %603 = vmatprep.subr.bf16.mxu1 %v627_v0  ;;  %s541_s21 = sshll.u32 %s760_s16, 3  ;;  %v630_v3 = vld [vmem:[%s756_s1 + $0x20] sm:$0xff]   ;;  %v631_v9 = vld [vmem:[%s756_s1 + $0x18] sm:$0xff]   ;;  %v632_v11 = vld [vmem:[%s756_s1 + $0x10] sm:$0xff]   ;;  %s544_s11 = sshll.u32 %s762_s13, 1 }
   0xd   : > { %572 = vmatpush3.bf16.msra.mxu0 %v627_v0  ;;  %611 = vmatpush3.bf16.msra.mxu1 %v627_v0  ;;  %s691_s24 = scalar_lea.vmem %s755_s0, %s541_s21  ;;  %v633_v12 = vld [vmem:[%s756_s1 + $0x8] sm:$0xff]   ;;  %v634_v13 = vld [vmem:[%s756_s1] sm:$0xff]   ;;  %s729_s10 = scalar_lea.vmem %s757_s2, %s541_s21 }
   0xe   : > { %573 = vmatprep.subr.bf16.mxu0 %v628_v1  ;;  %604 = vmatprep.subr.bf16.mxu1 %v628_v1  ;;  %v186_v4 = vld [vmem:[%s691_s24] sm:$0xff]  ;;  %v187_v5 = vld [vmem:[%s691_s24 + $0x8] sm:$0xff]  ;;  %v188_v14 = vld [vmem:[%s691_s24 + $0x10] sm:$0xff]  ;;  %s184_s16 = scalar_lea.vmem %s758_s3, %s544_s11 }
   0xf   : > { %v202_v6 = vpack.c.bf16 %v187_v5, %v186_v4  ;;  %v194_v7 = vld [vmem:[%s691_s24 + $0x40] sm:$0xff]  ;;  %v195_v8 = vld [vmem:[%s691_s24 + $0x48] sm:$0xff]  ;;  %v189_v15 = vld [vmem:[%s691_s24 + $0x18] sm:$0xff] }
  0x10   : > { %v206_v10 = vpack.c.bf16 %v195_v8, %v194_v7  ;;  %v190_v16 = vld [vmem:[%s691_s24 + $0x20] sm:$0xff]  ;;  %v196_v17 = vld [vmem:[%s691_s24 + $0x50] sm:$0xff]  ;;  %v197_v18 = vld [vmem:[%s691_s24 + $0x58] sm:$0xff]  ;;  %v203_v22 = vpack.c.bf16 %v189_v15, %v188_v14 }
  0x11   : > { %574 = vmatpush3.bf16.msra.mxu0 %v628_v1  ;;  %612 = vmatpush3.bf16.msra.mxu1 %v628_v1  ;;  %v191_v19 = vld [vmem:[%s691_s24 + $0x28] sm:$0xff]  ;;  %v198_v20 = vld [vmem:[%s691_s24 + $0x60] sm:$0xff]  ;;  %v207_v23 = vpack.c.bf16 %v197_v18, %v196_v17  ;;  %v192_v26 = vld [vmem:[%s691_s24 + $0x30] sm:$0xff] }
  0x12   : > { %575 = vmatprep.subr.bf16.mxu0 %v629_v2  ;;  %605 = vmatprep.subr.bf16.mxu1 %v629_v2  ;;  %v199_v21 = vld [vmem:[%s691_s24 + $0x68] sm:$0xff]  ;;  %v204_v24 = vpack.c.bf16 %v191_v19, %v190_v16  ;;  %v193_v27 = vld [vmem:[%s691_s24 + $0x38] sm:$0xff]  ;;  %v200_v28 = vld [vmem:[%s691_s24 + $0x70] sm:$0xff] }
  0x13   : > { %587 = vmatprep.mubr.bf16.mxu0 %v202_v6  ;;  %595 = vmatprep.mubr.bf16.mxu1 %v206_v10  ;;  %v208_v25 = vpack.c.bf16 %v199_v21, %v198_v20  ;;  %v201_v29 = vld [vmem:[%s691_s24 + $0x78] sm:$0xff]  ;;  %v205_v30 = vpack.c.bf16 %v193_v27, %v192_v26 }
  0x14   : > { %v209_v31 = vpack.c.bf16 %v201_v29, %v200_v28 }
  0x15   : > { %576 = vmatpush3.bf16.msra.mxu0 %v629_v2  ;;  %613 = vmatpush3.bf16.msra.mxu1 %v629_v2 }
  0x16   : > { %577 = vmatprep.subr.bf16.mxu0 %v630_v3  ;;  %606 = vmatprep.subr.bf16.mxu1 %v630_v3 }
  0x19   : > { %578 = vmatpush3.bf16.msra.mxu0 %v630_v3  ;;  %614 = vmatpush3.bf16.msra.mxu1 %v630_v3 }
  0x1a   : > { %579 = vmatprep.subr.bf16.mxu0 %v631_v9  ;;  %607 = vmatprep.subr.bf16.mxu1 %v631_v9 }
  0x1d   : > { %580 = vmatpush3.bf16.msra.mxu0 %v631_v9  ;;  %615 = vmatpush3.bf16.msra.mxu1 %v631_v9 }
  0x1e   : > { %581 = vmatprep.subr.bf16.mxu0 %v632_v11  ;;  %608 = vmatprep.subr.bf16.mxu1 %v632_v11 }
  0x21   : > { %582 = vmatpush3.bf16.msra.mxu0 %v632_v11  ;;  %616 = vmatpush3.bf16.msra.mxu1 %v632_v11 }
  0x22   : > { %583 = vmatprep.subr.bf16.mxu0 %v633_v12  ;;  %609 = vmatprep.subr.bf16.mxu1 %v633_v12 }
  0x25   : > { %584 = vmatpush3.bf16.msra.mxu0 %v633_v12  ;;  %617 = vmatpush3.bf16.msra.mxu1 %v633_v12 }
  0x26   : > { %585 = vmatprep.subr.bf16.mxu0 %v634_v13  ;;  %610 = vmatprep.subr.bf16.mxu1 %v634_v13 }
  0x29   : > { %586 = vmatpush3.bf16.msra.mxu0 %v634_v13  ;;  %618 = vmatpush3.bf16.msra.mxu1 %v634_v13 }
  0x2c   : > { %588 = vmatmul.mubr.bf16.vlgmr.msra.gmra.mxu0 %v203_v22  ;;  %596 = vmatmul.mubr.bf16.vlgmr.msra.gmra.mxu1 %v207_v23 }
  0x2d   : > { %591 = vmatprep.mubr.bf16.mxu0 %v204_v24  ;;  %599 = vmatprep.mubr.bf16.mxu1 %v208_v25 }
  0x34   : > { %592 = vmatmul.mubr.bf16.gmra.mxu0 %v205_v30  ;;  %600 = vmatmul.mubr.bf16.gmra.mxu1 %v209_v31 }
  0xec   : > { %v589_v32 = vpop.f32.mrf.mxu0  ;;  %v597_v33 = vpop.f32.mrf.mxu1 }
  0xed   : > { %373 = vst [vmem:[%s729_s10 + $0x10] sm:$0xff] %v589_v32  ;;  %381 = vst [vmem:[%s729_s10 + $0x50] sm:$0xff] %v597_v33  ;;  %v410_v45 = vmul.f32 %v589_v32, %v589_v32  ;;  %v418_v11 = vmul.f32 %v597_v33, %v597_v33 }
  0xee   : > { %v308_v34 = vpop.f32.mrf.mxu0  ;;  %v340_v35 = vpop.f32.mrf.mxu1 }
  0xef   : > { %371 = vst [vmem:[%s729_s10] sm:$0xff] %v308_v34  ;;  %379 = vst [vmem:[%s729_s10 + $0x40] sm:$0xff] %v340_v35  ;;  %v408_v40 = vmul.f32 %v308_v34, %v308_v34  ;;  %v416_v5 = vmul.f32 %v340_v35, %v340_v35 }
  0xf0   : > { %v590_v36 = vpop.f32.mrf.mxu0  ;;  %v598_v37 = vpop.f32.mrf.mxu1 }
  0xf1   : > { %374 = vst [vmem:[%s729_s10 + $0x18] sm:$0xff] %v590_v36  ;;  %382 = vst [vmem:[%s729_s10 + $0x58] sm:$0xff] %v598_v37  ;;  %v411_v50 = vmul.f32 %v590_v36, %v590_v36  ;;  %v419_v14 = vmul.f32 %v598_v37, %v598_v37 }
  0xf2   : > { %v311_v38 = vpop.f32.mrf.mxu0  ;;  %v343_v39 = vpop.f32.mrf.mxu1 }
  0xf3   : > { %372 = vst [vmem:[%s729_s10 + $0x8] sm:$0xff] %v311_v38  ;;  %v387_v41 = vadd.f32 %v311_v38, %v308_v34  ;;  %v409_v42 = vmul.f32 %v311_v38, %v311_v38  ;;  %380 = vst [vmem:[%s729_s10 + $0x48] sm:$0xff] %v343_v39  ;;  %v417_v9 = vmul.f32 %v343_v39, %v343_v39 }
  0xf4   : > { %v593_v43 = vpop.f32.mrf.mxu0  ;;  %v601_v44 = vpop.f32.mrf.mxu1 }
  0xf5   : > { %v388_v46 = vadd.f32 %v589_v32, %v387_v41  ;;  %v424_v47 = vadd.f32 %v409_v42, %v408_v40  ;;  %377 = vst [vmem:[%s729_s10 + $0x30] sm:$0xff] %v593_v43  ;;  %385 = vst [vmem:[%s729_s10 + $0x70] sm:$0xff] %v601_v44  ;;  %v414_v63 = vmul.f32 %v593_v43, %v593_v43 }
  0xf6   : > { %v324_v48 = vpop.f32.mrf.mxu0  ;;  %v356_v49 = vpop.f32.mrf.mxu1  ;;  %v422_v23 = vmul.f32 %v601_v44, %v601_v44 }
  0xf7   : > { %v425_v51 = vadd.f32 %v424_v47, %v410_v45  ;;  %375 = vst [vmem:[%s729_s10 + $0x20] sm:$0xff] %v324_v48  ;;  %v389_v52 = vadd.f32 %v590_v36, %v388_v46  ;;  %383 = vst [vmem:[%s729_s10 + $0x60] sm:$0xff] %v356_v49  ;;  %v412_v56 = vmul.f32 %v324_v48, %v324_v48 }
  0xf8   : > { %v594_v53 = vpop.f32.mrf.mxu0  ;;  %v602_v54 = vpop.f32.mrf.mxu1  ;;  %v420_v18 = vmul.f32 %v356_v49, %v356_v49 }
  0xf9   : > { %v390_v55 = vadd.f32 %v389_v52, %v324_v48  ;;  %v426_v57 = vadd.f32 %v425_v51, %v411_v50  ;;  %378 = vst [vmem:[%s729_s10 + $0x38] sm:$0xff] %v594_v53  ;;  %386 = vst [vmem:[%s729_s10 + $0x78] sm:$0xff] %v602_v54  ;;  %v415_v2 = vmul.f32 %v594_v53, %v594_v53 }
  0xfa   : > { %v327_v58 = vpop.f32.mrf.mxu0  ;;  %v359_v59 = vpop.f32.mrf.mxu1  ;;  %v423_v26 = vmul.f32 %v602_v54, %v602_v54 }
  0xfb   : > { %v427_v60 = vadd.f32 %v426_v57, %v412_v56  ;;  %376 = vst [vmem:[%s729_s10 + $0x28] sm:$0xff] %v327_v58  ;;  %v391_v61 = vadd.f32 %v390_v55, %v327_v58  ;;  %v413_v62 = vmul.f32 %v327_v58, %v327_v58  ;;  %384 = vst [vmem:[%s729_s10 + $0x68] sm:$0xff] %v359_v59 }
  0xfc   : > { %v421_v22 = vmul.f32 %v359_v59, %v359_v59 }
  0xfd   : > { %v392_v0 = vadd.f32 %v593_v43, %v391_v61  ;;  %v428_v1 = vadd.f32 %v427_v60, %v413_v62 }
  0xff   : > { %v393_v3 = vadd.f32 %v594_v53, %v392_v0  ;;  %v429_v4 = vadd.f32 %v428_v1, %v414_v63 }
 0x101   : > { %v430_v6 = vadd.f32 %v429_v4, %v415_v2  ;;  %v394_v7 = vadd.f32 %v393_v3, %v340_v35 }
 0x103   : > { %v395_v8 = vadd.f32 %v394_v7, %v343_v39  ;;  %v431_v10 = vadd.f32 %v430_v6, %v416_v5 }
 0x105   : > { %v396_v12 = vadd.f32 %v597_v33, %v395_v8  ;;  %v432_v13 = vadd.f32 %v431_v10, %v417_v9 }
 0x107   : > { %v433_v15 = vadd.f32 %v432_v13, %v418_v11  ;;  %v397_v16 = vadd.f32 %v598_v37, %v396_v12 }
 0x109   : > { %v398_v17 = vadd.f32 %v397_v16, %v356_v49  ;;  %v434_v19 = vadd.f32 %v433_v15, %v419_v14 }
 0x10b   : > { %v435_v20 = vadd.f32 %v434_v19, %v420_v18  ;;  %v399_v21 = vadd.f32 %v398_v17, %v359_v59 }
 0x10d   : > { %v400_v24 = vadd.f32 %v601_v44, %v399_v21  ;;  %v436_v25 = vadd.f32 %v435_v20, %v421_v22 }
 0x10f   : > { %v401_v27 = vadd.f32 %v602_v54, %v400_v24  ;;  %v437_v28 = vadd.f32 %v436_v25, %v422_v23 }
 0x111   : > { %v402_v29 = vrot.slane %v401_v27, 4  ;;  %v438_v30 = vadd.f32 %v437_v28, %v423_v26 }
 0x113   : > { %v403_v31 = vadd.f32 %v402_v29, %v401_v27  ;;  %v439_v32 = vrot.slane %v438_v30, 4 }
 0x115   : > { %v404_v33 = vrot.slane %v403_v31, 2  ;;  %v440_v34 = vadd.f32 %v439_v32, %v438_v30 }
 0x117   : > { %v405_v35 = vadd.f32 %v404_v33, %v403_v31  ;;  %v441_v36 = vrot.slane %v440_v34, 2 }
 0x119   : > { %v406_v37 = vrot.slane %v405_v35, 1  ;;  %v442_v38 = vadd.f32 %v441_v36, %v440_v34 }
 0x11b   : > { %v443_v39 = vrot.slane %v442_v38, 1  ;;  %v407_v40 = vadd.f32 %v406_v37, %v405_v35 }
 0x11d   : > { %v444_v41 = vadd.f32 %v443_v39, %v442_v38 }
 0x11f   : > { %v446_v42 = vsel %vm445_vm0, %v407_v40, %v444_v41 }
 0x120   : > { %447 = vst [vmem:[%s184_s16] sm:$0x3] %v446_v42 }
 0x121 PF: > { %s14_s12 = sadd.s32 1, %s641_s12  }
 0x122   : > { %p11_p5 = scmp.ge.s32.totalorder %s14_s12, 6  }
 0x124   :  { %13 = sbr.rel (!%p11_p5) target bundleno = 1 (0x1), region = 70 }

// kernel: _lambda_.7
= control target key start
LH: loop header
LB: loop body
LE: loop exit
PB: predicated region body
PF: predicated region fallthrough
CT: control target
= control target key end

     0   :  { %s473_s15 = smov 0   ;;  %s594_s0 = inlined_call_operand.vmem [shape: f32[512,128], index: 0, kind: input, shape index: {}]   ;;  %s595_s1 = inlined_call_operand.vmem [shape: f32[512,128], index: 1, kind: input, shape index: {}]   ;;  %s596_s2 = inlined_call_operand.vmem [shape: f32[1,128], index: 2, kind: input, shape index: {}]   ;;  %s597_s3 = inlined_call_operand.vmem [shape: f32[1,128], index: 3, kind: input, shape index: {}]   ;;  %s598_s4 = inlined_call_operand.vmem [shape: f32[512,128], index: 4, kind: output, shape index: {}]  }
   0x1 LB: > { %s417_s16 = sadd.s32 4294967295, %s446_s15   ;;  %p421_p0 = scmp.ge.s32.totalorder %s446_s15, 1  ;;  %s446_s15 = sphi %s473_s15, %s14_s15  }
   0x2   : > { %p174_p1 = scmp.lt.s32.totalorder %s446_s15, 5 }
   0x4   : > { %p175_p2 = pnand %p421_p0, %p174_p1 }
   0x5   : > { %s422_s17 = sshll.u32 (!%p175_p2), %s417_s16, 4 }
   0x6   : > { %178 = sbr.rel (%p175_p2) target bundleno = 37 (0x25), region = 36  ;;  %p206_p3 = scmp.lt.s32.totalorder (!%p175_p2), %s422_s17, 63 }
   0xb   : > { %s600_s17 = smov (!%p206_p3, %s422_s17), 63  ;;  %v486_v0 = vld [vmem:[%s596_s2] ss:$0 sm:$0xff] }
   0xc   : > { %s481_s18 = sshll.u32 %s600_s17, 3  ;;  %v504_v2 = vld [vmem:[%s597_s3] ss:$0 sm:$0xff] }
   0xd   : > { %s492_s23 = scalar_lea.vmem %s594_s0, %s481_s18  ;;  %s498_s26 = scalar_lea.vmem %s595_s1, %s481_s18 }
   0xe   : > { %v223_v1 = vld [vmem:[%s492_s23] sm:$0xff]  ;;  %v224_v3 = vld [vmem:[%s492_s23 + $0x8] sm:$0xff]  ;;  %v225_v7 = vld [vmem:[%s492_s23 + $0x10] sm:$0xff]  ;;  %s534_s5 = scalar_lea.vmem %s598_s4, %s481_s18 }
   0xf   : > { %v246_v4 = vmul.f32 %v486_v0, %v223_v1  ;;  %v285_v5 = vld [vmem:[%s498_s26] sm:$0xff]  ;;  %v247_v6 = vmul.f32 %v486_v0, %v224_v3  ;;  %v286_v8 = vld [vmem:[%s498_s26 + $0x8] sm:$0xff]  ;;  %v248_v9 = vmul.f32 %v486_v0, %v225_v7  ;;  %v226_v10 = vld [vmem:[%s492_s23 + $0x18] sm:$0xff] }
  0x10   : > { %v227_v11 = vld [vmem:[%s492_s23 + $0x20] sm:$0xff]  ;;  %v287_v14 = vld [vmem:[%s498_s26 + $0x10] sm:$0xff]  ;;  %v249_v15 = vmul.f32 %v486_v0, %v226_v10  ;;  %v288_v16 = vld [vmem:[%s498_s26 + $0x18] sm:$0xff] }
  0x11   : > { %v269_v12 = vadd.f32 %v504_v2, %v246_v4  ;;  %v270_v13 = vadd.f32 %v504_v2, %v247_v6  ;;  %v250_v17 = vmul.f32 %v486_v0, %v227_v11  ;;  %v228_v18 = vld [vmem:[%s492_s23 + $0x28] sm:$0xff]  ;;  %v271_v19 = vadd.f32 %v504_v2, %v248_v9  ;;  %v289_v20 = vld [vmem:[%s498_s26 + $0x20] sm:$0xff]  ;;  %v229_v22 = vld [vmem:[%s492_s23 + $0x30] sm:$0xff] }
  0x12   : > { %v251_v21 = vmul.f32 %v486_v0, %v228_v18  ;;  %v230_v23 = vld [vmem:[%s492_s23 + $0x38] sm:$0xff]  ;;  %v272_v26 = vadd.f32 %v504_v2, %v249_v15  ;;  %v290_v28 = vld [vmem:[%s498_s26 + $0x28] sm:$0xff]  ;;  %v252_v31 = vmul.f32 %v486_v0, %v229_v22  ;;  %v231_v33 = vld [vmem:[%s492_s23 + $0x40] sm:$0xff] }
  0x13   : > { %v301_v24 = vadd.f32 %v285_v5, %v269_v12  ;;  %v302_v25 = vadd.f32 %v286_v8, %v270_v13  ;;  %v273_v27 = vadd.f32 %v504_v2, %v250_v17  ;;  %v303_v29 = vadd.f32 %v287_v14, %v271_v19  ;;  %v232_v34 = vld [vmem:[%s492_s23 + $0x48] sm:$0xff]  ;;  %v291_v39 = vld [vmem:[%s498_s26 + $0x30] sm:$0xff]  ;;  %v292_v40 = vld [vmem:[%s498_s26 + $0x38] sm:$0xff] }
  0x14   : > { %v274_v30 = vadd.f32 %v504_v2, %v251_v21  ;;  %v253_v32 = vmul.f32 %v486_v0, %v230_v23  ;;  %v304_v37 = vadd.f32 %v288_v16, %v272_v26  ;;  %v233_v41 = vld [vmem:[%s492_s23 + $0x50] sm:$0xff]  ;;  %v275_v44 = vadd.f32 %v504_v2, %v252_v31  ;;  %v234_v46 = vld [vmem:[%s492_s23 + $0x58] sm:$0xff]  ;;  %v235_v47 = vld [vmem:[%s492_s23 + $0x60] sm:$0xff] }
  0x15   : > { %v317_v35 = vmax.f32 %v301_v24, 0.0  ;;  %v318_v36 = vmax.f32 %v302_v25, 0.0  ;;  %v305_v38 = vadd.f32 %v289_v20, %v273_v27  ;;  %v319_v42 = vmax.f32 %v303_v29, 0.0  ;;  %v236_v52 = vld [vmem:[%s492_s23 + $0x68] sm:$0xff]  ;;  %v293_v56 = vld [vmem:[%s498_s26 + $0x40] sm:$0xff]  ;;  %v295_v61 = vld [vmem:[%s498_s26 + $0x50] sm:$0xff] }
  0x16   : > { %v306_v43 = vadd.f32 %v290_v28, %v274_v30  ;;  %v276_v45 = vadd.f32 %v504_v2, %v253_v32  ;;  %v320_v48 = vmax.f32 %v304_v37, 0.0  ;;  %v254_v50 = vmul.f32 %v486_v0, %v231_v33  ;;  %v294_v57 = vld [vmem:[%s498_s26 + $0x48] sm:$0xff]  ;;  %v237_v1 = vld [vmem:[%s492_s23 + $0x70] sm:$0xff]  ;;  %v238_v3 = vld [vmem:[%s492_s23 + $0x78] sm:$0xff] }
  0x17   : > { %333 = vst [vmem:[%s534_s5] sm:$0xff] %v317_v35  ;;  %334 = vst [vmem:[%s534_s5 + $0x8] sm:$0xff] %v318_v36  ;;  %v321_v49 = vmax.f32 %v305_v38, 0.0  ;;  %v255_v51 = vmul.f32 %v486_v0, %v232_v34  ;;  %v307_v54 = vadd.f32 %v291_v39, %v275_v44  ;;  %v256_v58 = vmul.f32 %v486_v0, %v233_v41  ;;  %v296_v7 = vld [vmem:[%s498_s26 + $0x58] sm:$0xff]  ;;  %v297_v8 = vld [vmem:[%s498_s26 + $0x60] sm:$0xff] }
  0x18   : > { %335 = vst [vmem:[%s534_s5 + $0x10] sm:$0xff] %v319_v42  ;;  %v322_v53 = vmax.f32 %v306_v43, 0.0  ;;  %v308_v55 = vadd.f32 %v292_v40, %v276_v45  ;;  %336 = vst [vmem:[%s534_s5 + $0x18] sm:$0xff] %v320_v48  ;;  %v277_v59 = vadd.f32 %v504_v2, %v254_v50  ;;  %v257_v62 = vmul.f32 %v486_v0, %v234_v46  ;;  %v298_v14 = vld [vmem:[%s498_s26 + $0x68] sm:$0xff]  ;;  %v299_v23 = vld [vmem:[%s498_s26 + $0x70] sm:$0xff] }
  0x19   : > { %337 = vst [vmem:[%s534_s5 + $0x20] sm:$0xff] %v321_v49  ;;  %v278_v60 = vadd.f32 %v504_v2, %v255_v51  ;;  %v258_v63 = vmul.f32 %v486_v0, %v235_v47  ;;  %v323_v4 = vmax.f32 %v307_v54, 0.0  ;;  %v279_v6 = vadd.f32 %v504_v2, %v256_v58  ;;  %v300_v24 = vld [vmem:[%s498_s26 + $0x78] sm:$0xff] }
  0x1a   : > { %338 = vst [vmem:[%s534_s5 + $0x28] sm:$0xff] %v322_v53  ;;  %v324_v5 = vmax.f32 %v308_v55, 0.0  ;;  %v259_v9 = vmul.f32 %v486_v0, %v236_v52  ;;  %v309_v10 = vadd.f32 %v293_v56, %v277_v59  ;;  %v280_v12 = vadd.f32 %v504_v2, %v257_v62 }
  0x1b   : > { %v310_v11 = vadd.f32 %v294_v57, %v278_v60  ;;  %v281_v13 = vadd.f32 %v504_v2, %v258_v63  ;;  %339 = vst [vmem:[%s534_s5 + $0x30] sm:$0xff] %v323_v4  ;;  %v311_v15 = vadd.f32 %v295_v61, %v279_v6  ;;  %v260_v17 = vmul.f32 %v486_v0, %v237_v1 }
  0x1c   : > { %340 = vst [vmem:[%s534_s5 + $0x38] sm:$0xff] %v324_v5  ;;  %v282_v16 = vadd.f32 %v504_v2, %v259_v9  ;;  %v261_v18 = vmul.f32 %v486_v0, %v238_v3  ;;  %v325_v19 = vmax.f32 %v309_v10, 0.0  ;;  %v312_v21 = vadd.f32 %v296_v7, %v280_v12 }
  0x1d   : > { %v326_v20 = vmax.f32 %v310_v11, 0.0  ;;  %v313_v22 = vadd.f32 %v297_v8, %v281_v13  ;;  %v327_v25 = vmax.f32 %v311_v15, 0.0  ;;  %v283_v27 = vadd.f32 %v504_v2, %v260_v17 }
  0x1e   : > { %v314_v26 = vadd.f32 %v298_v14, %v282_v16  ;;  %v284_v28 = vadd.f32 %v504_v2, %v261_v18  ;;  %341 = vst [vmem:[%s534_s5 + $0x40] sm:$0xff] %v325_v19  ;;  %v328_v0 = vmax.f32 %v312_v21, 0.0 }
  0x1f   : > { %342 = vst [vmem:[%s534_s5 + $0x48] sm:$0xff] %v326_v20  ;;  %v329_v29 = vmax.f32 %v313_v22, 0.0  ;;  %343 = vst [vmem:[%s534_s5 + $0x50] sm:$0xff] %v327_v25  ;;  %v315_v31 = vadd.f32 %v299_v23, %v283_v27 }
  0x20   : > { %v330_v30 = vmax.f32 %v314_v26, 0.0  ;;  %v316_v32 = vadd.f32 %v300_v24, %v284_v28  ;;  %344 = vst [vmem:[%s534_s5 + $0x58] sm:$0xff] %v328_v0 }
  0x21   : > { %345 = vst [vmem:[%s534_s5 + $0x60] sm:$0xff] %v329_v29  ;;  %v331_v33 = vmax.f32 %v315_v31, 0.0 }
  0x22   : > { %346 = vst [vmem:[%s534_s5 + $0x68] sm:$0xff] %v330_v30  ;;  %v332_v34 = vmax.f32 %v316_v32, 0.0 }
  0x23   : > { %347 = vst [vmem:[%s534_s5 + $0x70] sm:$0xff] %v331_v33 }
  0x24   : > { %348 = vst [vmem:[%s534_s5 + $0x78] sm:$0xff] %v332_v34 }
  0x25 PF: > { %s14_s15 = sadd.s32 1, %s446_s15  }
  0x26   : > { %p11_p4 = scmp.ge.s32.totalorder %s14_s15, 6  }
  0x28   :  { %13 = sbr.rel (!%p11_p4) target bundleno = 1 (0x1), region = 69 }

// kernel: _lambda_.6
= control target key start
LH: loop header
LB: loop body
LE: loop exit
PB: predicated region body
PF: predicated region fallthrough
CT: control target
= control target key end

     0   :  { %s791_s18 = smov 0   ;;  %s925_s0 = inlined_call_operand.vmem [shape: f32[512,128], index: 0, kind: input, shape index: {}]   ;;  %s926_s1 = inlined_call_operand.vmem [shape: bf16[128,128], index: 1, kind: input, shape index: {}]   ;;  %s927_s2 = inlined_call_operand.vmem [shape: f32[1,128], index: 2, kind: input, shape index: {}]   ;;  %s928_s3 = inlined_call_operand.vmem [shape: f32[1,128], index: 3, kind: input, shape index: {}]   ;;  %s929_s4 = inlined_call_operand.vmem [shape: f32[512,128], index: 4, kind: output, shape index: {0}]   ;;  %s930_s5 = inlined_call_operand.vmem [shape: f32[4,2,128], index: 5, kind: output, shape index: {1}]  }
   0x1 LB: > { %s797_s19 = sadd.s32 4294967295, %s759_s18   ;;  %p655_p0 = scmp.ge.s32.totalorder %s759_s18, 1  ;;  %s759_s18 = sphi %s791_s18, %s16_s18  }
   0x2   : > { %p191_p1 = scmp.lt.s32.totalorder %s759_s18, 5 }
   0x4   : > { %p192_p2 = pnand %p655_p0, %p191_p1 }
   0x5   : > { %s656_s22 = sshll.u32 (!%p192_p2), %s797_s19, 4  ;;  %p235_p4 = scmp.lt.s32.totalorder (!%p192_p2), %s797_s19, 3 }
   0x6   : > { %195 = sbr.rel (%p192_p2) target bundleno = 289 (0x121), region = 36  ;;  %p224_p3 = scmp.lt.s32.totalorder (!%p192_p2), %s656_s22, 63 }
   0xb   : > { %v745_v0 = vld [vmem:[%s926_s1 + $0x38] sm:$0xff]   ;;  %v746_v1 = vld [vmem:[%s926_s1 + $0x30] sm:$0xff]   ;;  %s932_s22 = smov (!%p224_p3, %s656_s22), 63  ;;  %v747_v2 = vld [vmem:[%s926_s1 + $0x28] sm:$0xff]   ;;  %s934_s19 = smov (!%p235_p4, %s797_s19), 3  ;;  %vm561_vm0 = vcmask 1040384  }
   0xc   : > { %689 = vmatprep.subr.bf16.mxu0 %v745_v0  ;;  %721 = vmatprep.subr.bf16.mxu1 %v745_v0  ;;  %s657_s27 = sshll.u32 %s932_s22, 3  ;;  %v748_v3 = vld [vmem:[%s926_s1 + $0x20] sm:$0xff]   ;;  %v749_v12 = vld [vmem:[%s926_s1 + $0x18] sm:$0xff]   ;;  %v750_v17 = vld [vmem:[%s926_s1 + $0x10] sm:$0xff]   ;;  %s660_s22 = sshll.u32 %s934_s19, 1 }
   0xd   : > { %690 = vmatpush3.bf16.msra.mxu0 %v745_v0  ;;  %729 = vmatpush3.bf16.msra.mxu1 %v745_v0  ;;  %s819_s30 = scalar_lea.vmem %s925_s0, %s657_s27  ;;  %v829_v6 = vld [vmem:[%s927_s2] ss:$0 sm:$0xff]  ;;  %v751_v40 = vld [vmem:[%s926_s1 + $0x8] sm:$0xff]   ;;  %s899_s25 = scalar_lea.vmem %s929_s4, %s657_s27 }
   0xe   : > { %691 = vmatprep.subr.bf16.mxu0 %v746_v1  ;;  %722 = vmatprep.subr.bf16.mxu1 %v746_v1  ;;  %v240_v4 = vld [vmem:[%s819_s30] sm:$0xff]  ;;  %v241_v5 = vld [vmem:[%s819_s30 + $0x8] sm:$0xff]  ;;  %v242_v18 = vld [vmem:[%s819_s30 + $0x10] sm:$0xff]  ;;  %s238_s28 = scalar_lea.vmem %s930_s5, %s660_s22 }
   0xf   : > { %v263_v7 = vmul.f32 %v829_v6, %v240_v4  ;;  %v264_v8 = vmul.f32 %v829_v6, %v241_v5  ;;  %v836_v9 = vld [vmem:[%s928_s3] ss:$0 sm:$0xff]  ;;  %v249_v16 = vld [vmem:[%s819_s30 + $0x48] sm:$0xff]  ;;  %v243_v19 = vld [vmem:[%s819_s30 + $0x18] sm:$0xff]  ;;  %v265_v29 = vmul.f32 %v829_v6, %v242_v18 }
  0x10   : > { %v248_v13 = vld [vmem:[%s819_s30 + $0x40] sm:$0xff]  ;;  %v250_v23 = vld [vmem:[%s819_s30 + $0x50] sm:$0xff]  ;;  %v251_v24 = vld [vmem:[%s819_s30 + $0x58] sm:$0xff]  ;;  %v272_v26 = vmul.f32 %v829_v6, %v249_v16  ;;  %v266_v30 = vmul.f32 %v829_v6, %v243_v19 }
  0x11   : > { %692 = vmatpush3.bf16.msra.mxu0 %v746_v1  ;;  %730 = vmatpush3.bf16.msra.mxu1 %v746_v1  ;;  %v286_v10 = vadd.f32 %v836_v9, %v263_v7  ;;  %v287_v11 = vadd.f32 %v836_v9, %v264_v8  ;;  %v244_v21 = vld [vmem:[%s819_s30 + $0x20] sm:$0xff]  ;;  %v271_v22 = vmul.f32 %v829_v6, %v248_v13  ;;  %v245_v25 = vld [vmem:[%s819_s30 + $0x28] sm:$0xff]  ;;  %v246_v45 = vld [vmem:[%s819_s30 + $0x30] sm:$0xff] }
  0x12   : > { %693 = vmatprep.subr.bf16.mxu0 %v747_v2  ;;  %723 = vmatprep.subr.bf16.mxu1 %v747_v2  ;;  %v252_v27 = vld [vmem:[%s819_s30 + $0x60] sm:$0xff]  ;;  %v253_v28 = vld [vmem:[%s819_s30 + $0x68] sm:$0xff]  ;;  %v267_v32 = vmul.f32 %v829_v6, %v244_v21  ;;  %v295_v33 = vadd.f32 %v836_v9, %v272_v26  ;;  %v273_v34 = vmul.f32 %v829_v6, %v250_v23  ;;  %v247_v46 = vld [vmem:[%s819_s30 + $0x38] sm:$0xff] }
  0x13   : > { %v302_v14 = vmax.f32 %v286_v10, 0.0  ;;  %v303_v15 = vmax.f32 %v287_v11, 0.0  ;;  %v294_v31 = vadd.f32 %v836_v9, %v271_v22  ;;  %v274_v35 = vmul.f32 %v829_v6, %v251_v24  ;;  %v254_v53 = vld [vmem:[%s819_s30 + $0x70] sm:$0xff]  ;;  %v255_v54 = vld [vmem:[%s819_s30 + $0x78] sm:$0xff]  ;;  %v752_v55 = vld [vmem:[%s926_s1] sm:$0xff]  }
  0x14   : > { %v268_v36 = vmul.f32 %v829_v6, %v245_v25  ;;  %v275_v38 = vmul.f32 %v829_v6, %v252_v27  ;;  %v276_v39 = vmul.f32 %v829_v6, %v253_v28  ;;  %v311_v41 = vmax.f32 %v295_v33, 0.0 }
  0x15   : > { %694 = vmatpush3.bf16.msra.mxu0 %v747_v2  ;;  %731 = vmatpush3.bf16.msra.mxu1 %v747_v2  ;;  %v318_v20 = vpack.c.bf16 %v303_v15, %v302_v14  ;;  %v310_v37 = vmax.f32 %v294_v31, 0.0  ;;  %v288_v42 = vadd.f32 %v836_v9, %v265_v29  ;;  %v289_v43 = vadd.f32 %v836_v9, %v266_v30 }
  0x16   : > { %695 = vmatprep.subr.bf16.mxu0 %v748_v3  ;;  %724 = vmatprep.subr.bf16.mxu1 %v748_v3  ;;  %v290_v44 = vadd.f32 %v836_v9, %v267_v32  ;;  %v296_v48 = vadd.f32 %v836_v9, %v273_v34  ;;  %v297_v49 = vadd.f32 %v836_v9, %v274_v35 }
  0x17   : > { %705 = vmatprep.mubr.bf16.mxu0 %v318_v20  ;;  %v322_v47 = vpack.c.bf16 %v311_v41, %v310_v37  ;;  %v291_v50 = vadd.f32 %v836_v9, %v268_v36  ;;  %v298_v51 = vadd.f32 %v836_v9, %v275_v38  ;;  %v299_v52 = vadd.f32 %v836_v9, %v276_v39 }
  0x18   : > { %v304_v56 = vmax.f32 %v288_v42, 0.0  ;;  %v305_v57 = vmax.f32 %v289_v43, 0.0  ;;  %v269_v58 = vmul.f32 %v829_v6, %v246_v45  ;;  %v270_v59 = vmul.f32 %v829_v6, %v247_v46 }
  0x19   : > { %696 = vmatpush3.bf16.msra.mxu0 %v748_v3  ;;  %732 = vmatpush3.bf16.msra.mxu1 %v748_v3  ;;  %v312_v60 = vmax.f32 %v296_v48, 0.0  ;;  %v313_v61 = vmax.f32 %v297_v49, 0.0  ;;  %v277_v62 = vmul.f32 %v829_v6, %v254_v53  ;;  %v278_v63 = vmul.f32 %v829_v6, %v255_v54 }
  0x1a   : > { %697 = vmatprep.subr.bf16.mxu0 %v749_v12  ;;  %725 = vmatprep.subr.bf16.mxu1 %v749_v12  ;;  %v306_v0 = vmax.f32 %v290_v44, 0.0  ;;  %v307_v1 = vmax.f32 %v291_v50, 0.0  ;;  %v314_v2 = vmax.f32 %v298_v51, 0.0  ;;  %v315_v3 = vmax.f32 %v299_v52, 0.0 }
  0x1b   : > { %713 = vmatprep.mubr.bf16.mxu1 %v322_v47  ;;  %v319_v4 = vpack.c.bf16 %v305_v57, %v304_v56  ;;  %v292_v5 = vadd.f32 %v836_v9, %v269_v58  ;;  %v293_v7 = vadd.f32 %v836_v9, %v270_v59  ;;  %v323_v8 = vpack.c.bf16 %v313_v61, %v312_v60 }
  0x1c   : > { %v300_v10 = vadd.f32 %v836_v9, %v277_v62  ;;  %v301_v11 = vadd.f32 %v836_v9, %v278_v63  ;;  %v320_v6 = vpack.c.bf16 %v307_v1, %v306_v0 }
  0x1d   : > { %698 = vmatpush3.bf16.msra.mxu0 %v749_v12  ;;  %733 = vmatpush3.bf16.msra.mxu1 %v749_v12  ;;  %v324_v12 = vpack.c.bf16 %v315_v3, %v314_v2  ;;  %v308_v13 = vmax.f32 %v292_v5, 0.0  ;;  %v309_v14 = vmax.f32 %v293_v7, 0.0 }
  0x1e   : > { %699 = vmatprep.subr.bf16.mxu0 %v750_v17  ;;  %726 = vmatprep.subr.bf16.mxu1 %v750_v17  ;;  %v316_v15 = vmax.f32 %v300_v10, 0.0  ;;  %v317_v16 = vmax.f32 %v301_v11, 0.0 }
  0x20   : > { %v325_v18 = vpack.c.bf16 %v317_v16, %v316_v15 }
  0x21   : > { %700 = vmatpush3.bf16.msra.mxu0 %v750_v17  ;;  %734 = vmatpush3.bf16.msra.mxu1 %v750_v17  ;;  %v321_v17 = vpack.c.bf16 %v309_v14, %v308_v13 }
  0x22   : > { %701 = vmatprep.subr.bf16.mxu0 %v751_v40  ;;  %727 = vmatprep.subr.bf16.mxu1 %v751_v40 }
  0x25   : > { %702 = vmatpush3.bf16.msra.mxu0 %v751_v40  ;;  %735 = vmatpush3.bf16.msra.mxu1 %v751_v40 }
  0x26   : > { %703 = vmatprep.subr.bf16.mxu0 %v752_v55  ;;  %728 = vmatprep.subr.bf16.mxu1 %v752_v55 }
  0x29   : > { %704 = vmatpush3.bf16.msra.mxu0 %v752_v55  ;;  %736 = vmatpush3.bf16.msra.mxu1 %v752_v55 }
  0x2c   : > { %706 = vmatmul.mubr.bf16.vlgmr.msra.gmra.mxu0 %v319_v4  ;;  %714 = vmatmul.mubr.bf16.vlgmr.msra.gmra.mxu1 %v323_v8 }
  0x2d   : > { %709 = vmatprep.mubr.bf16.mxu0 %v320_v6  ;;  %717 = vmatprep.mubr.bf16.mxu1 %v324_v12 }
  0x34   : > { %710 = vmatmul.mubr.bf16.gmra.mxu0 %v321_v17  ;;  %718 = vmatmul.mubr.bf16.gmra.mxu1 %v325_v18 }
  0xec   : > { %v707_v9 = vpop.f32.mrf.mxu0  ;;  %v715_v19 = vpop.f32.mrf.mxu1 }
  0xed   : > { %489 = vst [vmem:[%s899_s25 + $0x10] sm:$0xff] %v707_v9  ;;  %497 = vst [vmem:[%s899_s25 + $0x50] sm:$0xff] %v715_v19  ;;  %v526_v31 = vmul.f32 %v707_v9, %v707_v9  ;;  %v534_v61 = vmul.f32 %v715_v19, %v715_v19 }
  0xee   : > { %v424_v20 = vpop.f32.mrf.mxu0  ;;  %v456_v21 = vpop.f32.mrf.mxu1 }
  0xef   : > { %487 = vst [vmem:[%s899_s25] sm:$0xff] %v424_v20  ;;  %495 = vst [vmem:[%s899_s25 + $0x40] sm:$0xff] %v456_v21  ;;  %v524_v26 = vmul.f32 %v424_v20, %v424_v20  ;;  %v532_v55 = vmul.f32 %v456_v21, %v456_v21 }
  0xf0   : > { %v708_v22 = vpop.f32.mrf.mxu0  ;;  %v716_v23 = vpop.f32.mrf.mxu1 }
  0xf1   : > { %490 = vst [vmem:[%s899_s25 + $0x18] sm:$0xff] %v708_v22  ;;  %498 = vst [vmem:[%s899_s25 + $0x58] sm:$0xff] %v716_v23  ;;  %v527_v36 = vmul.f32 %v708_v22, %v708_v22  ;;  %v535_v0 = vmul.f32 %v716_v23, %v716_v23 }
  0xf2   : > { %v427_v24 = vpop.f32.mrf.mxu0  ;;  %v459_v25 = vpop.f32.mrf.mxu1 }
  0xf3   : > { %488 = vst [vmem:[%s899_s25 + $0x8] sm:$0xff] %v427_v24  ;;  %v503_v27 = vadd.f32 %v427_v24, %v424_v20  ;;  %v525_v28 = vmul.f32 %v427_v24, %v427_v24  ;;  %496 = vst [vmem:[%s899_s25 + $0x48] sm:$0xff] %v459_v25  ;;  %v533_v59 = vmul.f32 %v459_v25, %v459_v25 }
  0xf4   : > { %v711_v29 = vpop.f32.mrf.mxu0  ;;  %v719_v30 = vpop.f32.mrf.mxu1 }
  0xf5   : > { %v504_v32 = vadd.f32 %v707_v9, %v503_v27  ;;  %v540_v33 = vadd.f32 %v525_v28, %v524_v26  ;;  %493 = vst [vmem:[%s899_s25 + $0x30] sm:$0xff] %v711_v29  ;;  %501 = vst [vmem:[%s899_s25 + $0x70] sm:$0xff] %v719_v30  ;;  %v530_v49 = vmul.f32 %v711_v29, %v711_v29 }
  0xf6   : > { %v440_v34 = vpop.f32.mrf.mxu0  ;;  %v472_v35 = vpop.f32.mrf.mxu1  ;;  %v538_v11 = vmul.f32 %v719_v30, %v719_v30 }
  0xf7   : > { %v541_v37 = vadd.f32 %v540_v33, %v526_v31  ;;  %491 = vst [vmem:[%s899_s25 + $0x20] sm:$0xff] %v440_v34  ;;  %v505_v38 = vadd.f32 %v708_v22, %v504_v32  ;;  %499 = vst [vmem:[%s899_s25 + $0x60] sm:$0xff] %v472_v35  ;;  %v528_v42 = vmul.f32 %v440_v34, %v440_v34 }
  0xf8   : > { %v712_v39 = vpop.f32.mrf.mxu0  ;;  %v720_v40 = vpop.f32.mrf.mxu1  ;;  %v536_v4 = vmul.f32 %v472_v35, %v472_v35 }
  0xf9   : > { %v506_v41 = vadd.f32 %v505_v38, %v440_v34  ;;  %v542_v43 = vadd.f32 %v541_v37, %v527_v36  ;;  %494 = vst [vmem:[%s899_s25 + $0x38] sm:$0xff] %v712_v39  ;;  %502 = vst [vmem:[%s899_s25 + $0x78] sm:$0xff] %v720_v40  ;;  %v531_v52 = vmul.f32 %v712_v39, %v712_v39 }
  0xfa   : > { %v443_v44 = vpop.f32.mrf.mxu0  ;;  %v475_v45 = vpop.f32.mrf.mxu1  ;;  %v539_v13 = vmul.f32 %v720_v40, %v720_v40 }
  0xfb   : > { %v543_v46 = vadd.f32 %v542_v43, %v528_v42  ;;  %492 = vst [vmem:[%s899_s25 + $0x28] sm:$0xff] %v443_v44  ;;  %v507_v47 = vadd.f32 %v506_v41, %v443_v44  ;;  %v529_v48 = vmul.f32 %v443_v44, %v443_v44  ;;  %500 = vst [vmem:[%s899_s25 + $0x68] sm:$0xff] %v475_v45 }
  0xfc   : > { %v537_v10 = vmul.f32 %v475_v45, %v475_v45 }
  0xfd   : > { %v508_v50 = vadd.f32 %v711_v29, %v507_v47  ;;  %v544_v51 = vadd.f32 %v543_v46, %v529_v48 }
  0xff   : > { %v509_v53 = vadd.f32 %v712_v39, %v508_v50  ;;  %v545_v54 = vadd.f32 %v544_v51, %v530_v49 }
 0x101   : > { %v546_v56 = vadd.f32 %v545_v54, %v531_v52  ;;  %v510_v57 = vadd.f32 %v509_v53, %v456_v21 }
 0x103   : > { %v511_v58 = vadd.f32 %v510_v57, %v459_v25  ;;  %v547_v60 = vadd.f32 %v546_v56, %v532_v55 }
 0x105   : > { %v512_v62 = vadd.f32 %v715_v19, %v511_v58  ;;  %v548_v63 = vadd.f32 %v547_v60, %v533_v59 }
 0x107   : > { %v549_v1 = vadd.f32 %v548_v63, %v534_v61  ;;  %v513_v2 = vadd.f32 %v716_v23, %v512_v62 }
 0x109   : > { %v514_v3 = vadd.f32 %v513_v2, %v472_v35  ;;  %v550_v5 = vadd.f32 %v549_v1, %v535_v0 }
 0x10b   : > { %v551_v7 = vadd.f32 %v550_v5, %v536_v4  ;;  %v515_v8 = vadd.f32 %v514_v3, %v475_v45 }
 0x10d   : > { %v516_v6 = vadd.f32 %v719_v30, %v515_v8  ;;  %v552_v12 = vadd.f32 %v551_v7, %v537_v10 }
 0x10f   : > { %v517_v14 = vadd.f32 %v720_v40, %v516_v6  ;;  %v553_v15 = vadd.f32 %v552_v12, %v538_v11 }
 0x111   : > { %v518_v16 = vrot.slane %v517_v14, 4  ;;  %v554_v17 = vadd.f32 %v553_v15, %v539_v13 }
 0x113   : > { %v519_v18 = vadd.f32 %v518_v16, %v517_v14  ;;  %v555_v9 = vrot.slane %v554_v17, 4 }
 0x115   : > { %v520_v19 = vrot.slane %v519_v18, 2  ;;  %v556_v20 = vadd.f32 %v555_v9, %v554_v17 }
 0x117   : > { %v521_v21 = vadd.f32 %v520_v19, %v519_v18  ;;  %v557_v22 = vrot.slane %v556_v20, 2 }
 0x119   : > { %v522_v23 = vrot.slane %v521_v21, 1  ;;  %v558_v24 = vadd.f32 %v557_v22, %v556_v20 }
 0x11b   : > { %v559_v25 = vrot.slane %v558_v24, 1  ;;  %v523_v26 = vadd.f32 %v522_v23, %v521_v21 }
 0x11d   : > { %v560_v27 = vadd.f32 %v559_v25, %v558_v24 }
 0x11f   : > { %v562_v28 = vsel %vm561_vm0, %v523_v26, %v560_v27 }
 0x120   : > { %563 = vst [vmem:[%s238_s28] sm:$0x3] %v562_v28 }
 0x121 PF: > { %s16_s18 = sadd.s32 1, %s759_s18  }
 0x122   : > { %p13_p5 = scmp.ge.s32.totalorder %s16_s18, 6  }
 0x124   :  { %15 = sbr.rel (!%p13_p5) target bundleno = 1 (0x1), region = 78 }

// kernel: _lambda_.5
= control target key start
LH: loop header
LB: loop body
LE: loop exit
PB: predicated region body
PF: predicated region fallthrough
CT: control target
= control target key end

     0   :  { %s5335_s18 = smov 0   ;;  %s7004_s0 = inlined_call_operand.vmem [shape: f32[2,16,16,128], index: 0, kind: input, shape index: {}]   ;;  %s7005_s1 = inlined_call_operand.vmem [shape: bf16[1152,128], index: 1, kind: input, shape index: {}]   ;;  %s7006_s2 = inlined_call_operand.vmem [shape: f32[1,128], index: 2, kind: input, shape index: {}]   ;;  %s7007_s3 = inlined_call_operand.vmem [shape: f32[1,128], index: 3, kind: input, shape index: {}]   ;;  %s7008_s4 = inlined_call_operand.vmem [shape: f32[2,16,16,128], index: 4, kind: output, shape index: {0}]   ;;  %s7009_s5 = inlined_call_operand.vmem [shape: f32[2,2,128], index: 5, kind: output, shape index: {1}]  }
   0x1 LB: > { %s4227_s19 = sadd.s32 4294967295, %s5302_s18   ;;  %p4231_p0 = scmp.ge.s32.totalorder %s5302_s18, 1  ;;  %s5302_s18 = sphi %s5335_s18, %s16_s18  }
   0x2   : > { %p190_p1 = scmp.lt.s32.totalorder %s5302_s18, 3 }
   0x4   : > { %p191_p2 = pnand %p4231_p0, %p190_p1 }
   0x6   : > { %194 = sbr.rel (%p191_p2) target bundleno = 590 (0x24e), region = 36 }
   0xb   : > { %v5068_v0 = vld [vmem:[%s7005_s1 + $0x78] sm:$0xff]   ;;  %v5304_v2 = vmov 0   ;;  %v5070_v3 = vld [vmem:[%s7005_s1 + $0x70] sm:$0xff]   ;;  %v5072_v5 = vld [vmem:[%s7005_s1 + $0x68] sm:$0xff]   ;;  %p222_p3 = scmp.lt.s32.totalorder %s4227_s19, 1  ;;  %vm402_vm0 = vcmask 1040384  }
   0xc   : > { %v5069_v1 = vld [vmem:[%s7005_s1 + $0x38] sm:$0xff]   ;;  %395 = vst [vmem:[#allocation2] sm:$0xf] %v5304_v2  ;;  %396 = vst [vmem:[#allocation2 + $0x4] sm:$0xf] %v5304_v2  ;;  %4523 = vmatprep.subr.bf16.mxu0 %v5068_v0  ;;  %5043 = vmatprep.subr.bf16.mxu1 %v5068_v0  ;;  %v5071_v4 = vld [vmem:[%s7005_s1 + $0x30] sm:$0xff]  }
   0xd   : > { %397 = vst [vmem:[#allocation2 + $0x8] sm:$0x1] %v5304_v2  ;;  %399 = vst [vmem:[#allocation2 + $0xcc] sm:$0xf] %v5304_v2  ;;  %4524 = vmatpush3.bf16.msra.mxu0 %v5069_v1  ;;  %5051 = vmatpush3.bf16.msra.mxu1 %v5069_v1  ;;  %v5073_v6 = vld [vmem:[%s7005_s1 + $0x28] sm:$0xff]   ;;  %v5074_v7 = vld [vmem:[%s7005_s1 + $0x60] sm:$0xff]  }
   0xe   : > { %400 = vst [vmem:[#allocation2 + $0xd0] sm:$0xf] %v5304_v2  ;;  %401 = vst [vmem:[#allocation2 + $0xd4] sm:$0x1] %v5304_v2  ;;  %4525 = vmatprep.subr.bf16.mxu0 %v5070_v3  ;;  %5044 = vmatprep.subr.bf16.mxu1 %v5070_v3  ;;  %s7055_s19 = smov (!%p222_p3, %s4227_s19), 1  ;;  %v5075_v8 = vld [vmem:[%s7005_s1 + $0x20] sm:$0xff]  }
   0xf   : > { %v5076_v9 = vld [vmem:[%s7005_s1 + $0x58] sm:$0xff]   ;;  %s4489_s13 = sshll.u32 %s7055_s19, 8  ;;  %v5078_v11 = vld [vmem:[%s7005_s1 + $0x50] sm:$0xff]   ;;  %vm403_vm1 = vsmask.f32 256  ;;  %v5080_v23 = vld [vmem:[%s7005_s1 + $0x48] sm:$0xff]  }
  0x10   : > { %v5077_v10 = vld [vmem:[%s7005_s1 + $0x18] sm:$0xff]   ;;  %s5388_s22 = scalar_lea.vmem %s7004_s0, %s4489_s13  ;;  %vm459_vm2 = vsmask.f32 7938  ;;  %vm5392_vm3 = vmand %vm402_vm0, %vm403_vm1  ;;  %v5079_v19 = vld [vmem:[%s7005_s1 + $0x10] sm:$0xff]   ;;  %vm918_vm5 = vcmask 1043456   ;;  %vm1626_vm10 = vcmask 1046528   ;;  %s6835_s7 = scalar_lea.vmem %s7008_s4, %s4489_s13 }
  0x11   : > { %4526 = vmatpush3.bf16.msra.mxu0 %v5071_v4  ;;  %5052 = vmatpush3.bf16.msra.mxu1 %v5071_v4  ;;  %vm5400_vm4 = vmand %vm402_vm0, %vm459_vm2  ;;  %v259_v17 = vld [vmem:[%s5388_s22 + $0xb0] sm:$0xff]  ;;  %v260_v18 = vld [vmem:[%s5388_s22 + $0xb8] sm:$0xff]  ;;  %vm1369_vm6 = vsmask.f32 7424  ;;  %vm595_vm7 = vsmask.f32 4368 }
  0x12   : > { %4527 = vmatprep.subr.bf16.mxu0 %v5072_v5  ;;  %5045 = vmatprep.subr.bf16.mxu1 %v5072_v5  ;;  %v5414_v21 = vld [vmem:[%s7006_s2] ss:$0 sm:$0xff]  ;;  %v441_v26 = vld [vmem:[#allocation2 + $0x90] sm:$0x1]  ;;  %v497_v27 = vld [vmem:[#allocation2 + $0x98] sm:$0x1] }
  0x13   : > { %v405_v12 = vld [vmem:[#allocation2] sm:$0x1]  ;;  %v298_v24 = vmul.f32 %v5414_v21, %v259_v17  ;;  %v299_v25 = vmul.f32 %v5414_v21, %v260_v18  ;;  %v5081_v28 = vld [vmem:[%s7005_s1 + $0x8] sm:$0xff]   ;;  %v442_v29 = vsel %vm5392_vm3, 0, %v441_v26  ;;  %v498_v30 = vsel %vm5400_vm4, 0, %v497_v27  ;;  %v5088_v43 = vld [vmem:[%s7005_s1 + $0xf8] sm:$0xff]  }
  0x14   : > { %v461_v14 = vld [vmem:[#allocation2 + $0x8] sm:$0x1]  ;;  %v406_v15 = vsel %vm5392_vm3, 0, %v405_v12  ;;  %v5419_v22 = vld [vmem:[%s7007_s3] ss:$0 sm:$0xff]  ;;  %v5089_v44 = vld [vmem:[%s7005_s1 + $0x178] sm:$0xff]  }
  0x15   : > { %4528 = vmatpush3.bf16.msra.mxu0 %v5073_v6  ;;  %5053 = vmatpush3.bf16.msra.mxu1 %v5073_v6  ;;  %407 = vst [vmem:[#allocation2] sm:$0x1] %v406_v15  ;;  %v462_v20 = vsel %vm5400_vm4, 0, %v461_v14  ;;  %v5082_v31 = vld [vmem:[%s7005_s1 + $0x40] sm:$0xff]   ;;  %v337_v32 = vadd.f32 %v5419_v22, %v298_v24  ;;  %v338_v33 = vadd.f32 %v5419_v22, %v299_v25  ;;  %443 = vst [vmem:[#allocation2 + $0x90] sm:$0x1] %v442_v29 }
  0x16   : > { %4529 = vmatprep.subr.bf16.mxu0 %v5074_v7  ;;  %5046 = vmatprep.subr.bf16.mxu1 %v5074_v7  ;;  %463 = vst [vmem:[#allocation2 + $0x8] sm:$0x1] %v462_v20  ;;  %499 = vst [vmem:[#allocation2 + $0x98] sm:$0x1] %v498_v30  ;;  %v5438_v34 = vld [vmem:[#allocation2 + $0x4] sm:$0xf] }
  0x17   : > { %v369_v35 = vmax.f32 %v337_v32, 0.0  ;;  %v370_v36 = vmax.f32 %v338_v33, 0.0  ;;  %v5083_v37 = vld [vmem:[%s7005_s1] sm:$0xff]   ;;  %v238_v39 = vld [vmem:[%s5388_s22 + $0x8] sm:$0xff]  ;;  %v464_v48 = vld [vmem:[#allocation2 + $0x14] sm:$0x1] }
  0x18   : > { %v237_v38 = vld [vmem:[%s5388_s22] sm:$0xff]  ;;  %v277_v46 = vmul.f32 %v5414_v21, %v238_v39  ;;  %v408_v47 = vld [vmem:[#allocation2 + $0xc] sm:$0x1]  ;;  %vm5461_vm8 = vmor %vm403_vm1, %vm595_vm7  ;;  %v465_v5 = vsel %vm5400_vm4, 0, %v464_v48  ;;  %s4236_s13 = sshll.u32 %s7055_s19, 1 }
  0x19   : > { %4530 = vmatpush3.bf16.msra.mxu0 %v5075_v8  ;;  %5054 = vmatpush3.bf16.msra.mxu1 %v5075_v8  ;;  %v4513_v41 = vpack.c.bf16 %v369_v35, %v369_v35  ;;  %v4514_v42 = vpack.c.bf16 %v370_v36, %v370_v36  ;;  %v276_v45 = vmul.f32 %v5414_v21, %v237_v38  ;;  %v409_v51 = vsel %vm5392_vm3, 0, %v408_v47  ;;  %vm5469_vm9 = vmand %vm918_vm5, %vm459_vm2  ;;  %v5091_v12 = vld [vmem:[%s7005_s1 + $0x138] sm:$0xff]   ;;  %v262_v17 = vld [vmem:[%s5388_s22 + $0xc8] sm:$0xff]  ;;  %s235_s10 = scalar_lea.vmem %s7009_s5, %s4236_s13 }
  0x1a   : > { %4531 = vmatprep.subr.bf16.mxu0 %v5076_v9  ;;  %5047 = vmatprep.subr.bf16.mxu1 %v5076_v9  ;;  %410 = vst [vmem:[#allocation2 + $0xc] sm:$0x1] %v409_v51  ;;  %v316_v1 = vadd.f32 %v5419_v22, %v277_v46  ;;  %466 = vst [vmem:[#allocation2 + $0x14] sm:$0x1] %v465_v5  ;;  %v301_v25 = vmul.f32 %v5414_v21, %v262_v17  ;;  %v500_v26 = vld [vmem:[#allocation2 + $0xa4] sm:$0x1] }
  0x1b   : > { %v785_v52 = vshrl.u32 %v4513_v41, 16  ;;  %v788_v53 = vshll.u32 %v4513_v41, 16  ;;  %v793_v54 = vshrl.u32 %v4514_v42, 16  ;;  %v796_v55 = vshll.u32 %v4514_v42, 16  ;;  %v239_v35 = vld [vmem:[%s5388_s22 + $0x10] sm:$0xff]  ;;  %v240_v36 = vld [vmem:[%s5388_s22 + $0x18] sm:$0xff] }
  0x1c   : > { %v1032_v40 = vld [vmem:[#allocation2] sm:$0xf]  ;;  %v997_v59 = vld [vmem:[#allocation2 + $0x90] sm:$0xf]  ;;  %v315_v0 = vadd.f32 %v5419_v22, %v276_v45  ;;  %v348_v15 = vmax.f32 %v316_v1, 0.0  ;;  %v501_v33 = vsel %vm5400_vm4, 0, %v500_v26  ;;  %v279_v45 = vmul.f32 %v5414_v21, %v240_v36 }
  0x1d   : > { %4532 = vmatpush3.bf16.msra.mxu0 %v5077_v10  ;;  %5055 = vmatpush3.bf16.msra.mxu1 %v5077_v10  ;;  %v4271_v49 = vcombine.low %v1032_v40, %v5438_v34  ;;  %v5454_v50 = vld [vmem:[#allocation2 + $0x8] ss:$0 sps:$4 sm:$0x11]   ;;  %v787_v61 = vrot.slane %v785_v52, 7  ;;  %v795_v62 = vrot.slane %v793_v54, 7  ;;  %v261_v10 = vld [vmem:[%s5388_s22 + $0xc0] sm:$0xff] }
  0x1e   : > { %4533 = vmatprep.subr.bf16.mxu0 %v5078_v11  ;;  %5048 = vmatprep.subr.bf16.mxu1 %v5078_v11  ;;  %v1378_v58 = vshll.u32 %v5454_v50, 16  ;;  %v1001_v63 = vld [vmem:[#allocation2 + $0x98] sm:$0x1]  ;;  %v347_v14 = vmax.f32 %v315_v0, 0.0  ;;  %v300_v18 = vmul.f32 %v5414_v21, %v261_v10  ;;  %v4492_v29 = vpack.c.bf16 %v348_v15, %v348_v15  ;;  %502 = vst [vmem:[#allocation2 + $0xa4] sm:$0x1] %v501_v33 }
  0x1f   : > { %v1371_v56 = vshrl.u32 %v4271_v49, 16  ;;  %v1373_v57 = vshll.u32 %v4271_v49, 16  ;;  %v790_v6 = vor.u32 %v788_v53, %v787_v61  ;;  %v791_v7 = vrot.slane %v787_v61, 4  ;;  %v411_v41 = vld [vmem:[#allocation2 + $0x18] sm:$0x1] }
  0x20   : > { %v1380_v3 = vrot.slane %v1378_v58, 1  ;;  %v798_v8 = vor.u32 %v796_v55, %v795_v62  ;;  %v800_v9 = vrot.slane %v795_v62, 4  ;;  %v339_v30 = vadd.f32 %v5419_v22, %v300_v18  ;;  %v467_v46 = vld [vmem:[#allocation2 + $0x20] sm:$0x1]  ;;  %v5103_v62 = vld [vmem:[%s7005_s1 + $0x170] sm:$0xff]  }
  0x21   : > { %4534 = vmatpush3.bf16.msra.mxu0 %v5079_v19  ;;  %5056 = vmatpush3.bf16.msra.mxu1 %v5079_v19  ;;  %v1375_v2 = vrot.slane %v1373_v57, 1  ;;  %v444_v19 = vld [vmem:[#allocation2 + $0x9c] sm:$0x1]  ;;  %v606_v39 = vshrl.u32 %v4492_v29, 16  ;;  %v609_v40 = vshll.u32 %v4492_v29, 16  ;;  %v468_v52 = vsel %vm5400_vm4, 0, %v467_v46 }
  0x22   : > { %4535 = vmatprep.subr.bf16.mxu0 %v5080_v23  ;;  %5049 = vmatprep.subr.bf16.mxu1 %v5080_v23  ;;  %v799_v20 = vsel %vm5461_vm8, %v791_v7, %v798_v8  ;;  %v998_v23 = vsel %vm5469_vm9, %v790_v6, %v997_v59  ;;  %v1002_v24 = vsel %vm5392_vm3, %v800_v9, %v1001_v63  ;;  %v445_v32 = vsel %vm5392_vm3, 0, %v444_v19  ;;  %v920_v51 = vld [vmem:[#allocation2 + $0xc] sm:$0xf]  ;;  %v924_v53 = vld [vmem:[#allocation2 + $0x14] sm:$0x1] }
  0x23   : > { %v1376_v11 = vor.u32 %v1375_v2, %v1371_v56  ;;  %999 = vst [vmem:[#allocation2 + $0x90] sm:$0xf] %v998_v23  ;;  %1000 = vst [vmem:[#allocation2 + $0x94] sm:$0xf] %v799_v20  ;;  %v371_v42 = vmax.f32 %v339_v30, 0.0  ;;  %v608_v48 = vrot.slane %v606_v39, 7  ;;  %v318_v1 = vadd.f32 %v5419_v22, %v279_v45 }
  0x24   : > { %1003 = vst [vmem:[#allocation2 + $0x98] sm:$0x1] %v1002_v24  ;;  %446 = vst [vmem:[#allocation2 + $0x9c] sm:$0x1] %v445_v32  ;;  %v5105_v8 = vld [vmem:[%s7005_s1 + $0x130] sm:$0xff]  }
  0x25   : > { %4536 = vmatpush3.bf16.msra.mxu0 %v5081_v28  ;;  %5057 = vmatpush3.bf16.msra.mxu1 %v5081_v28  ;;  %v1381_v27 = vsel %vm1369_vm6, %v1376_v11, %v1380_v3  ;;  %v4491_v28 = vpack.c.bf16 %v347_v14, %v347_v14  ;;  %v4515_v54 = vpack.c.bf16 %v371_v42, %v371_v42  ;;  %v613_v61 = vrot.slane %v608_v48, 4  ;;  %v263_v24 = vld [vmem:[%s5388_s22 + $0xd0] sm:$0xff]  ;;  %v264_v42 = vld [vmem:[%s5388_s22 + $0xd8] sm:$0xff] }
  0x26   : > { %4537 = vmatprep.subr.bf16.mxu0 %v5082_v31  ;;  %5050 = vmatprep.subr.bf16.mxu1 %v5082_v31  ;;  %v340_v31 = vadd.f32 %v5419_v22, %v301_v25  ;;  %469 = vst [vmem:[#allocation2 + $0x20] sm:$0x1] %v468_v52  ;;  %v611_v59 = vor.u32 %v609_v40, %v608_v48  ;;  %v350_v23 = vmax.f32 %v318_v1, 0.0  ;;  %v503_v48 = vld [vmem:[#allocation2 + $0xb0] sm:$0x1] }
  0x27   : > { %3227 = vmatprep.mubr.bf16.mxu0 %v1381_v27  ;;  %v601_v38 = vshll.u32 %v4491_v28, 16  ;;  %v925_v7 = vsel %vm5392_vm3, %v613_v61, %v924_v53  ;;  %v802_v9 = vshrl.u32 %v4515_v54, 16  ;;  %v805_v10 = vshll.u32 %v4515_v54, 16  ;;  %v5095_v61 = vld [vmem:[%s7005_s1 + $0xb0] sm:$0xff]  }
  0x28   : > { %926 = vst [vmem:[#allocation2 + $0x14] sm:$0x1] %v925_v7  ;;  %v302_v30 = vmul.f32 %v5414_v21, %v263_v24  ;;  %v4494_v39 = vpack.c.bf16 %v350_v23, %v350_v23  ;;  %v504_v1 = vsel %vm5400_vm4, 0, %v503_v48  ;;  %v241_v7 = vld [vmem:[%s5388_s22 + $0x20] sm:$0xff]  ;;  %v5099_v23 = vld [vmem:[%s7005_s1 + $0xa8] sm:$0xff]  }
  0x29   : > { %4538 = vmatpush3.bf16.msra.mxu0 %v5083_v37  ;;  %5058 = vmatpush3.bf16.msra.mxu1 %v5083_v37  ;;  %v598_v37 = vshrl.u32 %v4491_v28, 16  ;;  %v804_v19 = vrot.slane %v802_v9, 7  ;;  %v1008_v28 = vld [vmem:[#allocation2 + $0xa4] sm:$0x1]  ;;  %505 = vst [vmem:[#allocation2 + $0xb0] sm:$0x1] %v504_v1 }
  0x2a   : > { %4635 = vmatprep.subr.bf16.mxu1 %v5088_v43  ;;  %4747 = vmatprep.subr.bf16.mxu0 %v5089_v44  ;;  %v372_v43 = vmax.f32 %v340_v31, 0.0  ;;  %v278_v44 = vmul.f32 %v5414_v21, %v239_v35  ;;  %v1056_v63 = vld [vmem:[#allocation2 + $0x90] sm:$0xf]  ;;  %v1057_v0 = vld [vmem:[#allocation2 + $0x94] sm:$0xf]  ;;  %v5090_v31 = vld [vmem:[%s7005_s1 + $0xb8] sm:$0xff]   ;;  %v341_v54 = vadd.f32 %v5419_v22, %v302_v30 }
  0x2b   : > { %v600_v47 = vrot.slane %v598_v37, 7  ;;  %v4283_v2 = vcombine.low %v1056_v63, %v1057_v0  ;;  %v5087_v3 = vld [vmem:[#allocation2 + $0x98] ss:$0 sps:$4 sm:$0x11]   ;;  %v1004_v27 = vld [vmem:[#allocation2 + $0x9c] sm:$0xf]  ;;  %v807_v32 = vor.u32 %v805_v10, %v804_v19 }
  0x2c   : > { %3228 = vmatmul.mubr.bf16.vlgmr.msra.gmra.mxu0 %v4271_v49  ;;  %v412_v49 = vsel %vm5392_vm3, 0, %v411_v41  ;;  %v4516_v55 = vpack.c.bf16 %v372_v43, %v372_v43  ;;  %v317_v56 = vadd.f32 %v5419_v22, %v278_v44  ;;  %v1522_v17 = vshll.u32 %v5087_v3, 16  ;;  %v447_v43 = vld [vmem:[#allocation2 + $0xa8] sm:$0x1] }
  0x2d   : > { %4748 = vmatpush3.bf16.msra.mxu0 %v5091_v12  ;;  %413 = vst [vmem:[#allocation2 + $0x18] sm:$0x1] %v412_v49  ;;  %v603_v57 = vor.u32 %v601_v38, %v600_v47  ;;  %v604_v58 = vrot.slane %v600_v47, 4  ;;  %v1515_v14 = vshrl.u32 %v4283_v2, 16  ;;  %v1517_v15 = vshll.u32 %v4283_v2, 16  ;;  %v5094_v38 = vld [vmem:[%s7005_s1 + $0xf0] sm:$0xff]  }
  0x2e   : > { %4749 = vmatprep.subr.bf16.mxu0 %v5103_v62  ;;  %v810_v11 = vshrl.u32 %v4516_v55, 16  ;;  %v813_v12 = vshll.u32 %v4516_v55, 16  ;;  %v349_v18 = vmax.f32 %v317_v56, 0.0  ;;  %v1524_v26 = vrot.slane %v1522_v17, 1 }
  0x2f   : > { %v612_v5 = vsel %vm5461_vm8, %v604_v58, %v611_v59  ;;  %v921_v6 = vsel %vm5469_vm9, %v603_v57, %v920_v51  ;;  %v1519_v25 = vrot.slane %v1517_v15, 1  ;;  %v808_v33 = vrot.slane %v804_v19, 4  ;;  %v5540_v56 = vld [vmem:[#allocation2 + $0x14] ss:$0 sps:$4 sm:$0x11]  }
  0x30   : > { %922 = vst [vmem:[#allocation2 + $0xc] sm:$0xf] %v921_v6  ;;  %923 = vst [vmem:[#allocation2 + $0x10] sm:$0xf] %v612_v5  ;;  %v812_v20 = vrot.slane %v810_v11, 7  ;;  %v4493_v29 = vpack.c.bf16 %v349_v18, %v349_v18  ;;  %v1005_v45 = vsel %vm5469_vm9, %v807_v32, %v1004_v27  ;;  %v303_v47 = vmul.f32 %v5414_v21, %v264_v42 }
  0x31   : > { %4750 = vmatpush3.bf16.msra.mxu0 %v5105_v8  ;;  %v1520_v37 = vor.u32 %v1519_v25, %v1515_v14  ;;  %1006 = vst [vmem:[#allocation2 + $0x9c] sm:$0xf] %v1005_v45  ;;  %v623_v58 = vshrl.u32 %v4494_v39, 16  ;;  %v626_v59 = vshll.u32 %v4494_v39, 16  ;;  %v373_v63 = vmax.f32 %v341_v54, 0.0  ;;  %v5098_v8 = vld [vmem:[%s7005_s1 + $0xe8] sm:$0xff]  }
  0x32   : > { %v815_v35 = vor.u32 %v813_v12, %v812_v20  ;;  %v817_v36 = vrot.slane %v812_v20, 4  ;;  %v615_v40 = vshrl.u32 %v4493_v29, 16  ;;  %v618_v41 = vshll.u32 %v4493_v29, 16  ;;  %v242_v14 = vld [vmem:[%s5388_s22 + $0x28] sm:$0xff]  ;;  %v931_v19 = vld [vmem:[#allocation2 + $0x20] sm:$0x1] }
  0x33   : > { %v1525_v51 = vsel %vm1369_vm6, %v1520_v37, %v1524_v26  ;;  %v342_v62 = vadd.f32 %v5419_v22, %v303_v47  ;;  %v448_v0 = vsel %vm5392_vm3, 0, %v447_v43  ;;  %v625_v10 = vrot.slane %v623_v58, 7  ;;  %v5102_v26 = vld [vmem:[%s7005_s1 + $0xe0] sm:$0xff]   ;;  %v5108_v54 = vld [vmem:[%s7005_s1 + $0xd8] sm:$0xff]  }
  0x34   : > { %v816_v44 = vsel %vm5461_vm8, %v808_v33, %v815_v35  ;;  %v1009_v46 = vsel %vm5392_vm3, %v817_v36, %v1008_v28  ;;  %v927_v53 = vld [vmem:[#allocation2 + $0x18] sm:$0xf]  ;;  %3323 = vmatprep.mubr.bf16.mxu1 %v1525_v51  ;;  %v617_v57 = vrot.slane %v615_v40, 7  ;;  %449 = vst [vmem:[#allocation2 + $0xa8] sm:$0x1] %v448_v0  ;;  %v4517_v12 = vpack.c.bf16 %v373_v63, %v373_v63  ;;  %v5104_v43 = vld [vmem:[%s7005_s1 + $0xa0] sm:$0xff]  }
  0x35   : > { %1007 = vst [vmem:[#allocation2 + $0xa0] sm:$0xf] %v816_v44  ;;  %1010 = vst [vmem:[#allocation2 + $0xa4] sm:$0x1] %v1009_v46  ;;  %3324 = vmatmul.mubr.bf16.vlgmr.msra.gmra.mxu1 %v4283_v2  ;;  %v1390_v2 = vshll.u32 %v5540_v56, 16  ;;  %v374_v11 = vmax.f32 %v342_v62, 0.0  ;;  %v280_v20 = vmul.f32 %v5414_v21, %v241_v7  ;;  %v628_v24 = vor.u32 %v626_v59, %v625_v10 }
  0x36   : > { %4636 = vmatpush3.bf16.msra.mxu1 %v5090_v31  ;;  %v620_v6 = vor.u32 %v618_v41, %v617_v57  ;;  %v621_v9 = vrot.slane %v617_v57, 4  ;;  %v630_v25 = vrot.slane %v625_v10, 4  ;;  %v819_v28 = vshrl.u32 %v4517_v12, 16  ;;  %v414_v35 = vld [vmem:[#allocation2 + $0x24] sm:$0x1]  ;;  %v266_v0 = vld [vmem:[%s5388_s22 + $0xe8] sm:$0xff] }
  0x37   : > { %v1034_v49 = vld [vmem:[#allocation2 + $0xc] sm:$0xf]  ;;  %v5534_v52 = vld [vmem:[#allocation2 + $0x10] sm:$0xf]  ;;  %4637 = vmatprep.subr.bf16.mxu1 %v5094_v38  ;;  %v1392_v17 = vrot.slane %v1390_v2, 1  ;;  %v4518_v27 = vpack.c.bf16 %v374_v11, %v374_v11  ;;  %v281_v32 = vmul.f32 %v5414_v21, %v242_v14  ;;  %v319_v33 = vadd.f32 %v5419_v22, %v280_v20  ;;  %v265_v63 = vld [vmem:[%s5388_s22 + $0xe0] sm:$0xff] }
  0x38   : > { %v5538_v55 = vcombine.low %v1034_v49, %v5534_v52  ;;  %v928_v18 = vsel %vm5469_vm9, %v620_v6, %v927_v53  ;;  %v1058_v30 = vld [vmem:[#allocation2 + $0x9c] sm:$0xf]  ;;  %v470_v36 = vld [vmem:[#allocation2 + $0x2c] sm:$0x1]  ;;  %v629_v39 = vsel %vm5461_vm8, %v621_v9, %v628_v24  ;;  %v932_v40 = vsel %vm5392_vm3, %v630_v25, %v931_v19  ;;  %v1015_v59 = vld [vmem:[#allocation2 + $0xb0] sm:$0x1] }
  0x39   : > { %929 = vst [vmem:[#allocation2 + $0x18] sm:$0xf] %v928_v18  ;;  %v821_v41 = vrot.slane %v819_v28, 7  ;;  %930 = vst [vmem:[#allocation2 + $0x1c] sm:$0xf] %v629_v39  ;;  %v822_v44 = vshll.u32 %v4517_v12, 16  ;;  %v304_v18 = vmul.f32 %v5414_v21, %v265_v63  ;;  %v305_v19 = vmul.f32 %v5414_v21, %v266_v0 }
  0x3a   : > { %v1383_v3 = vshrl.u32 %v5538_v55, 16  ;;  %v1385_v5 = vshll.u32 %v5538_v55, 16  ;;  %4638 = vmatpush3.bf16.msra.mxu1 %v5095_v61  ;;  %933 = vst [vmem:[#allocation2 + $0x20] sm:$0x1] %v932_v40  ;;  %v827_v45 = vshrl.u32 %v4518_v27, 16  ;;  %v830_v46 = vshll.u32 %v4518_v27, 16 }
  0x3b   : > { %4639 = vmatprep.subr.bf16.mxu1 %v5098_v8  ;;  %v825_v49 = vrot.slane %v821_v41, 4  ;;  %v1011_v53 = vld [vmem:[#allocation2 + $0xa8] sm:$0xf]  ;;  %v824_v57 = vor.u32 %v822_v44, %v821_v41  ;;  %v320_v61 = vadd.f32 %v5419_v22, %v281_v32  ;;  %v351_v62 = vmax.f32 %v319_v33, 0.0  ;;  %v450_v6 = vld [vmem:[#allocation2 + $0xb4] sm:$0x1] }
  0x3c   : > { %v1387_v15 = vrot.slane %v1385_v5, 1  ;;  %v1059_v31 = vld [vmem:[#allocation2 + $0xa0] sm:$0xf]  ;;  %v5097_v38 = vld [vmem:[#allocation2 + $0xa4] ss:$0 sps:$4 sm:$0x11]   ;;  %v344_v39 = vadd.f32 %v5419_v22, %v305_v19 }
  0x3d   : > { %v5569_v37 = vcombine.low %v1058_v30, %v1059_v31  ;;  %v1534_v51 = vshll.u32 %v5097_v38, 16  ;;  %v829_v58 = vrot.slane %v827_v45, 7  ;;  %v415_v5 = vsel %vm5392_vm3, 0, %v414_v35  ;;  %v5109_v10 = vld [vmem:[%s7005_s1 + $0x98] sm:$0xff]   ;;  %v5113_v38 = vld [vmem:[%s7005_s1 + $0x90] sm:$0xff]   ;;  %v5119_v44 = vld [vmem:[%s7005_s1 + $0x128] sm:$0xff]  }
  0x3e   : > { %v1388_v29 = vor.u32 %v1387_v15, %v1383_v3  ;;  %4640 = vmatpush3.bf16.msra.mxu1 %v5099_v23  ;;  %v471_v2 = vsel %vm5400_vm4, 0, %v470_v36  ;;  %v1012_v9 = vsel %vm5469_vm9, %v824_v57, %v1011_v53  ;;  %v352_v11 = vmax.f32 %v320_v61, 0.0  ;;  %416 = vst [vmem:[#allocation2 + $0x24] sm:$0x1] %v415_v5  ;;  %v506_v12 = vld [vmem:[#allocation2 + $0xbc] sm:$0x1] }
  0x3f   : > { %v1527_v47 = vshrl.u32 %v5569_v37, 16  ;;  %v1529_v48 = vshll.u32 %v5569_v37, 16  ;;  %v1536_v3 = vrot.slane %v1534_v51, 1  ;;  %4641 = vmatprep.subr.bf16.mxu1 %v5102_v26  ;;  %v832_v7 = vor.u32 %v830_v46, %v829_v58  ;;  %472 = vst [vmem:[#allocation2 + $0x2c] sm:$0x1] %v471_v2  ;;  %v5117_v26 = vld [vmem:[%s7005_s1 + $0x168] sm:$0xff]  }
  0x40   : > { %v1393_v42 = vsel %vm1369_vm6, %v1388_v29, %v1392_v17  ;;  %v834_v8 = vrot.slane %v829_v58, 4  ;;  %1013 = vst [vmem:[#allocation2 + $0xa8] sm:$0xf] %v1012_v9  ;;  %v4495_v15 = vpack.c.bf16 %v351_v62, %v351_v62  ;;  %v5112_v17 = vld [vmem:[%s7005_s1 + $0xd0] sm:$0xff]   ;;  %v4496_v24 = vpack.c.bf16 %v352_v11, %v352_v11  ;;  %v5612_v28 = vld [vmem:[#allocation2 + $0x1c] sm:$0xf]  ;;  %4751 = vmatprep.subr.bf16.mxu0 %v5117_v26 }
  0x41   : > { %3235 = vmatprep.mubr.bf16.mxu0 %v1393_v42  ;;  %v1531_v1 = vrot.slane %v1529_v48, 1  ;;  %v833_v20 = vsel %vm5461_vm8, %v825_v49, %v832_v7  ;;  %v451_v25 = vsel %vm5392_vm3, 0, %v450_v6  ;;  %v343_v31 = vadd.f32 %v5419_v22, %v304_v18  ;;  %v5618_v33 = vld [vmem:[#allocation2 + $0x20] ss:$0 sps:$4 sm:$0x11]   ;;  %4752 = vmatpush3.bf16.msra.mxu0 %v5119_v44  ;;  %v5118_v0 = vld [vmem:[%s7005_s1 + $0x88] sm:$0xff]  }
  0x42   : > { %3236 = vmatmul.mubr.bf16.gmra.mxu0 %v5538_v55  ;;  %v1036_v55 = vld [vmem:[#allocation2 + $0x18] sm:$0xf]  ;;  %4642 = vmatpush3.bf16.msra.mxu1 %v5104_v43  ;;  %v1016_v23 = vsel %vm5392_vm3, %v834_v8, %v1015_v59  ;;  %1014 = vst [vmem:[#allocation2 + $0xac] sm:$0xf] %v833_v20  ;;  %v632_v29 = vshrl.u32 %v4495_v15, 16  ;;  %v635_v30 = vshll.u32 %v4495_v15, 16 }
  0x43   : > { %v1532_v14 = vor.u32 %v1531_v1, %v1527_v47  ;;  %1017 = vst [vmem:[#allocation2 + $0xb0] sm:$0x1] %v1016_v23  ;;  %4643 = vmatprep.subr.bf16.mxu1 %v5108_v54  ;;  %452 = vst [vmem:[#allocation2 + $0xb4] sm:$0x1] %v451_v25  ;;  %v5616_v32 = vcombine.low %v1036_v55, %v5612_v28  ;;  %v640_v35 = vshrl.u32 %v4496_v24, 16  ;;  %v643_v36 = vshll.u32 %v4496_v24, 16 }
  0x44   : > { %v634_v40 = vrot.slane %v632_v29, 7  ;;  %v375_v41 = vmax.f32 %v343_v31, 0.0  ;;  %v507_v42 = vsel %vm5400_vm4, 0, %v506_v12  ;;  %v5116_v43 = vld [vmem:[%s7005_s1 + $0xc8] sm:$0xff]   ;;  %v1402_v47 = vshll.u32 %v5618_v33, 16  ;;  %v243_v1 = vld [vmem:[%s5388_s22 + $0x30] sm:$0xff] }
  0x45   : > { %v1537_v27 = vsel %vm1369_vm6, %v1532_v14, %v1536_v3  ;;  %v1395_v45 = vshrl.u32 %v5616_v32, 16  ;;  %v1397_v46 = vshll.u32 %v5616_v32, 16  ;;  %508 = vst [vmem:[#allocation2 + $0xbc] sm:$0x1] %v507_v42  ;;  %v934_v49 = vld [vmem:[#allocation2 + $0x24] sm:$0xf]  ;;  %v282_v14 = vmul.f32 %v5414_v21, %v243_v1 }
  0x46   : > { %3331 = vmatprep.mubr.bf16.mxu1 %v1537_v27  ;;  %4644 = vmatpush3.bf16.msra.mxu1 %v5109_v10  ;;  %v637_v48 = vor.u32 %v635_v30, %v634_v40  ;;  %v638_v51 = vrot.slane %v634_v40, 4  ;;  %v938_v53 = vld [vmem:[#allocation2 + $0x2c] sm:$0x1]  ;;  %v376_v54 = vmax.f32 %v344_v39, 0.0  ;;  %v4519_v57 = vpack.c.bf16 %v375_v41, %v375_v41  ;;  %v244_v55 = vld [vmem:[%s5388_s22 + $0x38] sm:$0xff]  ;;  %v5122_v7 = vld [vmem:[%s7005_s1 + $0xc0] sm:$0xff]  }
  0x47   : > { %3332 = vmatmul.mubr.bf16.gmra.mxu1 %v5569_v37  ;;  %v642_v37 = vrot.slane %v640_v35, 7  ;;  %4645 = vmatprep.subr.bf16.mxu1 %v5112_v17  ;;  %v1399_v58 = vrot.slane %v1397_v46, 1  ;;  %v1404_v59 = vrot.slane %v1402_v47, 1  ;;  %v1060_v61 = vld [vmem:[#allocation2 + $0xa8] sm:$0xf]  ;;  %v283_v24 = vmul.f32 %v5414_v21, %v244_v55  ;;  %v5123_v42 = vld [vmem:[%s7005_s1 + $0x80] sm:$0xff]  }
  0x48   : > { %v935_v3 = vsel %vm5469_vm9, %v637_v48, %v934_v49  ;;  %v4520_v5 = vpack.c.bf16 %v376_v54, %v376_v54  ;;  %v836_v2 = vshrl.u32 %v4519_v57, 16  ;;  %v839_v6 = vshll.u32 %v4519_v57, 16  ;;  %v417_v26 = vld [vmem:[#allocation2 + $0x30] sm:$0x1]  ;;  %v473_v27 = vld [vmem:[#allocation2 + $0x38] sm:$0x1] }
  0x49   : > { %v645_v62 = vor.u32 %v643_v36, %v642_v37  ;;  %v647_v63 = vrot.slane %v642_v37, 4  ;;  %v1400_v8 = vor.u32 %v1399_v58, %v1395_v45  ;;  %v1061_v9 = vld [vmem:[#allocation2 + $0xac] sm:$0xf]  ;;  %936 = vst [vmem:[#allocation2 + $0x24] sm:$0xf] %v935_v3  ;;  %v321_v25 = vadd.f32 %v5419_v22, %v282_v14  ;;  %v245_v57 = vld [vmem:[%s5388_s22 + $0x40] sm:$0xff] }
  0x4a   : > { %4646 = vmatpush3.bf16.msra.mxu1 %v5113_v38  ;;  %v1018_v12 = vld [vmem:[#allocation2 + $0xb4] sm:$0xf]  ;;  %v4285_v15 = vcombine.low %v1060_v61, %v1061_v9  ;;  %v5107_v17 = vld [vmem:[#allocation2 + $0xb0] ss:$0 sps:$4 sm:$0x11]   ;;  %v838_v18 = vrot.slane %v836_v2, 7  ;;  %v322_v40 = vadd.f32 %v5419_v22, %v283_v24 }
  0x4b   : > { %v646_v10 = vsel %vm5461_vm8, %v638_v51, %v645_v62  ;;  %v939_v11 = vsel %vm5392_vm3, %v647_v63, %v938_v53  ;;  %v844_v19 = vshrl.u32 %v4520_v5, 16  ;;  %v847_v20 = vshll.u32 %v4520_v5, 16  ;;  %4647 = vmatprep.subr.bf16.mxu1 %v5116_v43  ;;  %v246_v2 = vld [vmem:[%s5388_s22 + $0x48] sm:$0xff] }
  0x4c   : > { %937 = vst [vmem:[#allocation2 + $0x28] sm:$0xf] %v646_v10  ;;  %940 = vst [vmem:[#allocation2 + $0x2c] sm:$0x1] %v939_v11  ;;  %v1405_v23 = vsel %vm1369_vm6, %v1400_v8, %v1404_v59  ;;  %v1539_v29 = vshrl.u32 %v4285_v15, 16  ;;  %v1541_v30 = vshll.u32 %v4285_v15, 16  ;;  %v841_v35 = vor.u32 %v839_v6, %v838_v18 }
  0x4d   : > { %3243 = vmatprep.mubr.bf16.mxu0 %v1405_v23  ;;  %v1546_v31 = vshll.u32 %v5107_v17, 16  ;;  %v1022_v36 = vld [vmem:[#allocation2 + $0xbc] sm:$0x1]  ;;  %v842_v38 = vrot.slane %v838_v18, 4  ;;  %v846_v39 = vrot.slane %v844_v19, 7  ;;  %v353_v41 = vmax.f32 %v321_v25, 0.0 }
  0x4e   : > { %3244 = vmatmul.mubr.bf16.gmra.mxu0 %v5616_v32  ;;  %4648 = vmatpush3.bf16.msra.mxu1 %v5118_v0  ;;  %v1543_v43 = vrot.slane %v1541_v30, 1  ;;  %v1019_v45 = vsel %vm5469_vm9, %v841_v35, %v1018_v12  ;;  %v418_v46 = vsel %vm5392_vm3, 0, %v417_v26  ;;  %v5126_v32 = vld [vmem:[%s7005_s1 + $0x1f8] sm:$0xff]   ;;  %v354_v48 = vmax.f32 %v322_v40, 0.0  ;;  %v1080_v17 = vld [vmem:[#allocation2] sm:$0xe] }
  0x4f   : > { %v1548_v44 = vrot.slane %v1546_v31, 1  ;;  %4649 = vmatprep.subr.bf16.mxu1 %v5122_v7  ;;  %v849_v47 = vor.u32 %v847_v20, %v846_v39  ;;  %v851_v37 = vrot.slane %v846_v39, 4  ;;  %1020 = vst [vmem:[#allocation2 + $0xb4] sm:$0xf] %v1019_v45  ;;  %419 = vst [vmem:[#allocation2 + $0x30] sm:$0x1] %v418_v46  ;;  %v4497_v54 = vpack.c.bf16 %v353_v41, %v353_v41 }
  0x50   : > { %v474_v51 = vsel %vm5400_vm4, 0, %v473_v27  ;;  %v1544_v49 = vor.u32 %v1543_v43, %v1539_v29  ;;  %v1038_v53 = vld [vmem:[#allocation2 + $0x24] sm:$0xf]  ;;  %v4498_v62 = vpack.c.bf16 %v354_v48, %v354_v48  ;;  %v284_v7 = vmul.f32 %v5414_v21, %v245_v57  ;;  %v420_v39 = vld [vmem:[#allocation2 + $0x3c] sm:$0x1] }
  0x51   : > { %475 = vst [vmem:[#allocation2 + $0x38] sm:$0x1] %v474_v51  ;;  %v850_v59 = vsel %vm5461_vm8, %v842_v38, %v849_v47  ;;  %v1023_v61 = vsel %vm5392_vm3, %v851_v37, %v1022_v36  ;;  %v649_v3 = vshrl.u32 %v4497_v54, 16  ;;  %v652_v5 = vshll.u32 %v4497_v54, 16  ;;  %v476_v40 = vld [vmem:[#allocation2 + $0x44] sm:$0x1] }
  0x52   : > { %4650 = vmatpush3.bf16.msra.mxu1 %v5123_v42  ;;  %v1549_v63 = vsel %vm1369_vm6, %v1544_v49, %v1548_v44  ;;  %1021 = vst [vmem:[#allocation2 + $0xb8] sm:$0xf] %v850_v59  ;;  %1024 = vst [vmem:[#allocation2 + $0xbc] sm:$0x1] %v1023_v61  ;;  %v657_v6 = vshrl.u32 %v4498_v62, 16  ;;  %v660_v55 = vshll.u32 %v4498_v62, 16  ;;  %v285_v18 = vmul.f32 %v5414_v21, %v246_v2 }
  0x53   : > { %v5669_v58 = vld [vmem:[#allocation2 + $0x28] sm:$0xf]  ;;  %v5677_v1 = vld [vmem:[#allocation2 + $0x2c] ss:$0 sps:$4 sm:$0x11]   ;;  %4859 = vmatprep.subr.bf16.mxu1 %v5126_v32  ;;  %3339 = vmatprep.mubr.bf16.mxu1 %v1549_v63  ;;  %v651_v11 = vrot.slane %v649_v3, 7  ;;  %v4303_v31 = vcombine.low %v1080_v17, %v5438_v34 }
  0x54   : > { %v4274_v0 = vcombine.low %v1038_v53, %v5669_v58  ;;  %3340 = vmatmul.mubr.bf16.gmra.mxu1 %v4285_v15  ;;  %v1414_v10 = vshll.u32 %v5677_v1, 16  ;;  %v1628_v12 = vrot.slane %v5454_v50, 1  ;;  %v659_v14 = vrot.slane %v657_v6, 7  ;;  %v5131_v15 = vld [vmem:[%s7005_s1 + $0x160] sm:$0xff]   ;;  %v247_v37 = vld [vmem:[%s5388_s22 + $0x50] sm:$0xff]  ;;  %v248_v61 = vld [vmem:[%s5388_s22 + $0x58] sm:$0xff] }
  0x55   : > { %v654_v24 = vor.u32 %v652_v5, %v651_v11  ;;  %v655_v25 = vrot.slane %v651_v11, 4  ;;  %v323_v50 = vadd.f32 %v5419_v22, %v284_v7  ;;  %v5132_v21 = vld [vmem:[%s7005_s1 + $0x120] sm:$0xff]   ;;  %v324_v38 = vadd.f32 %v5419_v22, %v285_v18  ;;  %4753 = vmatprep.subr.bf16.mxu0 %v5131_v15  ;;  %v1096_v62 = vld [vmem:[#allocation2 + $0xc] sm:$0xf]  ;;  %v5716_v7 = vld [vmem:[#allocation2 + $0x10] sm:$0xf] }
  0x56   : > { %v1407_v8 = vshrl.u32 %v4274_v0, 16  ;;  %v1409_v9 = vshll.u32 %v4274_v0, 16  ;;  %v1416_v20 = vrot.slane %v1414_v10, 1  ;;  %v1062_v23 = vld [vmem:[#allocation2 + $0xb4] sm:$0xf]  ;;  %v662_v26 = vor.u32 %v660_v55, %v659_v14  ;;  %4754 = vmatpush3.bf16.msra.mxu0 %v5132_v21  ;;  %v5140_v18 = vld [vmem:[%s7005_s1 + $0x158] sm:$0xff]  }
  0x57   : > { %v664_v27 = vrot.slane %v659_v14, 4  ;;  %v941_v29 = vld [vmem:[#allocation2 + $0x30] sm:$0xf]  ;;  %v1627_v43 = vrot.slane %v4303_v31, 1  ;;  %v355_v44 = vmax.f32 %v323_v50, 0.0  ;;  %v356_v22 = vmax.f32 %v324_v38, 0.0  ;;  %4755 = vmatprep.subr.bf16.mxu0 %v5140_v18 }
  0x58   : > { %v1411_v19 = vrot.slane %v1409_v9, 1  ;;  %v945_v30 = vld [vmem:[#allocation2 + $0x38] sm:$0x1]  ;;  %v942_v36 = vsel %vm5469_vm9, %v654_v24, %v941_v29  ;;  %v663_v34 = vsel %vm5461_vm8, %v655_v25, %v662_v26  ;;  %v421_v47 = vsel %vm5392_vm3, 0, %v420_v39  ;;  %v5712_v5 = vld [vmem:[%s7006_s2] ss:$0 sm:$0xff] }
  0x59   : > { %v1063_v41 = vld [vmem:[#allocation2 + $0xb8] sm:$0xf]  ;;  %943 = vst [vmem:[#allocation2 + $0x30] sm:$0xf] %v942_v36  ;;  %v946_v42 = vsel %vm5392_vm3, %v664_v27, %v945_v30  ;;  %944 = vst [vmem:[#allocation2 + $0x34] sm:$0xf] %v663_v34  ;;  %v5704_v48 = vsel %vm1626_vm10, %v1627_v43, %v1628_v12  ;;  %v4499_v49 = vpack.c.bf16 %v355_v44, %v355_v44 }
  0x5a   : > { %v1412_v35 = vor.u32 %v1411_v19, %v1407_v8  ;;  %v4286_v46 = vcombine.low %v1062_v23, %v1063_v41  ;;  %v5115_v32 = vld [vmem:[#allocation2 + $0xbc] ss:$0 sps:$4 sm:$0x11]   ;;  %947 = vst [vmem:[#allocation2 + $0x38] sm:$0x1] %v946_v42  ;;  %v477_v51 = vsel %vm5400_vm4, 0, %v476_v40  ;;  %v4500_v59 = vpack.c.bf16 %v356_v22, %v356_v22 }
  0x5b   : > { %422 = vst [vmem:[#allocation2 + $0x3c] sm:$0x1] %v421_v47  ;;  %v1558_v57 = vshll.u32 %v5115_v32, 16  ;;  %478 = vst [vmem:[#allocation2 + $0x44] sm:$0x1] %v477_v51  ;;  %v666_v63 = vshrl.u32 %v4499_v49, 16  ;;  %v286_v2 = vmul.f32 %v5712_v5, %v247_v37  ;;  %v287_v6 = vmul.f32 %v5712_v5, %v248_v61 }
  0x5c   : > { %v1417_v45 = vsel %vm1369_vm6, %v1412_v35, %v1416_v20  ;;  %v1551_v53 = vshrl.u32 %v4286_v46, 16  ;;  %v1553_v54 = vshll.u32 %v4286_v46, 16  ;;  %v669_v3 = vshll.u32 %v4499_v49, 16  ;;  %v1081_v11 = vld [vmem:[#allocation2 + $0xc] sm:$0xe]  ;;  %v5128_v61 = vld [vmem:[%s7005_s1 + $0x1b8] sm:$0xff]  }
  0x5d   : > { %3251 = vmatprep.mubr.bf16.mxu0 %v1417_v45  ;;  %v674_v8 = vshrl.u32 %v4500_v59, 16  ;;  %v677_v9 = vshll.u32 %v4500_v59, 16  ;;  %v668_v10 = vrot.slane %v666_v63, 7  ;;  %v5721_v12 = vld [vmem:[%s7007_s3] ss:$0 sm:$0xff]  ;;  %v5731_v15 = vcombine.low %v1096_v62, %v5716_v7 }
  0x5e   : > { %3252 = vmatmul.mubr.bf16.gmra.mxu0 %v4274_v0  ;;  %v1555_v55 = vrot.slane %v1553_v54, 1  ;;  %v1560_v0 = vrot.slane %v1558_v57, 1  ;;  %v325_v14 = vadd.f32 %v5721_v12, %v286_v2  ;;  %v326_v17 = vadd.f32 %v5721_v12, %v287_v6  ;;  %v423_v24 = vld [vmem:[#allocation2 + $0x48] sm:$0x1]  ;;  %v479_v32 = vld [vmem:[#allocation2 + $0x50] sm:$0x1] }
  0x5f   : > { %v676_v23 = vrot.slane %v674_v8, 7  ;;  %v671_v26 = vor.u32 %v669_v3, %v668_v10  ;;  %v672_v27 = vrot.slane %v668_v10, 4  ;;  %v4304_v29 = vcombine.low %v1081_v11, %v5534_v52  ;;  %v5143_v52 = vld [vmem:[%s7005_s1 + $0x118] sm:$0xff]   ;;  %v5141_v6 = vld [vmem:[%s7005_s1 + $0x1f0] sm:$0xff]   ;;  %v1100_v10 = vld [vmem:[#allocation2 + $0x24] sm:$0xf] }
  0x60   : > { %v1556_v19 = vor.u32 %v1555_v55, %v1551_v53  ;;  %v1040_v20 = vld [vmem:[#allocation2 + $0x30] sm:$0xf]  ;;  %v5728_v25 = vld [vmem:[#allocation2 + $0x34] sm:$0xf]  ;;  %v1631_v40 = vrot.slane %v5540_v56, 1  ;;  %v357_v41 = vmax.f32 %v325_v14, 0.0  ;;  %4756 = vmatpush3.bf16.msra.mxu0 %v5143_v52 }
  0x61   : > { %v4275_v31 = vcombine.low %v1040_v20, %v5728_v25  ;;  %v5736_v50 = vld [vmem:[#allocation2 + $0x38] ss:$0 sps:$4 sm:$0x11]   ;;  %v679_v21 = vor.u32 %v677_v9, %v676_v23  ;;  %v681_v35 = vrot.slane %v676_v23, 4  ;;  %v358_v34 = vmax.f32 %v326_v17, 0.0  ;;  %v250_v17 = vld [vmem:[%s5388_s22 + $0x68] sm:$0xff] }
  0x62   : > { %v1561_v30 = vsel %vm1369_vm6, %v1556_v19, %v1560_v0  ;;  %v948_v36 = vld [vmem:[#allocation2 + $0x3c] sm:$0xf]  ;;  %v952_v39 = vld [vmem:[#allocation2 + $0x44] sm:$0x1]  ;;  %v1426_v44 = vshll.u32 %v5736_v50, 16  ;;  %v1630_v37 = vrot.slane %v4304_v29, 1  ;;  %v4501_v57 = vpack.c.bf16 %v357_v41, %v357_v41 }
  0x63   : > { %3347 = vmatprep.mubr.bf16.mxu1 %v1561_v30  ;;  %v949_v38 = vsel %vm5469_vm9, %v671_v26, %v948_v36  ;;  %v1419_v42 = vshrl.u32 %v4275_v31, 16  ;;  %v1421_v43 = vshll.u32 %v4275_v31, 16  ;;  %v680_v45 = vsel %vm5461_vm8, %v672_v27, %v679_v21  ;;  %v1098_v47 = vld [vmem:[#allocation2 + $0x18] sm:$0xf]  ;;  %v5754_v54 = vld [vmem:[#allocation2 + $0x1c] sm:$0xf] }
  0x64   : > { %3348 = vmatmul.mubr.bf16.gmra.mxu1 %v4286_v46  ;;  %950 = vst [vmem:[#allocation2 + $0x3c] sm:$0xf] %v949_v38  ;;  %951 = vst [vmem:[#allocation2 + $0x40] sm:$0xf] %v680_v45  ;;  %v953_v22 = vsel %vm5392_vm3, %v681_v35, %v952_v39  ;;  %v424_v46 = vsel %vm5392_vm3, 0, %v423_v24  ;;  %v480_v51 = vsel %vm5400_vm4, 0, %v479_v32  ;;  %v4502_v59 = vpack.c.bf16 %v358_v34, %v358_v34 }
  0x65   : > { %3388 = vmatprep.mubr.bf16.mxu1 %v5731_v15  ;;  %v1423_v49 = vrot.slane %v1421_v43, 1  ;;  %v1428_v53 = vrot.slane %v1426_v44, 1  ;;  %954 = vst [vmem:[#allocation2 + $0x44] sm:$0x1] %v953_v22  ;;  %425 = vst [vmem:[#allocation2 + $0x48] sm:$0x1] %v424_v46  ;;  %v5764_v8 = vcombine.low %v1098_v47, %v5754_v54  ;;  %v289_v30 = vmul.f32 %v5712_v5, %v250_v17 }
  0x66   : > { %481 = vst [vmem:[#allocation2 + $0x50] sm:$0x1] %v480_v51  ;;  %v683_v63 = vshrl.u32 %v4501_v57, 16  ;;  %v686_v3 = vshll.u32 %v4501_v57, 16  ;;  %v691_v2 = vshrl.u32 %v4502_v59, 16  ;;  %v249_v0 = vld [vmem:[%s5388_s22 + $0x60] sm:$0xff] }
  0x67   : > { %v1424_v62 = vor.u32 %v1423_v49, %v1419_v42  ;;  %v1082_v55 = vld [vmem:[#allocation2 + $0x18] sm:$0xe]  ;;  %v694_v9 = vshll.u32 %v4502_v59, 16  ;;  %v5766_v11 = vld [vmem:[#allocation2 + $0x28] sm:$0xf]  ;;  %v288_v23 = vmul.f32 %v5712_v5, %v249_v0  ;;  %v1634_v27 = vrot.slane %v5618_v33, 1 }
  0x68   : > { %v4305_v14 = vcombine.low %v1082_v55, %v5612_v28  ;;  %v685_v19 = vrot.slane %v683_v63, 7  ;;  %v693_v20 = vrot.slane %v691_v2, 7  ;;  %v5144_v29 = vld [vmem:[%s7005_s1 + $0x1b0] sm:$0xff]   ;;  %v5797_v45 = vcombine.low %v1100_v10, %v5766_v11  ;;  %v482_v22 = vld [vmem:[#allocation2 + $0x5c] sm:$0x1] }
  0x69   : > { %v1429_v18 = vsel %vm1369_vm6, %v1424_v62, %v1428_v53  ;;  %v426_v39 = vld [vmem:[#allocation2 + $0x54] sm:$0x1]  ;;  %v327_v52 = vadd.f32 %v5721_v12, %v288_v23  ;;  %v328_v32 = vadd.f32 %v5721_v12, %v289_v30  ;;  %v483_v57 = vsel %vm5400_vm4, 0, %v482_v22  ;;  %v252_v59 = vld [vmem:[%s5388_s22 + $0x78] sm:$0xff]  ;;  %v1083_v63 = vld [vmem:[#allocation2 + $0x24] sm:$0xe] }
  0x6a   : > { %3259 = vmatprep.mubr.bf16.mxu0 %v1429_v18  ;;  %v5772_v26 = vrot.slane %v4305_v14, 1  ;;  %v688_v21 = vor.u32 %v686_v3, %v685_v19  ;;  %v689_v35 = vrot.slane %v685_v19, 4  ;;  %v696_v36 = vor.u32 %v694_v9, %v693_v20  ;;  %v251_v46 = vld [vmem:[%s5388_s22 + $0x70] sm:$0xff]  ;;  %484 = vst [vmem:[#allocation2 + $0x5c] sm:$0x1] %v483_v57 }
  0x6b   : > { %v1042_v24 = vld [vmem:[#allocation2 + $0x3c] sm:$0xf]  ;;  %3260 = vmatmul.mubr.bf16.gmra.mxu0 %v4275_v31  ;;  %v5780_v28 = vld [vmem:[#allocation2 + $0x40] sm:$0xf]  ;;  %v698_v38 = vrot.slane %v693_v20, 4  ;;  %v1632_v31 = vsel %vm1626_vm10, %v1630_v37, %v1631_v40  ;;  %v359_v49 = vmax.f32 %v327_v52, 0.0  ;;  %v290_v2 = vmul.f32 %v5712_v5, %v251_v46 }
  0x6c   : > { %3389 = vmatmul.mubr.bf16.vlgmr.msra.gmra.mxu1 %v5704_v48  ;;  %v5783_v41 = vcombine.low %v1042_v24, %v5780_v28  ;;  %v5785_v34 = vld [vmem:[#allocation2 + $0x44] ss:$0 sps:$4 sm:$0x11]   ;;  %v427_v48 = vsel %vm5392_vm3, 0, %v426_v39  ;;  %v697_v42 = vsel %vm5461_vm8, %v689_v35, %v696_v36  ;;  %v955_v43 = vld [vmem:[#allocation2 + $0x48] sm:$0xf]  ;;  %v4306_v18 = vcombine.low %v1083_v63, %v5669_v58 }
  0x6d   : > { %4860 = vmatpush3.bf16.msra.mxu1 %v5128_v61  ;;  %3396 = vmatprep.mubr.bf16.mxu1 %v5764_v8  ;;  %v959_v44 = vld [vmem:[#allocation2 + $0x50] sm:$0x1]  ;;  %428 = vst [vmem:[#allocation2 + $0x54] sm:$0x1] %v427_v48  ;;  %v1438_v40 = vshll.u32 %v5785_v34, 16  ;;  %v956_v37 = vsel %vm5469_vm9, %v688_v21, %v955_v43  ;;  %v360_v53 = vmax.f32 %v328_v32, 0.0  ;;  %v291_v19 = vmul.f32 %v5712_v5, %v252_v59 }
  0x6e   : > { %4861 = vmatprep.subr.bf16.mxu1 %v5141_v6  ;;  %v1431_v47 = vshrl.u32 %v5783_v41, 16  ;;  %v1433_v56 = vshll.u32 %v5783_v41, 16  ;;  %958 = vst [vmem:[#allocation2 + $0x4c] sm:$0xf] %v697_v42  ;;  %957 = vst [vmem:[#allocation2 + $0x48] sm:$0xf] %v956_v37  ;;  %v960_v51 = vsel %vm5392_vm3, %v698_v38, %v959_v44  ;;  %v4503_v6 = vpack.c.bf16 %v359_v49, %v359_v49 }
  0x6f   : > { %v1440_v62 = vrot.slane %v1438_v40, 1  ;;  %961 = vst [vmem:[#allocation2 + $0x50] sm:$0x1] %v960_v51  ;;  %v1637_v3 = vrot.slane %v5677_v1, 1  ;;  %v4504_v55 = vpack.c.bf16 %v360_v53, %v360_v53  ;;  %v1102_v0 = vld [vmem:[#allocation2 + $0x30] sm:$0xf]  ;;  %v329_v20 = vadd.f32 %v5721_v12, %v290_v2 }
  0x70   : > { %v1435_v61 = vrot.slane %v1433_v56, 1  ;;  %v5813_v9 = vld [vmem:[#allocation2 + $0x34] sm:$0xf]  ;;  %v429_v10 = vld [vmem:[#allocation2 + $0x60] sm:$0x1]  ;;  %v700_v24 = vshrl.u32 %v4503_v6, 16  ;;  %v1635_v58 = vsel %vm1626_vm10, %v5772_v26, %v1634_v27  ;;  %v330_v36 = vadd.f32 %v5721_v12, %v291_v19 }
  0x71   : > { %4862 = vmatpush3.bf16.msra.mxu1 %v5144_v29  ;;  %v485_v14 = vld [vmem:[#allocation2 + $0x68] sm:$0x1]  ;;  %v5152_v23 = vld [vmem:[%s7005_s1 + $0x150] sm:$0xff]   ;;  %v703_v29 = vshll.u32 %v4503_v6, 16  ;;  %v708_v30 = vshrl.u32 %v4504_v55, 16  ;;  %v711_v21 = vshll.u32 %v4504_v55, 16  ;;  %v5842_v44 = vcombine.low %v1102_v0, %v5813_v9 }
  0x72   : > { %v1436_v17 = vor.u32 %v1435_v61, %v1431_v47  ;;  %v361_v38 = vmax.f32 %v329_v20, 0.0  ;;  %4757 = vmatprep.subr.bf16.mxu0 %v5152_v23  ;;  %v5153_v39 = vld [vmem:[%s7005_s1 + $0x110] sm:$0xff]   ;;  %v5156_v52 = vld [vmem:[%s7005_s1 + $0x1e8] sm:$0xff]   ;;  %v430_v26 = vsel %vm5392_vm3, 0, %v429_v10  ;;  %v486_v27 = vsel %vm5400_vm4, 0, %v485_v14  ;;  %v253_v19 = vld [vmem:[%s5388_s22 + $0x80] sm:$0xff] }
  0x73   : > { %v710_v33 = vrot.slane %v708_v30, 7  ;;  %v1636_v32 = vrot.slane %v4306_v18, 1  ;;  %v362_v22 = vmax.f32 %v330_v36, 0.0  ;;  %431 = vst [vmem:[#allocation2 + $0x60] sm:$0x1] %v430_v26  ;;  %4863 = vmatprep.subr.bf16.mxu1 %v5156_v52  ;;  %4758 = vmatpush3.bf16.msra.mxu0 %v5153_v39  ;;  %v5158_v61 = vld [vmem:[%s7005_s1 + $0x1a8] sm:$0xff]   ;;  %v292_v26 = vmul.f32 %v5712_v5, %v253_v19 }
  0x74   : > { %3397 = vmatmul.mubr.bf16.gmra.mxu1 %v1632_v31  ;;  %v1441_v35 = vsel %vm1369_vm6, %v1436_v17, %v1440_v62  ;;  %v702_v31 = vrot.slane %v700_v24, 7  ;;  %v962_v43 = vld [vmem:[#allocation2 + $0x54] sm:$0xf]  ;;  %487 = vst [vmem:[#allocation2 + $0x68] sm:$0x1] %v486_v27  ;;  %v4505_v47 = vpack.c.bf16 %v361_v38, %v361_v38  ;;  %v5163_v27 = vld [vmem:[%s7005_s1 + $0x148] sm:$0xff]  }
  0x75   : > { %3404 = vmatprep.mubr.bf16.mxu1 %v5797_v45  ;;  %3267 = vmatprep.mubr.bf16.mxu0 %v1441_v35  ;;  %v5834_v48 = vld [vmem:[#allocation2 + $0x4c] sm:$0xf]  ;;  %v1044_v42 = vld [vmem:[#allocation2 + $0x48] sm:$0xf]  ;;  %v713_v51 = vor.u32 %v711_v21, %v710_v33  ;;  %v966_v49 = vld [vmem:[#allocation2 + $0x5c] sm:$0x1]  ;;  %v4506_v53 = vpack.c.bf16 %v362_v22, %v362_v22  ;;  %v1638_v30 = vsel %vm1626_vm10, %v1636_v32, %v1637_v3 }
  0x76   : > { %3268 = vmatmul.mubr.bf16.gmra.mxu0 %v5783_v41  ;;  %v5845_v56 = vcombine.low %v1044_v42, %v5834_v48  ;;  %v5847_v40 = vld [vmem:[#allocation2 + $0x50] ss:$0 sps:$4 sm:$0x11]   ;;  %v705_v37 = vor.u32 %v703_v29, %v702_v31  ;;  %v706_v46 = vrot.slane %v702_v31, 4  ;;  %v715_v41 = vrot.slane %v710_v33, 4  ;;  %4864 = vmatpush3.bf16.msra.mxu1 %v5158_v61  ;;  %v254_v29 = vld [vmem:[%s5388_s22 + $0x88] sm:$0xff] }
  0x77   : > { %v717_v57 = vshrl.u32 %v4505_v47, 16  ;;  %v720_v59 = vshll.u32 %v4505_v47, 16  ;;  %v1450_v2 = vshll.u32 %v5847_v40, 16  ;;  %v725_v14 = vshrl.u32 %v4506_v53, 16  ;;  %v1104_v17 = vld [vmem:[#allocation2 + $0x3c] sm:$0xf]  ;;  %4759 = vmatprep.subr.bf16.mxu0 %v5163_v27 }
  0x78   : > { %v1443_v62 = vshrl.u32 %v5845_v56, 16  ;;  %v1445_v63 = vshll.u32 %v5845_v56, 16  ;;  %v714_v6 = vsel %vm5461_vm8, %v706_v46, %v713_v51  ;;  %v963_v55 = vsel %vm5469_vm9, %v705_v37, %v962_v43  ;;  %v5861_v18 = vld [vmem:[#allocation2 + $0x40] sm:$0xf]  ;;  %v1084_v38 = vld [vmem:[#allocation2 + $0x30] sm:$0xe] }
  0x79   : > { %965 = vst [vmem:[#allocation2 + $0x58] sm:$0xf] %v714_v6  ;;  %v967_v0 = vsel %vm5392_vm3, %v715_v41, %v966_v49  ;;  %v719_v10 = vrot.slane %v717_v57, 7  ;;  %v1452_v23 = vrot.slane %v1450_v2, 1  ;;  %964 = vst [vmem:[#allocation2 + $0x54] sm:$0xf] %v963_v55  ;;  %v4307_v33 = vcombine.low %v1084_v38, %v5728_v25 }
  0x7a   : > { %v1447_v20 = vrot.slane %v1445_v63, 1  ;;  %968 = vst [vmem:[#allocation2 + $0x5c] sm:$0x1] %v967_v0  ;;  %v728_v24 = vshll.u32 %v4506_v53, 16  ;;  %v727_v36 = vrot.slane %v725_v14, 7  ;;  %v293_v43 = vmul.f32 %v5712_v5, %v254_v29  ;;  %v5165_v25 = vld [vmem:[%s7005_s1 + $0x108] sm:$0xff]  }
  0x7b   : > { %v722_v21 = vor.u32 %v720_v59, %v719_v10  ;;  %v723_v35 = vrot.slane %v719_v10, 4  ;;  %v969_v52 = vld [vmem:[#allocation2 + $0x60] sm:$0xf]  ;;  %v973_v31 = vld [vmem:[#allocation2 + $0x68] sm:$0x1]  ;;  %v5883_v47 = vcombine.low %v1104_v17, %v5861_v18  ;;  %v331_v37 = vadd.f32 %v5721_v12, %v292_v26  ;;  %4760 = vmatpush3.bf16.msra.mxu0 %v5165_v25  ;;  %v255_v59 = vld [vmem:[%s5388_s22 + $0x90] sm:$0xff] }
  0x7c   : > { %3405 = vmatmul.mubr.bf16.gmra.mxu1 %v1635_v58  ;;  %v1448_v39 = vor.u32 %v1447_v20, %v1443_v62  ;;  %v1640_v58 = vrot.slane %v5736_v50, 1  ;;  %v730_v1 = vor.u32 %v728_v24, %v727_v36  ;;  %v732_v42 = vrot.slane %v727_v36, 4  ;;  %v432_v32 = vld [vmem:[#allocation2 + $0x6c] sm:$0x1]  ;;  %v488_v51 = vld [vmem:[#allocation2 + $0x74] sm:$0x1] }
  0x7d   : > { %3412 = vmatprep.mubr.bf16.mxu1 %v5842_v44  ;;  %v970_v3 = vsel %vm5469_vm9, %v722_v21, %v969_v52  ;;  %v433_v46 = vsel %vm5392_vm3, 0, %v432_v32  ;;  %v332_v53 = vadd.f32 %v5721_v12, %v293_v43  ;;  %v489_v57 = vsel %vm5400_vm4, 0, %v488_v51  ;;  %v256_v63 = vld [vmem:[%s5388_s22 + $0x98] sm:$0xff]  ;;  %v1106_v19 = vld [vmem:[#allocation2 + $0x48] sm:$0xf] }
  0x7e   : > { %v1453_v22 = vsel %vm1369_vm6, %v1448_v39, %v1452_v23  ;;  %971 = vst [vmem:[#allocation2 + $0x60] sm:$0xf] %v970_v3  ;;  %v731_v41 = vsel %vm5461_vm8, %v723_v35, %v730_v1  ;;  %v974_v49 = vsel %vm5392_vm3, %v732_v42, %v973_v31  ;;  %434 = vst [vmem:[#allocation2 + $0x6c] sm:$0x1] %v433_v46  ;;  %v363_v62 = vmax.f32 %v331_v37, 0.0  ;;  %v5170_v1 = vld [vmem:[%s7005_s1 + $0x1e0] sm:$0xff]  }
  0x7f   : > { %3275 = vmatprep.mubr.bf16.mxu0 %v1453_v22  ;;  %972 = vst [vmem:[#allocation2 + $0x64] sm:$0xf] %v731_v41  ;;  %975 = vst [vmem:[#allocation2 + $0x68] sm:$0x1] %v974_v49  ;;  %v1639_v6 = vrot.slane %v4307_v33, 1  ;;  %v364_v55 = vmax.f32 %v332_v53, 0.0  ;;  %v294_v0 = vmul.f32 %v5712_v5, %v255_v59  ;;  %v295_v10 = vmul.f32 %v5712_v5, %v256_v63 }
  0x80   : > { %3276 = vmatmul.mubr.bf16.gmra.mxu0 %v5845_v56  ;;  %v5897_v61 = vld [vmem:[#allocation2 + $0x58] sm:$0xf]  ;;  %490 = vst [vmem:[#allocation2 + $0x74] sm:$0x1] %v489_v57  ;;  %v1046_v2 = vld [vmem:[#allocation2 + $0x54] sm:$0xf]  ;;  %v4507_v56 = vpack.c.bf16 %v363_v62, %v363_v62  ;;  %4865 = vmatprep.subr.bf16.mxu1 %v5170_v1 }
  0x81   : > { %v4278_v14 = vcombine.low %v1046_v2, %v5897_v61  ;;  %v5903_v17 = vld [vmem:[#allocation2 + $0x5c] ss:$0 sps:$4 sm:$0x11]   ;;  %v1643_v20 = vrot.slane %v5785_v34, 1  ;;  %v4508_v23 = vpack.c.bf16 %v364_v55, %v364_v55  ;;  %v1085_v24 = vld [vmem:[#allocation2 + $0x3c] sm:$0xe]  ;;  %v333_v29 = vadd.f32 %v5721_v12, %v294_v0 }
  0x82   : > { %v5909_v21 = vadd.f32 %v5721_v12, %v295_v10  ;;  %v1462_v38 = vshll.u32 %v5903_v17, 16  ;;  %v734_v39 = vshrl.u32 %v4507_v56, 16  ;;  %v5912_v52 = vld [vmem:[#allocation2 + $0x4c] sm:$0xf]  ;;  %v737_v31 = vshll.u32 %v4507_v56, 16 }
  0x83   : > { %v1455_v35 = vshrl.u32 %v4278_v14, 16  ;;  %v1457_v36 = vshll.u32 %v4278_v14, 16  ;;  %v742_v33 = vshrl.u32 %v4508_v23, 16  ;;  %v745_v26 = vshll.u32 %v4508_v23, 16  ;;  %v435_v22 = vld [vmem:[#allocation2 + $0x78] sm:$0x1] }
  0x84   : > { %3413 = vmatmul.mubr.bf16.gmra.mxu1 %v1638_v30  ;;  %v4308_v27 = vcombine.low %v1085_v24, %v5780_v28  ;;  %v1464_v3 = vrot.slane %v1462_v38, 1  ;;  %v736_v43 = vrot.slane %v734_v39, 7  ;;  %v365_v25 = vmax.f32 %v333_v29, 0.0  ;;  %v5936_v23 = vld [vmem:[#allocation2 + $0x58] sm:$0xf]  ;;  %v5172_v24 = vld [vmem:[%s7005_s1 + $0x1a0] sm:$0xff]  }
  0x85   : > { %3420 = vmatprep.mubr.bf16.mxu1 %v5883_v47  ;;  %v1048_v30 = vld [vmem:[#allocation2 + $0x60] sm:$0xf]  ;;  %v1459_v42 = vrot.slane %v1457_v36, 1  ;;  %v976_v32 = vld [vmem:[#allocation2 + $0x6c] sm:$0xf]  ;;  %v1641_v46 = vsel %vm1626_vm10, %v1639_v6, %v1640_v58  ;;  %v744_v51 = vrot.slane %v742_v33, 7  ;;  %v5924_v41 = vcombine.low %v1106_v19, %v5912_v52  ;;  %4866 = vmatpush3.bf16.msra.mxu1 %v5172_v24 }
  0x86   : > { %v5918_v37 = vld [vmem:[#allocation2 + $0x64] sm:$0xf]  ;;  %v1642_v28 = vrot.slane %v4308_v27, 1  ;;  %v5929_v57 = vld [vmem:[#allocation2 + $0x68] ss:$0 sps:$4 sm:$0x11]   ;;  %v739_v59 = vor.u32 %v737_v31, %v736_v43  ;;  %v4509_v33 = vpack.c.bf16 %v365_v25, %v365_v25 }
  0x87   : > { %v1460_v49 = vor.u32 %v1459_v42, %v1455_v35  ;;  %v5927_v53 = vcombine.low %v1048_v30, %v5918_v37  ;;  %v740_v62 = vrot.slane %v736_v43, 4  ;;  %v980_v63 = vld [vmem:[#allocation2 + $0x74] sm:$0x1]  ;;  %v747_v2 = vor.u32 %v745_v26, %v744_v51  ;;  %v491_v58 = vld [vmem:[#allocation2 + $0x80] sm:$0x1]  ;;  %v258_v26 = vld [vmem:[%s5388_s22 + $0xa8] sm:$0xff] }
  0x88   : > { %v749_v55 = vrot.slane %v744_v51, 4  ;;  %v366_v50 = vmax.f32 %v5909_v21, 0.0  ;;  %v1108_v6 = vld [vmem:[#allocation2 + $0x54] sm:$0xf]  ;;  %v1474_v19 = vshll.u32 %v5929_v57, 16  ;;  %v977_v21 = vsel %vm5469_vm9, %v739_v59, %v976_v32  ;;  %v257_v38 = vld [vmem:[%s5388_s22 + $0xa0] sm:$0xff] }
  0x89   : > { %v1465_v0 = vsel %vm1369_vm6, %v1460_v49, %v1464_v3  ;;  %v1467_v10 = vshrl.u32 %v5927_v53, 16  ;;  %v1469_v56 = vshll.u32 %v5927_v53, 16  ;;  %v748_v29 = vsel %vm5461_vm8, %v740_v62, %v747_v2  ;;  %978 = vst [vmem:[#allocation2 + $0x6c] sm:$0xf] %v977_v21  ;;  %v1086_v42 = vld [vmem:[#allocation2 + $0x48] sm:$0xe] }
  0x8a   : > { %3283 = vmatprep.mubr.bf16.mxu0 %v1465_v0  ;;  %v981_v35 = vsel %vm5392_vm3, %v749_v55, %v980_v63  ;;  %v436_v36 = vsel %vm5392_vm3, 0, %v435_v22  ;;  %v1476_v30 = vrot.slane %v1474_v19, 1  ;;  %979 = vst [vmem:[#allocation2 + $0x70] sm:$0xf] %v748_v29  ;;  %v492_v31 = vsel %vm5400_vm4, 0, %v491_v58  ;;  %v5175_v3 = vld [vmem:[%s7005_s1 + $0x140] sm:$0xff]  }
  0x8b   : > { %3284 = vmatmul.mubr.bf16.gmra.mxu0 %v4278_v14  ;;  %v1471_v39 = vrot.slane %v1469_v56, 1  ;;  %982 = vst [vmem:[#allocation2 + $0x74] sm:$0x1] %v981_v35  ;;  %437 = vst [vmem:[#allocation2 + $0x78] sm:$0x1] %v436_v36  ;;  %v1644_v27 = vsel %vm1626_vm10, %v1642_v28, %v1643_v20  ;;  %v4510_v1 = vpack.c.bf16 %v366_v50, %v366_v50  ;;  %v751_v32 = vshrl.u32 %v4509_v33, 16 }
  0x8c   : > { %3421 = vmatmul.mubr.bf16.gmra.mxu1 %v1641_v46  ;;  %493 = vst [vmem:[#allocation2 + $0x80] sm:$0x1] %v492_v31  ;;  %v5958_v14 = vcombine.low %v1108_v6, %v5936_v23  ;;  %v754_v22 = vshll.u32 %v4509_v33, 16  ;;  %v4309_v25 = vcombine.low %v1086_v42, %v5834_v48  ;;  %v438_v46 = vld [vmem:[#allocation2 + $0x84] sm:$0x1]  ;;  %v1646_v20 = vrot.slane %v5847_v40, 1  ;;  %4761 = vmatprep.subr.bf16.mxu0 %v5175_v3 }
  0x8d   : > { %3428 = vmatprep.mubr.bf16.mxu1 %v5924_v41  ;;  %v1472_v43 = vor.u32 %v1471_v39, %v1467_v10  ;;  %v759_v51 = vshrl.u32 %v4510_v1, 16  ;;  %v762_v34 = vshll.u32 %v4510_v1, 16  ;;  %v296_v28 = vmul.f32 %v5712_v5, %v257_v38  ;;  %v494_v49 = vld [vmem:[#allocation2 + $0x8c] sm:$0x1]  ;;  %v5176_v59 = vld [vmem:[%s7005_s1 + $0x100] sm:$0xff]   ;;  %v5183_v6 = vld [vmem:[%s7005_s1 + $0x1d8] sm:$0xff]  }
  0x8e   : > { %v753_v63 = vrot.slane %v751_v32, 7  ;;  %v1645_v2 = vrot.slane %v4309_v25, 1  ;;  %v297_v55 = vmul.f32 %v5712_v5, %v258_v26  ;;  %v439_v40 = vsel %vm5392_vm3, 0, %v438_v46  ;;  %4762 = vmatpush3.bf16.msra.mxu0 %v5176_v59  ;;  %v1110_v56 = vld [vmem:[#allocation2 + $0x60] sm:$0xf]  ;;  %v5983_v19 = vld [vmem:[%s7005_s1 + $0x238] sm:$0xff]   ;;  %4867 = vmatprep.subr.bf16.mxu1 %v5183_v6 }
  0x8f   : > { %v1477_v62 = vsel %vm1369_vm6, %v1472_v43, %v1476_v30  ;;  %v761_v48 = vrot.slane %v759_v51, 7  ;;  %v335_v50 = vadd.f32 %v5721_v12, %v296_v28  ;;  %v495_v58 = vsel %vm5400_vm4, 0, %v494_v49  ;;  %440 = vst [vmem:[#allocation2 + $0x84] sm:$0x1] %v439_v40  ;;  %4995 = vmatprep.subr.bf16.mxu0 %v5983_v19  ;;  %v5186_v43 = vld [vmem:[%s7005_s1 + $0x198] sm:$0xff]  }
  0x90   : > { %3291 = vmatprep.mubr.bf16.mxu0 %v1477_v62  ;;  %v756_v0 = vor.u32 %v754_v22, %v753_v63  ;;  %v757_v10 = vrot.slane %v753_v63, 4  ;;  %v336_v5 = vadd.f32 %v5721_v12, %v297_v55  ;;  %496 = vst [vmem:[#allocation2 + $0x8c] sm:$0x1] %v495_v58  ;;  %v1050_v24 = vld [vmem:[#allocation2 + $0x6c] sm:$0xf]  ;;  %v1647_v32 = vsel %vm1626_vm10, %v1645_v2, %v1646_v20  ;;  %v5194_v2 = vld [vmem:[%s7005_s1 + $0x1d0] sm:$0xff]  }
  0x91   : > { %v5985_v29 = vld [vmem:[#allocation2 + $0x70] sm:$0xf]  ;;  %v764_v21 = vor.u32 %v762_v34, %v761_v48  ;;  %v766_v36 = vrot.slane %v761_v48, 4  ;;  %v367_v33 = vmax.f32 %v335_v50, 0.0  ;;  %v1087_v51 = vld [vmem:[#allocation2 + $0x54] sm:$0xe]  ;;  %4868 = vmatpush3.bf16.msra.mxu1 %v5186_v43 }
  0x92   : > { %v4280_v35 = vcombine.low %v1050_v24, %v5985_v29  ;;  %v5990_v12 = vld [vmem:[#allocation2 + $0x74] ss:$0 sps:$4 sm:$0x11]   ;;  %v983_v38 = vld [vmem:[#allocation2 + $0x78] sm:$0xf]  ;;  %v368_v26 = vmax.f32 %v336_v5, 0.0  ;;  %v4310_v49 = vcombine.low %v1087_v51, %v5897_v61  ;;  %4869 = vmatprep.subr.bf16.mxu1 %v5194_v2 }
  0x93   : > { %3292 = vmatmul.mubr.bf16.gmra.mxu0 %v5927_v53  ;;  %v765_v39 = vsel %vm5461_vm8, %v757_v10, %v764_v21  ;;  %v984_v30 = vsel %vm5469_vm9, %v756_v0, %v983_v38  ;;  %v987_v31 = vld [vmem:[#allocation2 + $0x80] sm:$0x1]  ;;  %v1486_v42 = vshll.u32 %v5990_v12, 16  ;;  %v4511_v22 = vpack.c.bf16 %v367_v33, %v367_v33  ;;  %v1112_v61 = vld [vmem:[#allocation2 + $0x6c] sm:$0xf] }
  0x94   : > { %3429 = vmatmul.mubr.bf16.gmra.mxu1 %v1644_v27  ;;  %v5997_v27 = vld [vmem:[#allocation2 + $0x64] sm:$0xf]  ;;  %v1479_v53 = vshrl.u32 %v4280_v35, 16  ;;  %v1481_v1 = vshll.u32 %v4280_v35, 16  ;;  %985 = vst [vmem:[#allocation2 + $0x78] sm:$0xf] %v984_v30  ;;  %v988_v3 = vsel %vm5392_vm3, %v766_v36, %v987_v31  ;;  %v4512_v25 = vpack.c.bf16 %v368_v26, %v368_v26 }
  0x95   : > { %3436 = vmatprep.mubr.bf16.mxu1 %v5958_v14  ;;  %986 = vst [vmem:[#allocation2 + $0x7c] sm:$0xf] %v765_v39  ;;  %989 = vst [vmem:[#allocation2 + $0x80] sm:$0x1] %v988_v3  ;;  %v6007_v46 = vcombine.low %v1110_v56, %v5997_v27  ;;  %v1488_v28 = vrot.slane %v1486_v42, 1  ;;  %v768_v59 = vshrl.u32 %v4511_v22, 16 }
  0x96   : > { %v1483_v34 = vrot.slane %v1481_v1, 1  ;;  %v771_v62 = vshll.u32 %v4511_v22, 16  ;;  %v776_v63 = vshrl.u32 %v4512_v25, 16  ;;  %v779_v55 = vshll.u32 %v4512_v25, 16  ;;  %v990_v6 = vld [vmem:[#allocation2 + $0x84] sm:$0xf] }
  0x97   : > { %v1648_v50 = vrot.slane %v4310_v49, 1  ;;  %v1649_v20 = vrot.slane %v5903_v17, 1  ;;  %v770_v40 = vrot.slane %v768_v59, 7  ;;  %v994_v10 = vld [vmem:[#allocation2 + $0x8c] sm:$0x1]  ;;  %v1652_v49 = vrot.slane %v5929_v57, 1 }
  0x98   : > { %v1484_v48 = vor.u32 %v1483_v34, %v1479_v53  ;;  %v778_v58 = vrot.slane %v776_v63, 7  ;;  %v6016_v5 = vld [vmem:[#allocation2 + $0x70] sm:$0xf]  ;;  %v1088_v43 = vld [vmem:[#allocation2 + $0x60] sm:$0xe] }
  0x99   : > { %v773_v17 = vor.u32 %v771_v62, %v770_v40  ;;  %v774_v21 = vrot.slane %v770_v40, 4  ;;  %v1650_v31 = vsel %vm1626_vm10, %v1648_v50, %v1649_v20  ;;  %v6031_v1 = vcombine.low %v1112_v61, %v6016_v5  ;;  %v1144_v22 = vld [vmem:[#allocation2 + $0xc] sm:$0xe]  ;;  %v5180_v34 = vld [vmem:[#allocation2 + $0x14] ss:$0 sps:$4 sm:$0x11]  }
  0x9a   : > { %v1489_v0 = vsel %vm1369_vm6, %v1484_v48, %v1488_v28  ;;  %v781_v36 = vor.u32 %v779_v55, %v778_v58  ;;  %v783_v38 = vrot.slane %v778_v58, 4  ;;  %v4351_v55 = vcombine.low %v1144_v22, %v5716_v7  ;;  %v1089_v48 = vld [vmem:[#allocation2 + $0x6c] sm:$0xe]  ;;  %v5197_v7 = vld [vmem:[%s7005_s1 + $0x190] sm:$0xff]  }
  0x9b   : > { %3299 = vmatprep.mubr.bf16.mxu0 %v1489_v0  ;;  %v1052_v56 = vld [vmem:[#allocation2 + $0x78] sm:$0xf]  ;;  %v991_v26 = vsel %vm5469_vm9, %v773_v17, %v990_v6  ;;  %v2092_v0 = vrot.slane %v5180_v34, 1  ;;  %4870 = vmatpush3.bf16.msra.mxu1 %v5197_v7  ;;  %v6081_v7 = vld [vmem:[#allocation2 + $0x94] sm:$0xf] }
  0x9c   : > { %3437 = vmatmul.mubr.bf16.gmra.mxu1 %v1647_v32  ;;  %v6018_v24 = vld [vmem:[#allocation2 + $0x7c] sm:$0xf]  ;;  %3300 = vmatmul.mubr.bf16.gmra.mxu0 %v4280_v35  ;;  %v6021_v30 = vld [vmem:[#allocation2 + $0x80] ss:$0 sps:$4 sm:$0x11]   ;;  %v782_v33 = vsel %vm5461_vm8, %v774_v21, %v781_v36  ;;  %v995_v53 = vsel %vm5392_vm3, %v783_v38, %v994_v10  ;;  %v4311_v32 = vcombine.low %v1088_v43, %v5918_v37  ;;  %v2091_v61 = vrot.slane %v4351_v55, 1 }
  0x9d   : > { %3444 = vmatprep.mubr.bf16.mxu1 %v6007_v46  ;;  %v4281_v39 = vcombine.low %v1052_v56, %v6018_v24  ;;  %v1498_v3 = vshll.u32 %v6021_v30, 16  ;;  %992 = vst [vmem:[#allocation2 + $0x84] sm:$0xf] %v991_v26  ;;  %993 = vst [vmem:[#allocation2 + $0x88] sm:$0xf] %v782_v33  ;;  %v4312_v37 = vcombine.low %v1089_v48, %v5985_v29  ;;  %v1838_v29 = vshll.u32 %v5731_v15, 16 }
  0x9e   : > { %996 = vst [vmem:[#allocation2 + $0x8c] sm:$0x1] %v995_v53  ;;  %v1651_v28 = vrot.slane %v4311_v32, 1  ;;  %v1114_v62 = vld [vmem:[#allocation2 + $0x78] sm:$0xf]  ;;  %v1655_v10 = vrot.slane %v5990_v12, 1 }
  0x9f   : > { %v1491_v42 = vshrl.u32 %v4281_v39, 16  ;;  %v1493_v35 = vshll.u32 %v4281_v39, 16  ;;  %v1500_v51 = vrot.slane %v1498_v3, 1  ;;  %v6037_v63 = vld [vmem:[#allocation2 + $0x7c] sm:$0xf]  ;;  %v1654_v38 = vrot.slane %v4312_v37, 1 }
  0xa0   : > { %v1653_v40 = vsel %vm1626_vm10, %v1651_v28, %v1652_v49  ;;  %v6046_v58 = vcombine.low %v1114_v62, %v6037_v63  ;;  %v1145_v56 = vld [vmem:[#allocation2 + $0x18] sm:$0xe]  ;;  %v1840_v3 = vrot.slane %v1838_v29, 1  ;;  %v1843_v32 = vshll.u32 %v5180_v34, 16  ;;  %v1146_v55 = vld [vmem:[#allocation2 + $0x24] sm:$0xe] }
  0xa1   : > { %v1495_v25 = vrot.slane %v1493_v35, 1  ;;  %v1090_v12 = vld [vmem:[#allocation2 + $0x78] sm:$0xe]  ;;  %v5208_v35 = vld [vmem:[%s7005_s1 + $0x188] sm:$0xff]   ;;  %v4352_v22 = vcombine.low %v1145_v56, %v5754_v54  ;;  %v1850_v62 = vshll.u32 %v5764_v8, 16  ;;  %v1848_v56 = vshrl.u32 %v5764_v8, 16 }
  0xa2   : > { %v4313_v49 = vcombine.low %v1090_v12, %v6018_v24  ;;  %v1845_v54 = vrot.slane %v1843_v32, 1  ;;  %v1658_v24 = vrot.slane %v6021_v30, 1  ;;  %v1092_v32 = vld [vmem:[#allocation2 + $0x90] sm:$0xe]  ;;  %v1158_v16 = vld [vmem:[#allocation2 + $0xb4] sm:$0xe] }
  0xa3   : > { %v1496_v59 = vor.u32 %v1495_v25, %v1491_v42  ;;  %v1836_v42 = vshrl.u32 %v5731_v15, 16  ;;  %v5187_v25 = vld [vmem:[#allocation2 + $0x20] ss:$0 sps:$4 sm:$0x11]   ;;  %v2094_v48 = vrot.slane %v4352_v22, 1  ;;  %v1860_v22 = vshrl.u32 %v5797_v45, 16 }
  0xa4   : > { %3445 = vmatmul.mubr.bf16.gmra.mxu1 %v1650_v31  ;;  %v1054_v20 = vld [vmem:[#allocation2 + $0x84] sm:$0xf]  ;;  %v6042_v2 = vld [vmem:[#allocation2 + $0x88] sm:$0xf]  ;;  %v1657_v37 = vrot.slane %v4313_v49, 1 }
  0xa5   : > { %3452 = vmatprep.mubr.bf16.mxu1 %v6031_v1  ;;  %v1501_v50 = vsel %vm1369_vm6, %v1496_v59, %v1500_v51  ;;  %v4282_v57 = vcombine.low %v1054_v20, %v6042_v2  ;;  %v6049_v6 = vld [vmem:[#allocation2 + $0x8c] ss:$0 sps:$4 sm:$0x11]   ;;  %v1116_v31 = vld [vmem:[#allocation2 + $0x84] sm:$0xf]  ;;  %v1656_v51 = vsel %vm1626_vm10, %v1654_v38, %v1655_v10  ;;  %v2093_v59 = vsel %vm1626_vm10, %v2091_v61, %v2092_v0  ;;  %v5195_v38 = vld [vmem:[%s7005_s1 + $0x230] sm:$0xff]  }
  0xa6   : > { %3307 = vmatprep.mubr.bf16.mxu0 %v1501_v50  ;;  %v1510_v36 = vshll.u32 %v6049_v6, 16  ;;  %v6061_v33 = vld [vmem:[#allocation2 + $0x88] sm:$0xf]  ;;  %v1841_v34 = vor.u32 %v1840_v3, %v1836_v42  ;;  %v2095_v50 = vrot.slane %v5187_v25, 1  ;;  %v5216_v20 = vld [vmem:[%s7005_s1 + $0x1c0] sm:$0xff]   ;;  %v1855_v0 = vshll.u32 %v5187_v25, 16 }
  0xa7   : > { %3308 = vmatmul.mubr.bf16.gmra.mxu0 %v4281_v39  ;;  %v1503_v17 = vshrl.u32 %v4282_v57, 16  ;;  %v1505_v21 = vshll.u32 %v4282_v57, 16  ;;  %v5205_v39 = vld [vmem:[%s7005_s1 + $0x1c8] sm:$0xff]   ;;  %v6070_v28 = vcombine.low %v1116_v31, %v6061_v33  ;;  %v1091_v29 = vld [vmem:[#allocation2 + $0x84] sm:$0xe]  ;;  %v1659_v30 = vsel %vm1626_vm10, %v1657_v37, %v1658_v24 }
  0xa8   : > { %v1512_v53 = vrot.slane %v1510_v36, 1  ;;  %4871 = vmatprep.subr.bf16.mxu1 %v5205_v39  ;;  %v1846_v61 = vsel %vm1369_vm6, %v1841_v34, %v1845_v54  ;;  %v5191_v10 = vld [vmem:[#allocation2 + $0x2c] ss:$0 sps:$4 sm:$0x11]   ;;  %v2096_v36 = vsel %vm1626_vm10, %v2094_v48, %v2095_v50  ;;  %v1147_v31 = vld [vmem:[#allocation2 + $0x30] sm:$0xe] }
  0xa9   : > { %v1507_v26 = vrot.slane %v1505_v21, 1  ;;  %4872 = vmatpush3.bf16.msra.mxu1 %v5208_v35  ;;  %v4314_v21 = vcombine.low %v1091_v29, %v6042_v2  ;;  %v1661_v42 = vrot.slane %v6049_v6, 1  ;;  %v5206_v35 = vld [vmem:[%s7005_s1 + $0x228] sm:$0xff]   ;;  %v1120_v3 = vld [vmem:[#allocation2 + $0x9c] sm:$0xf]  ;;  %v1867_v49 = vshll.u32 %v5191_v10, 16 }
  0xaa   : > { %4873 = vmatprep.subr.bf16.mxu1 %v5216_v20  ;;  %v5198_v25 = vld [vmem:[#allocation2 + $0x38] ss:$0 sps:$4 sm:$0x11]   ;;  %v1148_v34 = vld [vmem:[#allocation2 + $0x3c] sm:$0xe]  ;;  %v5219_v50 = vld [vmem:[%s7005_s1 + $0x180] sm:$0xff]  }
  0xab   : > { %v1508_v43 = vor.u32 %v1507_v26, %v1503_v17  ;;  %v1852_v17 = vrot.slane %v1850_v62, 1  ;;  %v1857_v26 = vrot.slane %v1855_v0, 1  ;;  %v1660_v12 = vrot.slane %v4314_v21, 1  ;;  %v5286_v62 = vld [vmem:[#allocation2 + $0x94] sm:$0xf] }
  0xac   : > { %3453 = vmatmul.mubr.bf16.gmra.mxu1 %v1653_v40  ;;  %v1118_v40 = vld [vmem:[#allocation2 + $0x90] sm:$0xf]  ;;  %v1869_v37 = vrot.slane %v1867_v49, 1  ;;  %v2101_v20 = vrot.slane %v5198_v25, 1  ;;  %v1122_v0 = vld [vmem:[#allocation2 + $0xa8] sm:$0xf]  ;;  %v4355_v21 = vcombine.low %v1148_v34, %v5861_v18 }
  0xad   : > { %3460 = vmatprep.mubr.bf16.mxu1 %v6046_v58  ;;  %v1513_v15 = vsel %vm1369_vm6, %v1508_v43, %v1512_v53  ;;  %v6093_v39 = vcombine.low %v1118_v40, %v6081_v7  ;;  %v1853_v2 = vor.u32 %v1852_v17, %v1848_v56  ;;  %v2098_v53 = vrot.slane %v5191_v10, 1  ;;  %v6102_v43 = vld [vmem:[#allocation2 + $0xa0] sm:$0xf]  ;;  %v5287_v40 = vld [vmem:[#allocation2 + $0x98] ss:$0 sps:$4 sm:$0x11]   ;;  %4874 = vmatpush3.bf16.msra.mxu1 %v5219_v50 }
  0xae   : > { %3315 = vmatprep.mubr.bf16.mxu0 %v1513_v15  ;;  %v1662_v15 = vsel %vm1626_vm10, %v1660_v12, %v1661_v42  ;;  %v1664_v29 = vrot.slane %v5287_v40, 1  ;;  %v268_v10 = vld [vmem:[%s5388_s22 + $0xf8] sm:$0xff]  ;;  %v5288_v56 = vld [vmem:[%s7006_s2] ss:$0 sm:$0xff]  ;;  %v1872_v42 = vshrl.u32 %v5842_v44, 16 }
  0xaf   : > { %3316 = vmatmul.mubr.bf16.gmra.mxu0 %v4282_v57  ;;  %v4353_v57 = vcombine.low %v1146_v55, %v5766_v11  ;;  %v1862_v11 = vshll.u32 %v5797_v45, 16  ;;  %v1858_v6 = vsel %vm1369_vm6, %v1853_v2, %v1857_v26  ;;  %v4315_v55 = vcombine.low %v1092_v32, %v5286_v62  ;;  %v5217_v45 = vld [vmem:[%s7005_s1 + $0x220] sm:$0xff]   ;;  %v1149_v62 = vld [vmem:[#allocation2 + $0x48] sm:$0xe] }
  0xb0   : > { %3549 = vmatprep.mubr.bf16.mxu0 %v2093_v59  ;;  %v6109_v59 = vcombine.low %v1120_v3, %v6102_v43  ;;  %v1879_v26 = vshll.u32 %v5198_v25, 16  ;;  %v5289_v2 = vld [vmem:[%s7007_s3] ss:$0 sm:$0xff]  ;;  %v5291_v40 = vld [vmem:[#allocation2 + $0xa4] ss:$0 sps:$4 sm:$0x11]  }
  0xb1   : > { %v2097_v8 = vrot.slane %v4353_v57, 1  ;;  %v267_v57 = vld [vmem:[%s5388_s22 + $0xf0] sm:$0xff] }
  0xb2   : > { %v306_v17 = vmul.f32 %v5288_v56, %v267_v57 }
  0xb3   : > { %v2099_v54 = vsel %vm1626_vm10, %v2097_v8, %v2098_v53  ;;  %v6129_v8 = vld [vmem:[#allocation2 + $0x44] ss:$0 sps:$4 sm:$0x11]  }
  0xb4   : > { %3461 = vmatmul.mubr.bf16.gmra.mxu1 %v1656_v51  ;;  %v4354_v51 = vcombine.low %v1147_v31, %v5813_v9  ;;  %v1874_v9 = vshll.u32 %v5842_v44, 16  ;;  %v1886_v31 = vshll.u32 %v5883_v47, 16  ;;  %v345_v53 = vadd.f32 %v5289_v2, %v306_v17 }
  0xb5   : > { %3468 = vmatprep.mubr.bf16.mxu1 %v6070_v28  ;;  %v1884_v44 = vshrl.u32 %v5883_v47, 16  ;;  %v2104_v50 = vrot.slane %v6129_v8, 1 }
  0xb6   : > { %v2100_v24 = vrot.slane %v4354_v51, 1  ;;  %v377_v51 = vmax.f32 %v345_v53, 0.0  ;;  %v1888_v34 = vrot.slane %v1886_v31, 1 }
  0xb7   : > { %3550 = vmatmul.mubr.bf16.vlgmr.msra.gmra.mxu0 %v1846_v61  ;;  %v1663_v61 = vrot.slane %v4315_v55, 1  ;;  %v1881_v55 = vrot.slane %v1879_v26, 1  ;;  %v6159_v26 = vld [vmem:[#allocation2 + $0x50] ss:$0 sps:$4 sm:$0x11]  }
  0xb8   : > { %4996 = vmatpush3.bf16.msra.mxu0 %v5983_v19  ;;  %3557 = vmatprep.mubr.bf16.mxu0 %v2096_v36  ;;  %v1864_v19 = vrot.slane %v1862_v11, 1  ;;  %v6126_v36 = vld [vmem:[#allocation2 + $0xac] sm:$0xf]  ;;  %v307_v11 = vmul.f32 %v5288_v56, %v268_v10  ;;  %v2102_v49 = vsel %vm1626_vm10, %v2100_v24, %v2101_v20  ;;  %v1124_v24 = vld [vmem:[#allocation2 + $0xb4] sm:$0xf] }
  0xb9   : > { %4997 = vmatprep.subr.bf16.mxu0 %v5195_v38  ;;  %v1665_v32 = vsel %vm1626_vm10, %v1663_v61, %v1664_v29  ;;  %v1667_v29 = vrot.slane %v5291_v40, 1  ;;  %v1163_v40 = vld [vmem:[#allocation2 + $0x24] sm:$0xf] }
  0xba   : > { %v1865_v48 = vor.u32 %v1864_v19, %v1860_v22  ;;  %v346_v3 = vadd.f32 %v5289_v2, %v307_v11  ;;  %v6140_v22 = vcombine.low %v1122_v0, %v6126_v36  ;;  %v5290_v19 = vld [vmem:[#allocation2 + $0xa0] sm:$0xf]  ;;  %v1094_v0 = vld [vmem:[#allocation2 + $0xa8] sm:$0xe]  ;;  %v4356_v11 = vcombine.low %v1149_v62, %v5912_v52 }
  0xbc   : > { %3469 = vmatmul.mubr.bf16.gmra.mxu1 %v1659_v30  ;;  %4998 = vmatpush3.bf16.msra.mxu0 %v5195_v38  ;;  %v453_v30 = vld [vmem:[#allocation2 + $0xc0] sm:$0x1]  ;;  %v1093_v38 = vld [vmem:[#allocation2 + $0x9c] sm:$0xe]  ;;  %v1870_v12 = vsel %vm1369_vm6, %v1865_v48, %v1869_v37  ;;  %v1891_v37 = vshll.u32 %v6129_v8, 16 }
  0xbd   : > { %3476 = vmatprep.mubr.bf16.mxu1 %v6093_v39  ;;  %4999 = vmatprep.subr.bf16.mxu0 %v5206_v35  ;;  %v454_v18 = vsel %vm5392_vm3, 0, %v453_v30  ;;  %v4316_v25 = vcombine.low %v1093_v38, %v5290_v19  ;;  %v1161_v30 = vld [vmem:[#allocation2 + $0x18] sm:$0xf]  ;;  %v5234_v38 = vld [vmem:[%s7005_s1 + $0x210] sm:$0xff]  }
  0xbe   : > { %455 = vst [vmem:[#allocation2 + $0xc0] sm:$0x1] %v454_v18  ;;  %v1893_v62 = vrot.slane %v1891_v37, 1  ;;  %v1095_v37 = vld [vmem:[#allocation2 + $0xb4] sm:$0xe] }
  0xbf   : > { %3558 = vmatmul.mubr.bf16.gmra.mxu0 %v1858_v6  ;;  %v2103_v6 = vrot.slane %v4355_v21, 1  ;;  %v1666_v47 = vrot.slane %v4316_v25, 1  ;;  %v6152_v21 = vld [vmem:[#allocation2 + $0x1c] sm:$0xf]  ;;  %v5241_v25 = vld [vmem:[%s7005_s1 + $0x208] sm:$0xff]  }
  0xc0   : > { %3565 = vmatprep.mubr.bf16.mxu0 %v2099_v54  ;;  %5000 = vmatpush3.bf16.msra.mxu0 %v5206_v35  ;;  %v1876_v35 = vrot.slane %v1874_v9, 1  ;;  %v4521_v54 = vpack.c.bf16 %v377_v51, %v377_v51  ;;  %v5227_v9 = vld [vmem:[%s7005_s1 + $0x218] sm:$0xff]   ;;  %v6170_v19 = vcombine.low %v1161_v30, %v6152_v21  ;;  %v1898_v51 = vshll.u32 %v5924_v41, 16 }
  0xc1   : > { %5001 = vmatprep.subr.bf16.mxu0 %v5217_v45  ;;  %v1668_v18 = vsel %vm1626_vm10, %v1666_v47, %v1667_v29  ;;  %v6189_v29 = vld [vmem:[#allocation2 + $0x28] sm:$0xf] }
  0xc2   : > { %v1877_v48 = vor.u32 %v1876_v35, %v1872_v42  ;;  %v853_v57 = vshrl.u32 %v4521_v54, 16  ;;  %v856_v61 = vshll.u32 %v4521_v54, 16  ;;  %v2302_v47 = vshll.u32 %v6170_v19, 16 }
  0xc4   : > { %3477 = vmatmul.mubr.bf16.gmra.mxu1 %v1662_v15  ;;  %5002 = vmatpush3.bf16.msra.mxu0 %v5217_v45  ;;  %v378_v15 = vmax.f32 %v346_v3, 0.0  ;;  %v6149_v45 = vld [vmem:[#allocation2 + $0xb8] sm:$0xf]  ;;  %v855_v17 = vrot.slane %v853_v57, 7  ;;  %v1882_v31 = vsel %vm1369_vm6, %v1877_v48, %v1881_v55  ;;  %v2106_v55 = vrot.slane %v4356_v11, 1 }
  0xc5   : > { %3484 = vmatprep.mubr.bf16.mxu1 %v6109_v59  ;;  %5003 = vmatprep.subr.bf16.mxu0 %v5227_v9  ;;  %v6162_v8 = vcombine.low %v1124_v24, %v6149_v45  ;;  %v1025_v53 = vld [vmem:[#allocation2 + $0xc0] sm:$0xf]  ;;  %v1889_v48 = vor.u32 %v1888_v34, %v1884_v44  ;;  %v1910_v44 = vshll.u32 %v5958_v14, 16  ;;  %v1896_v34 = vshrl.u32 %v5924_v41, 16 }
  0xc6   : > { %v4522_v20 = vpack.c.bf16 %v378_v15, %v378_v15  ;;  %v858_v35 = vor.u32 %v856_v61, %v855_v17  ;;  %v859_v3 = vrot.slane %v855_v17, 4  ;;  %v1150_v15 = vld [vmem:[#allocation2 + $0x54] sm:$0xe]  ;;  %v1900_v57 = vrot.slane %v1898_v51, 1 }
  0xc7   : > { %3566 = vmatmul.mubr.bf16.gmra.mxu0 %v1870_v12  ;;  %v5292_v12 = vld [vmem:[#allocation2 + $0xac] sm:$0xf]  ;;  %v4357_v60 = vcombine.low %v1150_v15, %v5936_v23  ;;  %v1903_v61 = vshll.u32 %v6159_v26, 16  ;;  %v5294_v23 = vld [vmem:[#allocation2 + $0xb8] sm:$0xf]  ;;  %v2300_v11 = vshrl.u32 %v6170_v19, 16  ;;  %v6200_v41 = vcombine.low %v1163_v40, %v6189_v29 }
  0xc8   : > { %3573 = vmatprep.mubr.bf16.mxu0 %v2102_v49  ;;  %v861_v10 = vshrl.u32 %v4522_v20, 16  ;;  %v864_v56 = vshll.u32 %v4522_v20, 16  ;;  %5004 = vmatpush3.bf16.msra.mxu0 %v5227_v9  ;;  %v4317_v42 = vcombine.low %v1094_v0, %v5292_v12  ;;  %v1026_v49 = vsel %vm5469_vm9, %v858_v35, %v1025_v53  ;;  %v5248_v9 = vld [vmem:[%s7005_s1 + $0x200] sm:$0xff]   ;;  %v6203_v12 = vld [vmem:[#allocation2 + $0x2c] ss:$0 sps:$4 sm:$0x11]  }
  0xc9   : > { %5005 = vmatprep.subr.bf16.mxu0 %v5234_v38  ;;  %1027 = vst [vmem:[#allocation2 + $0xc0] sm:$0xf] %v1026_v49  ;;  %v6185_v20 = vld [vmem:[#allocation2 + $0x20] ss:$0 sps:$4 sm:$0x11]   ;;  %v1894_v0 = vsel %vm1369_vm6, %v1889_v48, %v1893_v62  ;;  %v4318_v30 = vcombine.low %v1095_v37, %v5294_v23  ;;  %v1905_v35 = vrot.slane %v1903_v61, 1 }
  0xca   : > { %v6164_v2 = vrot.slane %v861_v10, 7  ;;  %v1669_v4 = vrot.slane %v4317_v42, 1  ;;  %v2307_v53 = vshll.u32 %v6185_v20, 16  ;;  %v1901_v42 = vor.u32 %v1900_v57, %v1896_v34  ;;  %v5295_v49 = vld [vmem:[#allocation2 + $0xbc] ss:$0 sps:$4 sm:$0x11]  }
  0xcb   : > { %v1672_v51 = vrot.slane %v4318_v30, 1  ;;  %v1673_v15 = vrot.slane %v5295_v49, 1  ;;  %v1152_v48 = vld [vmem:[#allocation2 + $0x6c] sm:$0xe]  ;;  %v1912_v37 = vrot.slane %v1910_v44, 1  ;;  %v2312_v61 = vshrl.u32 %v6200_v41, 16 }
  0xcc   : > { %3485 = vmatmul.mubr.bf16.gmra.mxu1 %v1665_v32  ;;  %v2105_v32 = vsel %vm1626_vm10, %v2103_v6, %v2104_v50  ;;  %v866_v52 = vor.u32 %v864_v56, %v6164_v2  ;;  %5006 = vmatpush3.bf16.msra.mxu0 %v5234_v38  ;;  %v2107_v6 = vrot.slane %v6159_v26, 1  ;;  %v5293_v50 = vld [vmem:[#allocation2 + $0xb0] ss:$0 sps:$4 sm:$0x11]   ;;  %v1151_v38 = vld [vmem:[#allocation2 + $0x60] sm:$0xe]  ;;  %v1906_v40 = vsel %vm1369_vm6, %v1901_v42, %v1905_v35 }
  0xcd   : > { %3492 = vmatprep.mubr.bf16.mxu1 %v6140_v22  ;;  %v1670_v24 = vrot.slane %v5293_v50, 1  ;;  %5007 = vmatprep.subr.bf16.mxu0 %v5241_v25  ;;  %v5213_v56 = vld [vmem:[#allocation2 + $0x5c] ss:$0 sps:$4 sm:$0x11]   ;;  %v1922_v26 = vshll.u32 %v6007_v46, 16  ;;  %v1674_v57 = vsel %vm1626_vm10, %v1672_v51, %v1673_v15  ;;  %v1920_v44 = vshrl.u32 %v6007_v46, 16 }
  0xce   : > { %v867_v54 = vsel %vm5461_vm8, %v859_v3, %v866_v52  ;;  %v2108_v10 = vsel %vm1626_vm10, %v2106_v55, %v2107_v6  ;;  %v2109_v3 = vrot.slane %v4357_v60, 1  ;;  %v2110_v52 = vrot.slane %v5213_v56, 1  ;;  %v6213_v50 = vld [vmem:[#allocation2 + $0x34] sm:$0xf]  ;;  %v1167_v42 = vld [vmem:[#allocation2 + $0x3c] sm:$0xf] }
  0xcf   : > { %3574 = vmatmul.mubr.bf16.gmra.mxu0 %v1882_v31  ;;  %1028 = vst [vmem:[#allocation2 + $0xc4] sm:$0xf] %v867_v54  ;;  %v1671_v17 = vsel %vm1626_vm10, %v1669_v4, %v1670_v24  ;;  %v2304_v31 = vrot.slane %v2302_v47, 1  ;;  %v1915_v62 = vshll.u32 %v5213_v56, 16  ;;  %v2309_v6 = vrot.slane %v2307_v53, 1 }
  0xd0   : > { %3581 = vmatprep.mubr.bf16.mxu0 %v2105_v32  ;;  %5008 = vmatpush3.bf16.msra.mxu0 %v5241_v25  ;;  %v2314_v54 = vshll.u32 %v6200_v41, 16  ;;  %v1165_v4 = vld [vmem:[#allocation2 + $0x30] sm:$0xf]  ;;  %v1908_v24 = vshrl.u32 %v5958_v14, 16  ;;  %v2319_v60 = vshll.u32 %v6203_v12, 16  ;;  %v2111_v34 = vsel %vm1626_vm10, %v2109_v3, %v2110_v52 }
  0xd1   : > { %5009 = vmatprep.subr.bf16.mxu0 %v5248_v9  ;;  %v2305_v55 = vor.u32 %v2304_v31, %v2300_v11  ;;  %v5220_v47 = vld [vmem:[#allocation2 + $0x68] ss:$0 sps:$4 sm:$0x11]   ;;  %v1917_v56 = vrot.slane %v1915_v62, 1  ;;  %v4359_v23 = vcombine.low %v1152_v48, %v6016_v5  ;;  %v6230_v46 = vld [vmem:[#allocation2 + $0x40] sm:$0xf] }
  0xd2   : > { %v1913_v30 = vor.u32 %v1912_v37, %v1908_v24  ;;  %v5224_v11 = vld [vmem:[#allocation2 + $0x74] ss:$0 sps:$4 sm:$0x11]   ;;  %v2113_v53 = vrot.slane %v5220_v47, 1  ;;  %v2321_v3 = vrot.slane %v2319_v60, 1  ;;  %v1934_v5 = vshll.u32 %v6031_v1, 16 }
  0xd3   : > { %v1153_v49 = vld [vmem:[#allocation2 + $0x78] sm:$0xe]  ;;  %v1932_v48 = vshrl.u32 %v6031_v1, 16 }
  0xd4   : > { %3493 = vmatmul.mubr.bf16.gmra.mxu1 %v1668_v18  ;;  %v1126_v18 = vld [vmem:[#allocation2 + $0xc0] sm:$0xf]  ;;  %5010 = vmatpush3.bf16.msra.mxu0 %v5248_v9  ;;  %v4358_v9 = vcombine.low %v1151_v38, %v5997_v27  ;;  %v2310_v27 = vsel %vm1369_vm6, %v2305_v55, %v2309_v6  ;;  %v1927_v38 = vshll.u32 %v5220_v47, 16  ;;  %v1918_v15 = vsel %vm1369_vm6, %v1913_v30, %v1917_v56  ;;  %v1169_v30 = vld [vmem:[#allocation2 + $0x48] sm:$0xf] }
  0xd5   : > { %3500 = vmatprep.mubr.bf16.mxu1 %v6162_v8  ;;  %v2115_v6 = vrot.slane %v4359_v23, 1 }
  0xd6   : > { %v6205_v32 = vld [vmem:[#allocation2 + $0xc4] sm:$0xf]  ;;  %v2112_v14 = vrot.slane %v4358_v9, 1  ;;  %v1929_v55 = vrot.slane %v1927_v38, 1  ;;  %v2116_v9 = vrot.slane %v5224_v11, 1 }
  0xd7   : > { %3582 = vmatmul.mubr.bf16.gmra.mxu0 %v1894_v0  ;;  %v6208_v25 = vcombine.low %v1126_v18, %v6205_v32  ;;  %v2316_v0 = vrot.slane %v2314_v54, 1  ;;  %v6227_v18 = vld [vmem:[#allocation2 + $0x38] ss:$0 sps:$4 sm:$0x11]  }
  0xd8   : > { %3589 = vmatprep.mubr.bf16.mxu0 %v2108_v10  ;;  %v6223_v10 = vcombine.low %v1165_v4, %v6213_v50  ;;  %v2114_v54 = vsel %vm1626_vm10, %v2112_v14, %v2113_v53  ;;  %v6239_v4 = vcombine.low %v1167_v42, %v6230_v46  ;;  %v2331_v60 = vshll.u32 %v6227_v18, 16  ;;  %v1209_v14 = vld [vmem:[#allocation2 + $0x18] sm:$0xe]  ;;  %v1170_v53 = vld [vmem:[#allocation2 + $0x4c] sm:$0xf] }
  0xd9   : > { %v2317_v35 = vor.u32 %v2316_v0, %v2312_v61  ;;  %v1939_v61 = vshll.u32 %v5224_v11, 16  ;;  %v1946_v0 = vshll.u32 %v6046_v58, 16  ;;  %v2117_v38 = vsel %vm1626_vm10, %v2115_v6, %v2116_v9  ;;  %v1211_v9 = vld [vmem:[#allocation2 + $0x30] sm:$0xe] }
  0xda   : > { %v2326_v52 = vshll.u32 %v6223_v10, 16  ;;  %v2324_v37 = vshrl.u32 %v6223_v10, 16  ;;  %v2338_v56 = vshll.u32 %v6239_v4, 16  ;;  %v2333_v23 = vrot.slane %v2331_v60, 1 }
  0xdb   : > { %v2322_v24 = vsel %vm1369_vm6, %v2317_v35, %v2321_v3  ;;  %v2556_v42 = vrot.slane %v6185_v20, 1  ;;  %v1210_v35 = vld [vmem:[#allocation2 + $0x24] sm:$0xe]  ;;  %v868_v3 = vrot.slane %v6164_v2, 4  ;;  %v1944_v6 = vshrl.u32 %v6046_v58, 16 }
  0xdc   : > { %3501 = vmatmul.mubr.bf16.gmra.mxu1 %v1671_v17  ;;  %v1924_v17 = vrot.slane %v1922_v26, 1  ;;  %v2328_v47 = vrot.slane %v2326_v52, 1  ;;  %v1941_v52 = vrot.slane %v1939_v61, 1  ;;  %v6266_v20 = vcombine.low %v1169_v30, %v1170_v53  ;;  %v1212_v2 = vld [vmem:[#allocation2 + $0x3c] sm:$0xe] }
  0xdd   : > { %3508 = vmatprep.mubr.bf16.mxu1 %v6208_v25  ;;  %v4402_v61 = vcombine.low %v1212_v2, %v6230_v46  ;;  %v1956_v58 = vshrl.u32 %v6070_v28, 16 }
  0xde   : > { %v1925_v62 = vor.u32 %v1924_v17, %v1920_v44  ;;  %v6253_v17 = vld [vmem:[#allocation2 + $0x80] ss:$0 sps:$4 sm:$0x11]  }
  0xdf   : > { %3590 = vmatmul.mubr.bf16.gmra.mxu0 %v1906_v40  ;;  %v1936_v40 = vrot.slane %v1934_v5, 1  ;;  %v2559_v5 = vrot.slane %v6203_v12, 1 }
  0xe0   : > { %3597 = vmatprep.mubr.bf16.mxu0 %v2111_v34  ;;  %v6244_v34 = vld [vmem:[#allocation2 + $0x44] ss:$0 sps:$4 sm:$0x11]   ;;  %v1930_v44 = vsel %vm1369_vm6, %v1925_v62, %v1929_v55  ;;  %v2119_v55 = vrot.slane %v6253_v17, 1 }
  0xe1   : > { %v1937_v11 = vor.u32 %v1936_v40, %v1932_v48  ;;  %v1154_v48 = vld [vmem:[#allocation2 + $0x84] sm:$0xe] }
  0xe2   : > { %v4361_v30 = vcombine.low %v1154_v48, %v6061_v33 }
  0xe4   : > { %3509 = vmatmul.mubr.bf16.gmra.mxu1 %v1674_v57  ;;  %v509_v57 = vld [vmem:[#allocation2 + $0xc8] sm:$0x1] }
  0xe5   : > { %3710 = vmatprep.mubr.bf16.mxu1 %v2310_v27  ;;  %v4360_v27 = vcombine.low %v1153_v49, %v6037_v63  ;;  %v510_v1 = vsel %vm5400_vm4, 0, %v509_v57  ;;  %v2329_v63 = vor.u32 %v2328_v47, %v2324_v37  ;;  %v2336_v49 = vshrl.u32 %v6239_v4, 16 }
  0xe6   : > { %511 = vst [vmem:[#allocation2 + $0xc8] sm:$0x1] %v510_v1  ;;  %v4401_v57 = vcombine.low %v1211_v9, %v6213_v50  ;;  %v1951_v50 = vshll.u32 %v6253_v17, 16  ;;  %v6290_v17 = vld [vmem:[#allocation2 + $0x5c] ss:$0 sps:$4 sm:$0x11]  }
  0xe7   : > { %3598 = vmatmul.mubr.bf16.gmra.mxu0 %v1918_v15  ;;  %v2340_v15 = vrot.slane %v2338_v56, 1  ;;  %v2571_v48 = vrot.slane %v6290_v17, 1 }
  0xe8   : > { %3605 = vmatprep.mubr.bf16.mxu0 %v2114_v54  ;;  %v2334_v54 = vsel %vm1369_vm6, %v2329_v63, %v2333_v23  ;;  %v2561_v46 = vrot.slane %v4401_v57, 1  ;;  %v2564_v23 = vrot.slane %v4402_v61, 1  ;;  %v2121_v61 = vrot.slane %v4361_v30, 1 }
  0xe9   : > { %v2341_v1 = vor.u32 %v2340_v15, %v2336_v49 }
  0xec   : > { %v4539_v31 = vpop.f32.mrf.mxu0  ;;  %3711 = vmatmul.mubr.bf16.vlgmr.msra.gmra.mxu1 %v6170_v19  ;;  %v4399_v19 = vcombine.low %v1209_v14, %v6152_v21  ;;  %v4400_v21 = vcombine.low %v1210_v35, %v6189_v29  ;;  %v5240_v29 = vld [vmem:[#allocation2 + $0x50] ss:$0 sps:$4 sm:$0x11]  }
  0xed   : > { %3718 = vmatprep.mubr.bf16.mxu1 %v2322_v24  ;;  %v1948_v24 = vrot.slane %v1946_v0, 1  ;;  %v1029_v40 = vld [vmem:[#allocation2 + $0xc8] sm:$0x1]  ;;  %v2568_v33 = vrot.slane %v5240_v29, 1 }
  0xee   : > { %v4540_v26 = vpop.f32.mrf.mxu0  ;;  %v2555_v62 = vrot.slane %v4399_v19, 1  ;;  %v2558_v47 = vrot.slane %v4400_v21, 1  ;;  %v1030_v56 = vsel %vm5392_vm3, %v868_v3, %v1029_v40  ;;  %v1942_v19 = vsel %vm1369_vm6, %v1937_v11, %v1941_v52  ;;  %v1214_v3 = vld [vmem:[#allocation2 + $0x54] sm:$0xe]  ;;  %v1155_v40 = vld [vmem:[#allocation2 + $0x90] sm:$0xe] }
  0xef   : > { %v6233_v51 = vadd.f32 %v4540_v26, %v4539_v31  ;;  %v2343_v31 = vshll.u32 %v6244_v34, 16  ;;  %v2118_v26 = vrot.slane %v4360_v27, 1  ;;  %3606 = vmatmul.mubr.bf16.gmra.mxu0 %v1930_v44  ;;  %v2562_v27 = vrot.slane %v6227_v18, 1  ;;  %v1213_v44 = vld [vmem:[#allocation2 + $0x48] sm:$0xe] }
  0xf0   : > { %v6269_v12 = vsel %vm1626_vm10, %v2555_v62, %v2556_v42  ;;  %3613 = vmatprep.mubr.bf16.mxu0 %v2117_v38  ;;  %v6275_v0 = vpop.f32.mrf.mxu0  ;;  %v6280_v14 = vsel %vm1626_vm10, %v2558_v47, %v2559_v5  ;;  %v2350_v18 = vshll.u32 %v6266_v20, 16  ;;  %1031 = vst [vmem:[#allocation2 + $0xc8] sm:$0x1] %v1030_v56  ;;  %v1172_v42 = vld [vmem:[#allocation2 + $0x58] sm:$0xf]  ;;  %v4403_v35 = vcombine.low %v1213_v44, %v1170_v53 }
  0xf1   : > { %v2345_v37 = vrot.slane %v2343_v31, 1  ;;  %v1171_v31 = vld [vmem:[#allocation2 + $0x54] sm:$0xf]  ;;  %v6293_v49 = vsel %vm1626_vm10, %v2561_v46, %v2562_v27  ;;  %v5231_v62 = vld [vmem:[#allocation2 + $0x8c] ss:$0 sps:$4 sm:$0x11]   ;;  %v4404_v2 = vcombine.low %v1214_v3, %v1172_v42  ;;  %v1949_v57 = vor.u32 %v1948_v24, %v1944_v6 }
  0xf2   : > { %v2348_v52 = vshrl.u32 %v6266_v20, 16  ;;  %v2355_v21 = vshll.u32 %v5240_v29, 16  ;;  %v6300_v53 = vpop.f32.mrf.mxu0  ;;  %v6302_v9 = vcombine.low %v1171_v31, %v1172_v42  ;;  %v1953_v27 = vrot.slane %v1951_v50, 1  ;;  %v5235_v42 = vld [vmem:[#allocation2 + $0x98] ss:$0 sps:$4 sm:$0x11]  }
  0xf3   : > { %v2346_v11 = vsel %vm1369_vm6, %v2341_v1, %v2345_v37  ;;  %v1958_v37 = vshll.u32 %v6070_v28, 16  ;;  %v2570_v29 = vrot.slane %v4404_v2, 1  ;;  %v2122_v1 = vrot.slane %v5231_v62, 1  ;;  %v6336_v2 = vld [vmem:[#allocation2 + $0x68] ss:$0 sps:$4 sm:$0x11]  }
  0xf4   : > { %3719 = vmatmul.mubr.bf16.gmra.mxu1 %v6200_v41  ;;  %v2565_v41 = vrot.slane %v6244_v34, 1  ;;  %v2120_v34 = vsel %vm1626_vm10, %v2118_v26, %v2119_v55  ;;  %v2352_v26 = vrot.slane %v2350_v18, 1  ;;  %v2357_v44 = vrot.slane %v2355_v21, 1 }
  0xf5   : > { %v4611_v60 = vpop.f32.mrf.mxu1  ;;  %3726 = vmatprep.mubr.bf16.mxu1 %v2334_v54  ;;  %v2567_v54 = vrot.slane %v4403_v35, 1  ;;  %v2362_v18 = vshll.u32 %v6302_v9, 16  ;;  %v4362_v46 = vcombine.low %v1155_v40, %v6081_v7  ;;  %v1960_v6 = vrot.slane %v1958_v37, 1 }
  0xf6   : > { %v6296_v15 = vsel %vm1626_vm10, %v2564_v23, %v2565_v41  ;;  %v2353_v41 = vor.u32 %v2352_v26, %v2348_v52  ;;  %v1173_v23 = vld [vmem:[#allocation2 + $0x60] sm:$0xf]  ;;  %v1963_v24 = vshll.u32 %v5231_v62, 16  ;;  %v1954_v30 = vsel %vm1369_vm6, %v1949_v57, %v1953_v27 }
  0xf7   : > { %v4612_v63 = vpop.f32.mrf.mxu1  ;;  %3614 = vmatmul.mubr.bf16.gmra.mxu0 %v1942_v19  ;;  %v6319_v19 = vld [vmem:[#allocation2 + $0x64] sm:$0xf]  ;;  %v2123_v31 = vsel %vm1626_vm10, %v2121_v61, %v2122_v1  ;;  %v2360_v3 = vshrl.u32 %v6302_v9, 16  ;;  %v1970_v28 = vshll.u32 %v6093_v39, 16  ;;  %v2124_v52 = vrot.slane %v4362_v46, 1 }
  0xf8   : > { %v6287_v38 = vadd.f32 %v4612_v63, %v4611_v60  ;;  %v6308_v60 = vsel %vm1626_vm10, %v2567_v54, %v2568_v33  ;;  %3621 = vmatprep.mubr.bf16.mxu0 %v2120_v34  ;;  %v6316_v63 = vsel %vm1626_vm10, %v2570_v29, %v2571_v48  ;;  %v2358_v7 = vsel %vm1369_vm6, %v2353_v41, %v2357_v44  ;;  %v1175_v1 = vld [vmem:[#allocation2 + $0x6c] sm:$0xf] }
  0xf9   : > { %v4614_v5 = vpop.f32.mrf.mxu1  ;;  %v2364_v34 = vrot.slane %v2362_v18, 1  ;;  %v6330_v33 = vcombine.low %v1173_v23, %v6319_v19  ;;  %v1961_v26 = vor.u32 %v1960_v6, %v1956_v58  ;;  %v1968_v48 = vshrl.u32 %v6093_v39, 16  ;;  %v5238_v39 = vld [vmem:[#allocation2 + $0xa4] ss:$0 sps:$4 sm:$0x11]  }
  0xfa   : > { %v1972_v27 = vrot.slane %v1970_v28, 1  ;;  %v1975_v61 = vshll.u32 %v5235_v42, 16 }
  0xfb   : > { %v4615_v55 = vpop.f32.mrf.mxu1  ;;  %v2365_v37 = vor.u32 %v2364_v34, %v2360_v3  ;;  %v2374_v57 = vshll.u32 %v6330_v33, 16  ;;  %v2372_v6 = vshrl.u32 %v6330_v33, 16  ;;  %v1157_v3 = vld [vmem:[#allocation2 + $0xa8] sm:$0xe]  ;;  %v2128_v34 = vrot.slane %v5238_v39, 1 }
  0xfc   : > { %v6305_v47 = vadd.f32 %v4615_v55, %v4614_v5  ;;  %3727 = vmatmul.mubr.bf16.gmra.mxu1 %v6223_v10  ;;  %v2367_v5 = vshll.u32 %v6290_v17, 16  ;;  %v2125_v55 = vrot.slane %v5235_v42, 1  ;;  %v1156_v17 = vld [vmem:[#allocation2 + $0x9c] sm:$0xe]  ;;  %v1977_v42 = vrot.slane %v1975_v61, 1 }
  0xfd   : > { %3734 = vmatprep.mubr.bf16.mxu1 %v2346_v11  ;;  %v1965_v11 = vrot.slane %v1963_v24, 1  ;;  %v4363_v44 = vcombine.low %v1156_v17, %v6102_v43  ;;  %v2376_v24 = vrot.slane %v2374_v57, 1  ;;  %v1982_v43 = vshll.u32 %v6109_v59, 16 }
  0xfe   : > { %v2369_v40 = vrot.slane %v2367_v5, 1  ;;  %v2126_v46 = vsel %vm1626_vm10, %v2124_v52, %v2125_v55  ;;  %v6357_v52 = vld [vmem:[#allocation2 + $0x74] ss:$0 sps:$4 sm:$0x11]   ;;  %v4364_v55 = vcombine.low %v1157_v3, %v6126_v36 }
  0xff   : > { %3622 = vmatmul.mubr.bf16.gmra.mxu0 %v1954_v30  ;;  %v1966_v18 = vsel %vm1369_vm6, %v1961_v26, %v1965_v11  ;;  %v2377_v11 = vor.u32 %v2376_v24, %v2372_v6  ;;  %v512_v26 = vld [vmem:[#allocation2 + $0xd4] sm:$0x1] }
 0x100   : > { %3629 = vmatprep.mubr.bf16.mxu0 %v2123_v31  ;;  %v2370_v23 = vsel %vm1369_vm6, %v2365_v37, %v2369_v40  ;;  %v1973_v31 = vor.u32 %v1972_v27, %v1968_v48  ;;  %v1177_v37 = vld [vmem:[#allocation2 + $0x78] sm:$0xf]  ;;  %v1980_v40 = vshrl.u32 %v6109_v59, 16 }
 0x102   : > { %v4545_v56 = vpop.f32.mrf.mxu0  ;;  %v1978_v17 = vsel %vm1369_vm6, %v1973_v31, %v1977_v42  ;;  %v2130_v42 = vrot.slane %v4364_v55, 1  ;;  %v4365_v55 = vcombine.low %v1158_v16, %v6149_v45  ;;  %v2006_v45 = vshll.u32 %v6162_v8, 16 }
 0x104   : > { %v4546_v10 = vpop.f32.mrf.mxu0  ;;  %3735 = vmatmul.mubr.bf16.gmra.mxu1 %v6239_v4 }
 0x105   : > { %v6322_v50 = vadd.f32 %v4546_v10, %v4545_v56  ;;  %3742 = vmatprep.mubr.bf16.mxu1 %v2358_v7  ;;  %v6342_v56 = vld [vmem:[#allocation2 + $0x70] sm:$0xf]  ;;  %v2379_v10 = vshll.u32 %v6336_v2, 16  ;;  %v2127_v7 = vrot.slane %v4363_v44, 1 }
 0x106   : > { %v4548_v35 = vpop.f32.mrf.mxu0  ;;  %v6351_v30 = vcombine.low %v1175_v1, %v6342_v56  ;;  %v1987_v1 = vshll.u32 %v5238_v39, 16  ;;  %v1994_v39 = vshll.u32 %v6140_v22, 16 }
 0x107   : > { %v4617_v21 = vpop.f32.mrf.mxu1  ;;  %3630 = vmatmul.mubr.bf16.gmra.mxu0 %v1966_v18  ;;  %v2381_v28 = vrot.slane %v2379_v10, 1  ;;  %v2129_v61 = vsel %vm1626_vm10, %v2127_v7, %v2128_v34  ;;  %v513_v18 = vsel %vm5400_vm4, 0, %v512_v26  ;;  %v2391_v10 = vshll.u32 %v6357_v52, 16 }
 0x108   : > { %v4549_v62 = vpop.f32.mrf.mxu0  ;;  %3637 = vmatprep.mubr.bf16.mxu0 %v2126_v46  ;;  %v2384_v36 = vshrl.u32 %v6351_v30, 16  ;;  %514 = vst [vmem:[#allocation2 + $0xd4] sm:$0x1] %v513_v18  ;;  %v1989_v31 = vrot.slane %v1987_v1, 1  ;;  %v1996_v26 = vrot.slane %v1994_v39, 1 }
 0x109   : > { %v6334_v54 = vadd.f32 %v4549_v62, %v4548_v35  ;;  %v4618_v29 = vpop.f32.mrf.mxu1  ;;  %v456_v62 = vld [vmem:[#allocation2 + $0xcc] sm:$0x1]  ;;  %v2382_v46 = vsel %vm1369_vm6, %v2377_v11, %v2381_v28  ;;  %v2393_v34 = vrot.slane %v2391_v10, 1  ;;  %v6387_v11 = vld [vmem:[#allocation2 + $0x88] sm:$0xf]  ;;  %v2133_v10 = vrot.slane %v4365_v55, 1 }
 0x10a   : > { %v6340_v4 = vadd.f32 %v4618_v29, %v4617_v21  ;;  %v2386_v21 = vshll.u32 %v6351_v30, 16  ;;  %v1984_v29 = vrot.slane %v1982_v43, 1  ;;  %v457_v27 = vsel %vm5392_vm3, 0, %v456_v62  ;;  %v6403_v39 = vld [vmem:[#allocation2 + $0x8c] ss:$0 sps:$4 sm:$0x11]  }
 0x10b   : > { %v4620_v41 = vpop.f32.mrf.mxu1  ;;  %458 = vst [vmem:[#allocation2 + $0xcc] sm:$0x1] %v457_v27  ;;  %v5249_v55 = vld [vmem:[#allocation2 + $0xc8] ss:$0 sps:$4 sm:$0x11]  }
 0x10c   : > { %3743 = vmatmul.mubr.bf16.gmra.mxu1 %v6266_v20  ;;  %v6362_v20 = vld [vmem:[#allocation2 + $0x7c] sm:$0xf]  ;;  %v2388_v59 = vrot.slane %v2386_v21, 1  ;;  %v1985_v24 = vor.u32 %v1984_v29, %v1980_v40  ;;  %v1992_v21 = vshrl.u32 %v6140_v22, 16 }
 0x10d   : > { %v4621_v58 = vpop.f32.mrf.mxu1  ;;  %3750 = vmatprep.mubr.bf16.mxu1 %v2370_v23  ;;  %v6376_v23 = vcombine.low %v1177_v37, %v6362_v20  ;;  %v5245_v29 = vld [vmem:[#allocation2 + $0xbc] ss:$0 sps:$4 sm:$0x11]  }
 0x10e   : > { %v6353_v35 = vadd.f32 %v4621_v58, %v4620_v41  ;;  %v4551_v5 = vpop.f32.mrf.mxu0  ;;  %v5242_v41 = vld [vmem:[#allocation2 + $0xb0] ss:$0 sps:$4 sm:$0x11]   ;;  %v2389_v7 = vor.u32 %v2388_v59, %v2384_v36  ;;  %v1990_v37 = vsel %vm1369_vm6, %v1985_v24, %v1989_v31 }
 0x10f   : > { %3638 = vmatmul.mubr.bf16.gmra.mxu0 %v1978_v17  ;;  %v2131_v43 = vrot.slane %v5242_v41, 1  ;;  %v2398_v28 = vshll.u32 %v6376_v23, 16  ;;  %v1999_v17 = vshll.u32 %v5242_v41, 16  ;;  %v2396_v27 = vshrl.u32 %v6376_v23, 16 }
 0x110   : > { %v4552_v48 = vpop.f32.mrf.mxu0  ;;  %3645 = vmatprep.mubr.bf16.mxu0 %v2129_v61  ;;  %v2394_v1 = vsel %vm1369_vm6, %v2389_v7, %v2393_v34  ;;  %v6408_v7 = vld [vmem:[#allocation2 + $0x94] sm:$0xf]  ;;  %v2008_v34 = vrot.slane %v2006_v45, 1 }
 0x111   : > { %v6365_v57 = vadd.f32 %v4552_v48, %v4551_v5  ;;  %v6382_v5 = vld [vmem:[#allocation2 + $0x80] ss:$0 sps:$4 sm:$0x11]   ;;  %v2132_v40 = vsel %vm1626_vm10, %v2130_v42, %v2131_v43  ;;  %v2001_v59 = vrot.slane %v1999_v17, 1 }
 0x112   : > { %v4554_v44 = vpop.f32.mrf.mxu0  ;;  %v2403_v36 = vshll.u32 %v6382_v5, 16 }
 0x114   : > { %v4555_v13 = vpop.f32.mrf.mxu0  ;;  %3751 = vmatmul.mubr.bf16.gmra.mxu1 %v6302_v9  ;;  %v4623_v58 = vpop.f32.mrf.mxu1  ;;  %v1179_v9 = vld [vmem:[#allocation2 + $0x84] sm:$0xf]  ;;  %v2405_v31 = vrot.slane %v2403_v36, 1  ;;  %v2018_v36 = vshll.u32 %v6208_v25, 16 }
 0x115   : > { %v6380_v6 = vadd.f32 %v4555_v13, %v4554_v44  ;;  %3758 = vmatprep.mubr.bf16.mxu1 %v2382_v46  ;;  %v2400_v44 = vrot.slane %v2398_v28, 1  ;;  %v6397_v22 = vcombine.low %v1179_v9, %v6387_v11  ;;  %v1997_v46 = vor.u32 %v1996_v26, %v1992_v21 }
 0x116   : > { %v4624_v3 = vpop.f32.mrf.mxu1  ;;  %v2134_v13 = vrot.slane %v5245_v29, 1  ;;  %v2011_v28 = vshll.u32 %v5245_v29, 16 }
 0x117   : > { %v6385_v62 = vadd.f32 %v4624_v3, %v4623_v58  ;;  %3646 = vmatmul.mubr.bf16.gmra.mxu0 %v1990_v37  ;;  %v1159_v58 = vld [vmem:[#allocation2 + $0xc0] sm:$0xe]  ;;  %v2401_v24 = vor.u32 %v2400_v44, %v2396_v27  ;;  %v2410_v42 = vshll.u32 %v6397_v22, 16  ;;  %v1181_v3 = vld [vmem:[#allocation2 + $0x90] sm:$0xf]  ;;  %v2002_v26 = vsel %vm1369_vm6, %v1997_v46, %v2001_v59 }
 0x118   : > { %v4626_v48 = vpop.f32.mrf.mxu1  ;;  %3653 = vmatprep.mubr.bf16.mxu0 %v2132_v40  ;;  %v4366_v21 = vcombine.low %v1159_v58, %v6205_v32  ;;  %v2135_v17 = vsel %vm1626_vm10, %v2133_v10, %v2134_v13  ;;  %v2408_v27 = vshrl.u32 %v6397_v22, 16  ;;  %v6424_v46 = vld [vmem:[#allocation2 + $0x98] ss:$0 sps:$4 sm:$0x11]   ;;  %v2137_v59 = vrot.slane %v5249_v55, 1 }
 0x119   : > { %v2406_v40 = vsel %vm1369_vm6, %v2401_v24, %v2405_v31  ;;  %v6427_v24 = vld [vmem:[#allocation2 + $0xa0] sm:$0xf] }
 0x11a   : > { %v4627_v61 = vpop.f32.mrf.mxu1  ;;  %v2136_v45 = vrot.slane %v4366_v21, 1 }
 0x11b   : > { %v6399_v41 = vadd.f32 %v4627_v61, %v4626_v48  ;;  %v2415_v48 = vshll.u32 %v6403_v39, 16  ;;  %v2412_v61 = vrot.slane %v2410_v42, 1  ;;  %v2016_v42 = vshrl.u32 %v6208_v25, 16 }
 0x11c   : > { %3759 = vmatmul.mubr.bf16.gmra.mxu1 %v6330_v33  ;;  %v2004_v33 = vshrl.u32 %v6162_v8, 16  ;;  %v6418_v8 = vcombine.low %v1181_v3, %v6408_v7  ;;  %v2138_v21 = vsel %vm1626_vm10, %v2136_v45, %v2137_v59 }
 0x11d   : > { %3766 = vmatprep.mubr.bf16.mxu1 %v2394_v1  ;;  %v2013_v1 = vrot.slane %v2011_v28, 1  ;;  %v2413_v13 = vor.u32 %v2412_v61, %v2408_v27  ;;  %v2427_v28 = vshll.u32 %v6424_v46, 16 }
 0x11e   : > { %v4557_v18 = vpop.f32.mrf.mxu0  ;;  %v2009_v32 = vor.u32 %v2008_v34, %v2004_v33  ;;  %v2422_v58 = vshll.u32 %v6418_v8, 16  ;;  %v2020_v33 = vrot.slane %v2018_v36, 1  ;;  %v2023_v34 = vshll.u32 %v5249_v55, 16 }
 0x11f   : > { %3654 = vmatmul.mubr.bf16.gmra.mxu0 %v2002_v26 }
 0x120   : > { %v4558_v16 = vpop.f32.mrf.mxu0  ;;  %3661 = vmatprep.mubr.bf16.mxu0 %v2135_v17  ;;  %v2021_v55 = vor.u32 %v2020_v33, %v2016_v42  ;;  %v2025_v61 = vrot.slane %v2023_v34, 1 }
 0x121   : > { %v6406_v43 = vadd.f32 %v4558_v16, %v4557_v18  ;;  %v2417_v18 = vrot.slane %v2415_v48, 1  ;;  %v1183_v16 = vld [vmem:[#allocation2 + $0x9c] sm:$0xf]  ;;  %v2420_v48 = vshrl.u32 %v6418_v8, 16 }
 0x122   : > { %v4560_v9 = vpop.f32.mrf.mxu0  ;;  %v2026_v42 = vsel %vm1369_vm6, %v2021_v55, %v2025_v61 }
 0x123   : > { %v2418_v17 = vsel %vm1369_vm6, %v2413_v13, %v2417_v18  ;;  %v2429_v18 = vrot.slane %v2427_v28, 1  ;;  %v1185_v13 = vld [vmem:[#allocation2 + $0xa8] sm:$0xf] }
 0x124   : > { %v4561_v37 = vpop.f32.mrf.mxu0  ;;  %v4629_v44 = vpop.f32.mrf.mxu1  ;;  %3767 = vmatmul.mubr.bf16.gmra.mxu1 %v6351_v30  ;;  %v2014_v30 = vsel %vm1369_vm6, %v2009_v32, %v2013_v1  ;;  %v6443_v32 = vld [vmem:[#allocation2 + $0xa4] ss:$0 sps:$4 sm:$0x11]  }
 0x125   : > { %v6420_v29 = vadd.f32 %v4561_v37, %v4560_v9  ;;  %3774 = vmatprep.mubr.bf16.mxu1 %v2406_v40  ;;  %v6435_v9 = vcombine.low %v1183_v16, %v6427_v24  ;;  %v2424_v37 = vrot.slane %v2422_v58, 1  ;;  %v6448_v58 = vld [vmem:[#allocation2 + $0xac] sm:$0xf]  ;;  %v2439_v34 = vshll.u32 %v6443_v32, 16 }
 0x126   : > { %v4630_v10 = vpop.f32.mrf.mxu1 }
 0x127   : > { %v6429_v31 = vadd.f32 %v4630_v10, %v4629_v44  ;;  %3662 = vmatmul.mubr.bf16.gmra.mxu0 %v2014_v30  ;;  %v2434_v1 = vshll.u32 %v6435_v9, 16  ;;  %v2425_v45 = vor.u32 %v2424_v37, %v2420_v48  ;;  %v2432_v30 = vshrl.u32 %v6435_v9, 16 }
 0x128   : > { %v4632_v3 = vpop.f32.mrf.mxu1  ;;  %3669 = vmatprep.mubr.bf16.mxu0 %v2138_v21  ;;  %v4544_v48 = vadd.f32 %v6300_v53, %v6275_v0  ;;  %v2441_v61 = vrot.slane %v2439_v34, 1 }
 0x129   : > { %v2436_v33 = vrot.slane %v2434_v1, 1  ;;  %v6468_v1 = vld [vmem:[#allocation2 + $0xb0] ss:$0 sps:$4 sm:$0x11]  }
 0x12a   : > { %v4633_v26 = vpop.f32.mrf.mxu1 }
 0x12b   : > { %v6440_v40 = vadd.f32 %v4633_v26, %v4632_v3  ;;  %v4563_v25 = vpop.f32.mrf.mxu0  ;;  %v2430_v26 = vsel %vm1369_vm6, %v2425_v45, %v2429_v18  ;;  %v2437_v55 = vor.u32 %v2436_v33, %v2432_v30  ;;  %v1187_v45 = vld [vmem:[#allocation2 + $0xb4] sm:$0xf]  ;;  %v6471_v18 = vld [vmem:[#allocation2 + $0xb8] sm:$0xf] }
 0x12c   : > { %v4651_v27 = vpop.f32.mrf.mxu1  ;;  %3775 = vmatmul.mubr.bf16.gmra.mxu1 %v6376_v23  ;;  %v6482_v34 = vcombine.low %v1187_v45, %v6471_v18 }
 0x12d   : > { %3782 = vmatprep.mubr.bf16.mxu1 %v2418_v17  ;;  %v4564_v44 = vpop.f32.mrf.mxu0  ;;  %v6458_v17 = vcombine.low %v1185_v13, %v6448_v58 }
 0x12e   : > { %v4652_v36 = vpop.f32.mrf.mxu1  ;;  %v6446_v59 = vadd.f32 %v4564_v44, %v4563_v25 }
 0x12f   : > { %v4653_v10 = vadd.f32 %v4652_v36, %v4651_v27  ;;  %v4566_v16 = vpop.f32.mrf.mxu0  ;;  %3670 = vmatmul.mubr.bf16.gmra.mxu0 %v2026_v42  ;;  %v2446_v36 = vshll.u32 %v6458_v17, 16  ;;  %v2444_v42 = vshrl.u32 %v6458_v17, 16 }
 0x130   : > { %v4654_v23 = vpop.f32.mrf.mxu1  ;;  %5011 = vmatprep.mubr.bf16.mxu0 %v6269_v12  ;;  %v2442_v12 = vsel %vm1369_vm6, %v2437_v55, %v2441_v61 }
 0x131   : > { %v6453_v3 = vadd.f32 %v4653_v10, %v6233_v51  ;;  %v4567_v21 = vpop.f32.mrf.mxu0  ;;  %v2448_v33 = vrot.slane %v2446_v36, 1 }
 0x132   : > { %v4655_v28 = vpop.f32.mrf.mxu1  ;;  %v6462_v37 = vadd.f32 %v4567_v21, %v4566_v16  ;;  %v2451_v16 = vshll.u32 %v6468_v1, 16 }
 0x133   : > { %v4656_v25 = vadd.f32 %v4655_v28, %v4654_v23 }
 0x134   : > { %v4657_v27 = vpop.f32.mrf.mxu1  ;;  %3783 = vmatmul.mubr.bf16.gmra.mxu1 %v6397_v22  ;;  %v2453_v36 = vrot.slane %v2451_v16, 1  ;;  %v2456_v16 = vshrl.u32 %v6482_v34, 16 }
 0x135   : > { %v6466_v51 = vadd.f32 %v4656_v25, %v4544_v48  ;;  %3790 = vmatprep.mubr.bf16.mxu1 %v2430_v26  ;;  %v1215_v25 = vld [vmem:[#allocation2 + $0x60] sm:$0xe] }
 0x136   : > { %v4658_v44 = vpop.f32.mrf.mxu1  ;;  %v4569_v0 = vpop.f32.mrf.mxu0 }
 0x137   : > { %v4659_v53 = vadd.f32 %v4658_v44, %v4657_v27  ;;  %5012 = vmatmul.mubr.bf16.vlgmr.msra.gmra.mxu0 %v6280_v14  ;;  %v6490_v27 = vld [vmem:[#allocation2 + $0xbc] ss:$0 sps:$4 sm:$0x11]   ;;  %v2449_v44 = vor.u32 %v2448_v33, %v2444_v42  ;;  %v2458_v14 = vshll.u32 %v6482_v34, 16 }
 0x138   : > { %v4660_v10 = vpop.f32.mrf.mxu1  ;;  %v4570_v13 = vpop.f32.mrf.mxu0  ;;  %5015 = vmatprep.mubr.bf16.mxu0 %v6293_v49  ;;  %v4405_v49 = vcombine.low %v1215_v25, %v6319_v19  ;;  %v1216_v25 = vld [vmem:[#allocation2 + $0x6c] sm:$0xe] }
 0x139   : > { %v6474_v22 = vadd.f32 %v4659_v53, %v6322_v50  ;;  %v6478_v23 = vadd.f32 %v4570_v13, %v4569_v0  ;;  %v1189_v53 = vld [vmem:[#allocation2 + $0xc0] sm:$0xf]  ;;  %v2460_v42 = vrot.slane %v2458_v14, 1  ;;  %v1217_v14 = vld [vmem:[#allocation2 + $0x78] sm:$0xe] }
 0x13a   : > { %v4661_v30 = vpop.f32.mrf.mxu1  ;;  %v4572_v21 = vpop.f32.mrf.mxu0 }
 0x13b   : > { %v4662_v28 = vadd.f32 %v4661_v30, %v4660_v10  ;;  %v2463_v10 = vshll.u32 %v6490_v27, 16  ;;  %v2454_v30 = vsel %vm1369_vm6, %v2449_v44, %v2453_v36  ;;  %v6516_v44 = vld [vmem:[#allocation2 + $0xc8] ss:$0 sps:$4 sm:$0x11]  }
 0x13c   : > { %v4663_v26 = vpop.f32.mrf.mxu1  ;;  %3791 = vmatmul.mubr.bf16.gmra.mxu1 %v6418_v8  ;;  %v4573_v50 = vpop.f32.mrf.mxu0  ;;  %v6495_v8 = vld [vmem:[#allocation2 + $0xc4] sm:$0xf] }
 0x13d   : > { %v6488_v48 = vadd.f32 %v4662_v28, %v6334_v54  ;;  %3798 = vmatprep.mubr.bf16.mxu1 %v2442_v12  ;;  %v6492_v55 = vadd.f32 %v4573_v50, %v4572_v21  ;;  %v6505_v33 = vcombine.low %v1189_v53, %v6495_v8  ;;  %v2573_v28 = vrot.slane %v4405_v49, 1 }
 0x13e   : > { %v4664_v61 = vpop.f32.mrf.mxu1  ;;  %v2465_v53 = vrot.slane %v2463_v10, 1  ;;  %v2475_v10 = vshll.u32 %v6516_v44, 16 }
 0x13f   : > { %v4665_v0 = vadd.f32 %v4664_v61, %v4663_v26  ;;  %5016 = vmatmul.mubr.bf16.gmra.mxu0 %v6296_v15 }
 0x140   : > { %v4666_v45 = vpop.f32.mrf.mxu1  ;;  %v4575_v13 = vpop.f32.mrf.mxu0  ;;  %5019 = vmatprep.mubr.bf16.mxu0 %v6308_v60 }
 0x141   : > { %v6499_v54 = vadd.f32 %v4665_v0, %v6365_v57  ;;  %v2574_v57 = vrot.slane %v6336_v2, 1  ;;  %v2461_v0 = vor.u32 %v2460_v42, %v2456_v16  ;;  %v2470_v2 = vshll.u32 %v6505_v33, 16 }
 0x142   : > { %v4667_v12 = vpop.f32.mrf.mxu1  ;;  %v4576_v19 = vpop.f32.mrf.mxu0  ;;  %v4407_v16 = vcombine.low %v1217_v14, %v6362_v20  ;;  %v1218_v14 = vld [vmem:[#allocation2 + $0x84] sm:$0xe] }
 0x143   : > { %v4668_v21 = vadd.f32 %v4667_v12, %v4666_v45  ;;  %v6511_v50 = vadd.f32 %v4576_v19, %v4575_v13  ;;  %v6519_v45 = vld [vmem:[#allocation2 + $0xd0] sm:$0xf]  ;;  %v2575_v13 = vsel %vm1626_vm10, %v2573_v28, %v2574_v57  ;;  %v2466_v19 = vsel %vm1369_vm6, %v2461_v0, %v2465_v53 }
 0x144   : > { %v4669_v26 = vpop.f32.mrf.mxu1  ;;  %3799 = vmatmul.mubr.bf16.gmra.mxu1 %v6435_v9  ;;  %v4578_v36 = vpop.f32.mrf.mxu0  ;;  %v1191_v9 = vld [vmem:[#allocation2 + $0xcc] sm:$0xf]  ;;  %v2579_v20 = vrot.slane %v4407_v16, 1 }
 0x145   : > { %v6514_v61 = vadd.f32 %v4668_v21, %v6380_v6  ;;  %3806 = vmatprep.mubr.bf16.mxu1 %v2454_v30  ;;  %v4406_v6 = vcombine.low %v1216_v25, %v6342_v56  ;;  %v6533_v28 = vcombine.low %v1191_v9, %v6519_v45 }
 0x146   : > { %v4670_v15 = vpop.f32.mrf.mxu1  ;;  %v4579_v60 = vpop.f32.mrf.mxu0 }
 0x147   : > { %v4671_v49 = vadd.f32 %v4670_v15, %v4669_v26  ;;  %v6523_v30 = vadd.f32 %v4579_v60, %v4578_v36  ;;  %v2468_v26 = vshrl.u32 %v6505_v33, 16  ;;  %v2472_v15 = vrot.slane %v2470_v2, 1  ;;  %5020 = vmatmul.mubr.bf16.gmra.mxu0 %v6316_v63 }
 0x148   : > { %v4672_v12 = vpop.f32.mrf.mxu1  ;;  %v2576_v57 = vrot.slane %v4406_v6, 1  ;;  %5023 = vmatprep.mubr.bf16.mxu0 %v2575_v13  ;;  %v2580_v36 = vrot.slane %v6382_v5, 1  ;;  %v2477_v63 = vrot.slane %v2475_v10, 1  ;;  %v2482_v60 = vshll.u32 %v6533_v28, 16 }
 0x149   : > { %v6526_v21 = vadd.f32 %v4671_v49, %v6406_v43  ;;  %v2577_v43 = vrot.slane %v6357_v52, 1  ;;  %v1219_v49 = vld [vmem:[#allocation2 + $0x90] sm:$0xe]  ;;  %v2473_v9 = vor.u32 %v2472_v15, %v2468_v26  ;;  %v4408_v13 = vcombine.low %v1218_v14, %v6387_v11  ;;  %v6545_v5 = vld [vmem:[#allocation2 + $0xd4] ss:$0 sps:$4 sm:$0x11]  }
 0x14a   : > { %v4673_v42 = vpop.f32.mrf.mxu1  ;;  %v4409_v10 = vcombine.low %v1219_v49, %v6408_v7  ;;  %v2487_v11 = vshll.u32 %v6545_v5, 16  ;;  %v2583_v7 = vrot.slane %v6403_v39, 1  ;;  %v2586_v49 = vrot.slane %v6424_v46, 1 }
 0x14b   : > { %v4674_v56 = vadd.f32 %v4673_v42, %v4672_v12  ;;  %v4581_v53 = vpop.f32.mrf.mxu0  ;;  %v2578_v6 = vsel %vm1626_vm10, %v2576_v57, %v2577_v43  ;;  %v2478_v15 = vsel %vm1369_vm6, %v2473_v9, %v2477_v63  ;;  %v2484_v57 = vrot.slane %v2482_v60, 1  ;;  %v1220_v9 = vld [vmem:[#allocation2 + $0x9c] sm:$0xe] }
 0x14c   : > { %v4675_v25 = vpop.f32.mrf.mxu1  ;;  %3807 = vmatmul.mubr.bf16.gmra.mxu1 %v6458_v17  ;;  %v4410_v39 = vcombine.low %v1220_v9, %v6427_v24 }
 0x14d   : > { %v6540_v0 = vadd.f32 %v4674_v56, %v6420_v29  ;;  %3814 = vmatprep.mubr.bf16.mxu1 %v2466_v19  ;;  %v4582_v17 = vpop.f32.mrf.mxu0  ;;  %v2581_v29 = vsel %vm1626_vm10, %v2579_v20, %v2580_v36  ;;  %v2480_v56 = vshrl.u32 %v6533_v28, 16 }
 0x14e   : > { %v4676_v2 = vpop.f32.mrf.mxu1  ;;  %v6547_v16 = vadd.f32 %v4582_v17, %v4581_v53  ;;  %v2588_v24 = vrot.slane %v4410_v39, 1 }
 0x14f   : > { %v4677_v52 = vadd.f32 %v4676_v2, %v4675_v25  ;;  %v4584_v19 = vpop.f32.mrf.mxu0  ;;  %5024 = vmatmul.mubr.bf16.gmra.mxu0 %v2578_v6  ;;  %v2585_v2 = vrot.slane %v4409_v10, 1  ;;  %v2485_v60 = vor.u32 %v2484_v57, %v2480_v56 }
 0x150   : > { %v4678_v12 = vpop.f32.mrf.mxu1  ;;  %5027 = vmatprep.mubr.bf16.mxu0 %v2581_v29 }
 0x151   : > { %v6551_v42 = vadd.f32 %v4677_v52, %v6446_v59  ;;  %v4585_v25 = vpop.f32.mrf.mxu0  ;;  %v2582_v59 = vrot.slane %v4408_v13, 1  ;;  %v2489_v52 = vrot.slane %v2487_v11, 1  ;;  %v2587_v46 = vsel %vm1626_vm10, %v2585_v2, %v2586_v49  ;;  %v1223_v2 = vld [vmem:[#allocation2 + $0xc0] sm:$0xe] }
 0x152   : > { %v4679_v26 = vpop.f32.mrf.mxu1  ;;  %v6558_v20 = vadd.f32 %v4585_v25, %v4584_v19 }
 0x153   : > { %v4680_v43 = vadd.f32 %v4679_v26, %v4678_v12  ;;  %v4587_v53 = vpop.f32.mrf.mxu0  ;;  %v2584_v13 = vsel %vm1626_vm10, %v2582_v59, %v2583_v7  ;;  %v1222_v59 = vld [vmem:[#allocation2 + $0xb4] sm:$0xe] }
 0x154   : > { %v4681_v14 = vpop.f32.mrf.mxu1  ;;  %3815 = vmatmul.mubr.bf16.gmra.mxu1 %v6482_v34  ;;  %v1221_v34 = vld [vmem:[#allocation2 + $0xa8] sm:$0xe] }
 0x155   : > { %v6562_v36 = vadd.f32 %v4680_v43, %v6462_v37  ;;  %3822 = vmatprep.mubr.bf16.mxu1 %v2478_v15  ;;  %v4588_v17 = vpop.f32.mrf.mxu0  ;;  %v4411_v19 = vcombine.low %v1221_v34, %v6448_v58  ;;  %v2490_v15 = vsel %vm1369_vm6, %v2485_v60, %v2489_v52  ;;  %v4413_v52 = vcombine.low %v1223_v2, %v6495_v8  ;;  %v1224_v8 = vld [vmem:[#allocation2 + $0xcc] sm:$0xe] }
 0x156   : > { %v4682_v63 = vpop.f32.mrf.mxu1  ;;  %v6566_v29 = vadd.f32 %v4588_v17, %v4587_v53 }
 0x157   : > { %v4683_v6 = vadd.f32 %v4682_v63, %v4681_v14  ;;  %v4590_v10 = vpop.f32.mrf.mxu0  ;;  %5028 = vmatmul.mubr.bf16.gmra.mxu0 %v2584_v13  ;;  %v2591_v58 = vrot.slane %v4411_v19, 1  ;;  %v2592_v14 = vrot.slane %v6468_v1, 1  ;;  %v4412_v63 = vcombine.low %v1222_v59, %v6471_v18 }
 0x158   : > { %v4684_v12 = vpop.f32.mrf.mxu1  ;;  %5031 = vmatprep.mubr.bf16.mxu0 %v2587_v46  ;;  %v2595_v18 = vrot.slane %v6490_v27, 1  ;;  %v2598_v46 = vrot.slane %v6516_v44, 1 }
 0x159   : > { %v6570_v37 = vadd.f32 %v4683_v6, %v6478_v23  ;;  %v4591_v57 = vpop.f32.mrf.mxu0  ;;  %v2589_v23 = vrot.slane %v6443_v32, 1  ;;  %v2594_v13 = vrot.slane %v4412_v63, 1 }
 0x15a   : > { %v4685_v26 = vpop.f32.mrf.mxu1  ;;  %v6576_v43 = vadd.f32 %v4591_v57, %v4590_v10  ;;  %v2597_v10 = vrot.slane %v4413_v52, 1 }
 0x15b   : > { %v4686_v56 = vadd.f32 %v4685_v26, %v4684_v12  ;;  %v2596_v57 = vsel %vm1626_vm10, %v2594_v13, %v2595_v18 }
 0x15c   : > { %v4687_v11 = vpop.f32.mrf.mxu1  ;;  %3823 = vmatmul.mubr.bf16.gmra.mxu1 %v6505_v33  ;;  %v4593_v49 = vpop.f32.mrf.mxu0  ;;  %v2590_v33 = vsel %vm1626_vm10, %v2588_v24, %v2589_v23 }
 0x15d   : > { %v6580_v25 = vadd.f32 %v4686_v56, %v6492_v55  ;;  %3830 = vmatprep.mubr.bf16.mxu1 %v2490_v15  ;;  %v2593_v55 = vsel %vm1626_vm10, %v2591_v58, %v2592_v14 }
 0x15e   : > { %v4688_v7 = vpop.f32.mrf.mxu1  ;;  %v4594_v32 = vpop.f32.mrf.mxu0 }
 0x15f   : > { %v4689_v53 = vadd.f32 %v4688_v7, %v4687_v11  ;;  %v4595_v1 = vadd.f32 %v4594_v32, %v4593_v49  ;;  %5032 = vmatmul.mubr.bf16.gmra.mxu0 %v2590_v33  ;;  %v2601_v7 = vrot.slane %v6545_v5, 1 }
 0x160   : > { %v4690_v9 = vpop.f32.mrf.mxu1  ;;  %v4596_v17 = vpop.f32.mrf.mxu0  ;;  %5035 = vmatprep.mubr.bf16.mxu0 %v2593_v55 }
 0x161   : > { %v6586_v60 = vadd.f32 %v4689_v53, %v6511_v50 }
 0x162   : > { %v4691_v6 = vpop.f32.mrf.mxu1  ;;  %v4597_v39 = vpop.f32.mrf.mxu0 }
 0x163   : > { %v4692_v34 = vadd.f32 %v4691_v6, %v4690_v9  ;;  %v4598_v26 = vadd.f32 %v4597_v39, %v4596_v17 }
 0x164   : > { %v4693_v12 = vpop.f32.mrf.mxu1  ;;  %3831 = vmatmul.mubr.bf16.gmra.mxu1 %v6533_v28  ;;  %v4414_v28 = vcombine.low %v1224_v8, %v6519_v45 }
 0x165   : > { %v6593_v50 = vadd.f32 %v4692_v34, %v6523_v30  ;;  %v2599_v30 = vsel %vm1626_vm10, %v2597_v10, %v2598_v46 }
 0x166   : > { %v4694_v19 = vpop.f32.mrf.mxu1  ;;  %v2600_v59 = vrot.slane %v4414_v28, 1 }
 0x167   : > { %v4695_v15 = vadd.f32 %v4694_v19, %v4693_v12  ;;  %v4599_v27 = vpop.f32.mrf.mxu0  ;;  %5036 = vmatmul.mubr.bf16.gmra.mxu0 %v2596_v57 }
 0x168   : > { %v4696_v56 = vpop.f32.mrf.mxu1  ;;  %5039 = vmatprep.mubr.bf16.mxu0 %v2599_v30  ;;  %v2602_v63 = vsel %vm1626_vm10, %v2600_v59, %v2601_v7 }
 0x169   : > { %v6599_v11 = vadd.f32 %v4695_v15, %v6547_v16  ;;  %v4600_v58 = vpop.f32.mrf.mxu0 }
 0x16a   : > { %v4697_v24 = vpop.f32.mrf.mxu1  ;;  %v4601_v14 = vadd.f32 %v4600_v58, %v4599_v27 }
 0x16b   : > { %v4698_v23 = vadd.f32 %v4697_v24, %v4696_v56  ;;  %v4602_v45 = vpop.f32.mrf.mxu0 }
 0x16c   : > { %v4699_v44 = vpop.f32.mrf.mxu1 }
 0x16d   : > { %v6604_v53 = vadd.f32 %v4698_v23, %v6558_v20  ;;  %v4603_v49 = vpop.f32.mrf.mxu0 }
 0x16e   : > { %v4700_v2 = vpop.f32.mrf.mxu1  ;;  %v4604_v33 = vadd.f32 %v4603_v49, %v4602_v45 }
 0x16f   : > { %v4701_v16 = vadd.f32 %v4700_v2, %v4699_v44  ;;  %v4605_v6 = vpop.f32.mrf.mxu0  ;;  %5040 = vmatmul.mubr.bf16.gmra.mxu0 %v2602_v63 }
 0x170   : > { %v4702_v9 = vpop.f32.mrf.mxu1 }
 0x171   : > { %v6608_v32 = vadd.f32 %v4701_v16, %v6566_v29  ;;  %v4606_v20 = vpop.f32.mrf.mxu0 }
 0x172   : > { %v4703_v55 = vpop.f32.mrf.mxu1  ;;  %v4607_v12 = vadd.f32 %v4606_v20, %v4605_v6 }
 0x173   : > { %v4704_v52 = vadd.f32 %v4703_v55, %v4702_v9  ;;  %v4608_v18 = vpop.f32.mrf.mxu0 }
 0x174   : > { %v4705_v34 = vpop.f32.mrf.mxu1 }
 0x175   : > { %v6611_v5 = vadd.f32 %v4704_v52, %v6576_v43  ;;  %v4609_v46 = vpop.f32.mrf.mxu0 }
 0x176   : > { %v4706_v17 = vpop.f32.mrf.mxu1  ;;  %v4610_v29 = vadd.f32 %v4609_v46, %v4608_v18 }
 0x177   : > { %v4707_v13 = vadd.f32 %v4706_v17, %v4705_v34  ;;  %v4763_v15 = vpop.f32.mrf.mxu0 }
 0x178   : > { %v4708_v39 = vpop.f32.mrf.mxu1 }
 0x179   : > { %v6613_v10 = vadd.f32 %v4707_v13, %v4595_v1  ;;  %v4764_v28 = vpop.f32.mrf.mxu0 }
 0x17a   : > { %v4709_v8 = vpop.f32.mrf.mxu1  ;;  %v4765_v43 = vadd.f32 %v4764_v28, %v4763_v15 }
 0x17b   : > { %v4710_v19 = vadd.f32 %v4709_v8, %v4708_v39  ;;  %v4766_v24 = vpop.f32.mrf.mxu0 }
 0x17c   : > { %v4711_v56 = vpop.f32.mrf.mxu1  ;;  %v6618_v58 = vadd.f32 %v4765_v43, %v6453_v3 }
 0x17d   : > { %v6615_v57 = vadd.f32 %v4710_v19, %v4598_v26  ;;  %v4767_v1 = vpop.f32.mrf.mxu0 }
 0x17e   : > { %v4712_v27 = vpop.f32.mrf.mxu1  ;;  %v4768_v7 = vadd.f32 %v4767_v1, %v4766_v24 }
 0x17f   : > { %v4713_v30 = vadd.f32 %v4712_v27, %v4711_v56  ;;  %v4769_v2 = vpop.f32.mrf.mxu0 }
 0x180   : > { %v4714_v23 = vpop.f32.mrf.mxu1  ;;  %v6623_v26 = vadd.f32 %v4768_v7, %v6466_v51 }
 0x181   : > { %v6620_v44 = vadd.f32 %v4713_v30, %v4601_v14  ;;  %v4770_v9 = vpop.f32.mrf.mxu0 }
 0x182   : > { %v4715_v59 = vpop.f32.mrf.mxu1  ;;  %v4771_v55 = vadd.f32 %v4770_v9, %v4769_v2 }
 0x183   : > { %v4716_v45 = vadd.f32 %v4715_v59, %v4714_v23  ;;  %v4772_v6 = vpop.f32.mrf.mxu0 }
 0x184   : > { %v4717_v16 = vpop.f32.mrf.mxu1  ;;  %v6628_v14 = vadd.f32 %v4771_v55, %v6474_v22 }
 0x185   : > { %v6625_v49 = vadd.f32 %v4716_v45, %v4604_v33  ;;  %v4773_v20 = vpop.f32.mrf.mxu0 }
 0x186   : > { %v4718_v63 = vpop.f32.mrf.mxu1  ;;  %v4774_v13 = vadd.f32 %v4773_v20, %v4772_v6 }
 0x187   : > { %v4719_v52 = vadd.f32 %v4718_v63, %v4717_v16  ;;  %v4775_v39 = vpop.f32.mrf.mxu0 }
 0x188   : > { %v4720_v3 = vpop.f32.mrf.mxu1  ;;  %v6633_v33 = vadd.f32 %v4774_v13, %v6488_v48 }
 0x189   : > { %v6630_v34 = vadd.f32 %v4719_v52, %v4607_v12  ;;  %v4776_v8 = vpop.f32.mrf.mxu0 }
 0x18a   : > { %v4721_v17 = vpop.f32.mrf.mxu1  ;;  %v4777_v15 = vadd.f32 %v4776_v8, %v4775_v39 }
 0x18b   : > { %v4722_v18 = vadd.f32 %v4721_v17, %v4720_v3  ;;  %v4778_v28 = vpop.f32.mrf.mxu0 }
 0x18c   : > { %v4723_v51 = vpop.f32.mrf.mxu1  ;;  %v6638_v12 = vadd.f32 %v4777_v15, %v6499_v54 }
 0x18d   : > { %v6635_v46 = vadd.f32 %v4722_v18, %v4610_v29  ;;  %v4779_v43 = vpop.f32.mrf.mxu0 }
 0x18e   : > { %v4724_v19 = vpop.f32.mrf.mxu1  ;;  %v4780_v24 = vadd.f32 %v4779_v43, %v4778_v28 }
 0x18f   : > { %v4725_v56 = vadd.f32 %v4724_v19, %v4723_v51  ;;  %v4781_v48 = vpop.f32.mrf.mxu0 }
 0x190   : > { %v4726_v22 = vpop.f32.mrf.mxu1  ;;  %v6644_v29 = vadd.f32 %v4780_v24, %v6514_v61 }
 0x191   : > { %v6641_v27 = vadd.f32 %v4725_v56, %v6287_v38  ;;  %v4782_v7 = vpop.f32.mrf.mxu0 }
 0x192   : > { %v4727_v30 = vpop.f32.mrf.mxu1  ;;  %v4783_v2 = vadd.f32 %v4782_v7, %v4781_v48 }
 0x193   : > { %v4728_v23 = vadd.f32 %v4727_v30, %v4726_v22  ;;  %v4784_v16 = vpop.f32.mrf.mxu0 }
 0x194   : > { %v4729_v1 = vpop.f32.mrf.mxu1  ;;  %v6650_v38 = vadd.f32 %v4783_v2, %v6526_v21 }
 0x195   : > { %v6647_v59 = vadd.f32 %v4728_v23, %v6305_v47  ;;  %v4785_v55 = vpop.f32.mrf.mxu0 }
 0x196   : > { %v4730_v45 = vpop.f32.mrf.mxu1  ;;  %v4786_v6 = vadd.f32 %v4785_v55, %v4784_v16 }
 0x197   : > { %v4731_v54 = vadd.f32 %v4730_v45, %v4729_v1  ;;  %v4787_v3 = vpop.f32.mrf.mxu0 }
 0x198   : > { %v4732_v9 = vpop.f32.mrf.mxu1  ;;  %v6656_v47 = vadd.f32 %v4786_v6, %v6540_v0 }
 0x199   : > { %v6653_v63 = vadd.f32 %v4731_v54, %v6340_v4  ;;  %v4788_v13 = vpop.f32.mrf.mxu0 }
 0x19a   : > { %v4733_v52 = vpop.f32.mrf.mxu1  ;;  %v4789_v39 = vadd.f32 %v4788_v13, %v4787_v3 }
 0x19b   : > { %v4734_v61 = vadd.f32 %v4733_v52, %v4732_v9  ;;  %v4790_v51 = vpop.f32.mrf.mxu0 }
 0x19c   : > { %v4735_v20 = vpop.f32.mrf.mxu1  ;;  %v6662_v4 = vadd.f32 %v4789_v39, %v6551_v42 }
 0x19d   : > { %v6659_v17 = vadd.f32 %v4734_v61, %v6353_v35  ;;  %v4791_v15 = vpop.f32.mrf.mxu0 }
 0x19e   : > { %v4736_v18 = vpop.f32.mrf.mxu1  ;;  %v4792_v28 = vadd.f32 %v4791_v15, %v4790_v51 }
 0x19f   : > { %v4737_v21 = vadd.f32 %v4736_v18, %v4735_v20  ;;  %v4793_v22 = vpop.f32.mrf.mxu0 }
 0x1a0   : > { %v4738_v8 = vpop.f32.mrf.mxu1  ;;  %v6668_v35 = vadd.f32 %v4792_v28, %v6562_v36 }
 0x1a1   : > { %v6665_v19 = vadd.f32 %v4737_v21, %v6385_v62  ;;  %v4794_v24 = vpop.f32.mrf.mxu0 }
 0x1a2   : > { %v4739_v56 = vpop.f32.mrf.mxu1  ;;  %v4795_v48 = vadd.f32 %v4794_v24, %v4793_v22 }
 0x1a3   : > { %v4740_v0 = vadd.f32 %v4739_v56, %v4738_v8  ;;  %v4796_v1 = vpop.f32.mrf.mxu0 }
 0x1a4   : > { %v4741_v43 = vpop.f32.mrf.mxu1  ;;  %v6674_v62 = vadd.f32 %v4795_v48, %v6570_v37 }
 0x1a5   : > { %v6671_v30 = vadd.f32 %v4740_v0, %v6399_v41  ;;  %v4797_v2 = vpop.f32.mrf.mxu0 }
 0x1a6   : > { %v4742_v23 = vpop.f32.mrf.mxu1  ;;  %v4798_v16 = vadd.f32 %v4797_v2, %v4796_v1 }
 0x1a7   : > { %v4743_v42 = vadd.f32 %v4742_v23, %v4741_v43  ;;  %v4799_v9 = vpop.f32.mrf.mxu0 }
 0x1a8   : > { %v4744_v7 = vpop.f32.mrf.mxu1  ;;  %v6680_v41 = vadd.f32 %v4798_v16, %v6580_v25 }
 0x1a9   : > { %v6677_v45 = vadd.f32 %v4743_v42, %v6429_v31  ;;  %v4800_v6 = vpop.f32.mrf.mxu0 }
 0x1aa   : > { %v4745_v54 = vpop.f32.mrf.mxu1  ;;  %v4801_v3 = vadd.f32 %v4800_v6, %v4799_v9 }
 0x1ab   : > { %7018 = vst [vmem:[#allocation3_spill] sm:$0xff] %v6677_v45  ;;  %v4746_v36 = vadd.f32 %v4745_v54, %v4744_v7  ;;  %v4802_v20 = vpop.f32.mrf.mxu0 }
 0x1ac   : > { %v4875_v55 = vpop.f32.mrf.mxu1  ;;  %v6686_v31 = vadd.f32 %v4801_v3, %v6586_v60 }
 0x1ad   : > { %v6683_v52 = vadd.f32 %v4746_v36, %v6440_v40  ;;  %v4803_v39 = vpop.f32.mrf.mxu0 }
 0x1ae   : > { %v4876_v61 = vpop.f32.mrf.mxu1  ;;  %v4804_v51 = vadd.f32 %v4803_v39, %v4802_v20 }
 0x1af   : > { %7019 = vst [vmem:[#allocation4_spill] sm:$0xff] %v6683_v52  ;;  %v4877_v37 = vadd.f32 %v4876_v61, %v4875_v55  ;;  %v4805_v8 = vpop.f32.mrf.mxu0 }
 0x1b0   : > { %v4878_v13 = vpop.f32.mrf.mxu1  ;;  %v6694_v40 = vadd.f32 %v4804_v51, %v6593_v50 }
 0x1b1   : > { %v6689_v18 = vadd.f32 %v4877_v37, %v6618_v58  ;;  %v4806_v28 = vpop.f32.mrf.mxu0 }
 0x1b2   : > { %v4879_v21 = vpop.f32.mrf.mxu1  ;;  %v4807_v60 = vadd.f32 %v4806_v28, %v4805_v8 }
 0x1b3   : > { %v4880_v25 = vadd.f32 %v4879_v21, %v4878_v13  ;;  %v4808_v22 = vpop.f32.mrf.mxu0 }
 0x1b4   : > { %v6691_v15 = vpop.f32.mrf.mxu1  ;;  %v6704_v43 = vadd.f32 %v4807_v60, %v6599_v11 }
 0x1b5   : > { %v6697_v56 = vadd.f32 %v4880_v25, %v6623_v26  ;;  %v4809_v24 = vpop.f32.mrf.mxu0 }
 0x1b6   : > { %v6699_v0 = vpop.f32.mrf.mxu1  ;;  %v4810_v48 = vadd.f32 %v4809_v24, %v4808_v22 }
 0x1b7   : > { %v4811_v42 = vpop.f32.mrf.mxu0 }
 0x1b8   : > { %v6701_v58 = vpop.f32.mrf.mxu1  ;;  %v6711_v26 = vadd.f32 %v4810_v48, %v6604_v53 }
 0x1b9   : > { %v4812_v1 = vpop.f32.mrf.mxu0 }
 0x1ba   : > { %v6706_v23 = vpop.f32.mrf.mxu1  ;;  %v4813_v2 = vadd.f32 %v4812_v1, %v4811_v42 }
 0x1bb   : > { %v4814_v54 = vpop.f32.mrf.mxu0 }
 0x1bc   : > { %v6708_v50 = vpop.f32.mrf.mxu1  ;;  %v6718_v11 = vadd.f32 %v4813_v2, %v6608_v32 }
 0x1bd   : > { %v4815_v36 = vpop.f32.mrf.mxu0 }
 0x1be   : > { %v6713_v7 = vpop.f32.mrf.mxu1  ;;  %v4816_v55 = vadd.f32 %v4815_v36, %v4814_v54 }
 0x1bf   : > { %v4817_v6 = vpop.f32.mrf.mxu0 }
 0x1c0   : > { %v6715_v16 = vpop.f32.mrf.mxu1  ;;  %v6725_v53 = vadd.f32 %v4816_v55, %v6611_v5 }
 0x1c1   : > { %v4818_v3 = vpop.f32.mrf.mxu0 }
 0x1c2   : > { %v6720_v9 = vpop.f32.mrf.mxu1  ;;  %7020 = vst [vmem:[#allocation5_spill] sm:$0xff] %v6725_v53  ;;  %v4819_v20 = vadd.f32 %v4818_v3, %v4817_v6 }
 0x1c3   : > { %v4820_v13 = vpop.f32.mrf.mxu0 }
 0x1c4   : > { %v6722_v61 = vpop.f32.mrf.mxu1  ;;  %v6732_v32 = vadd.f32 %v4819_v20, %v6613_v10 }
 0x1c5   : > { %v4821_v21 = vpop.f32.mrf.mxu0 }
 0x1c6   : > { %v6727_v37 = vpop.f32.mrf.mxu1  ;;  %v4822_v25 = vadd.f32 %v4821_v21, %v4820_v13 }
 0x1c7   : > { %v4823_v8 = vpop.f32.mrf.mxu0 }
 0x1c8   : > { %v6729_v39 = vpop.f32.mrf.mxu1  ;;  %v6739_v5 = vadd.f32 %v4822_v25, %v6615_v57 }
 0x1c9   : > { %v4824_v60 = vpop.f32.mrf.mxu0 }
 0x1ca   : > { %v6734_v51 = vpop.f32.mrf.mxu1  ;;  %7021 = vst [vmem:[#allocation6_spill] sm:$0xff] %v6739_v5  ;;  %v4825_v24 = vadd.f32 %v4824_v60, %v4823_v8 }
 0x1cb   : > { %v4826_v48 = vpop.f32.mrf.mxu0 }
 0x1cc   : > { %v6736_v28 = vpop.f32.mrf.mxu1  ;;  %v6746_v10 = vadd.f32 %v4825_v24, %v6620_v44 }
 0x1cd   : > { %v4827_v1 = vpop.f32.mrf.mxu0 }
 0x1ce   : > { %v6741_v22 = vpop.f32.mrf.mxu1  ;;  %7022 = vst [vmem:[#allocation7_spill] sm:$0xff] %v6746_v10  ;;  %v4828_v54 = vadd.f32 %v4827_v1, %v4826_v48 }
 0x1cf   : > { %v4829_v36 = vpop.f32.mrf.mxu0 }
 0x1d0   : > { %v6743_v42 = vpop.f32.mrf.mxu1  ;;  %v6753_v57 = vadd.f32 %v4828_v54, %v6625_v49 }
 0x1d1   : > { %v4830_v6 = vpop.f32.mrf.mxu0 }
 0x1d2   : > { %v6748_v2 = vpop.f32.mrf.mxu1  ;;  %7023 = vst [vmem:[#allocation8_spill] sm:$0xff] %v6753_v57  ;;  %v4831_v20 = vadd.f32 %v4830_v6, %v4829_v36 }
 0x1d3   : > { %v4832_v13 = vpop.f32.mrf.mxu0 }
 0x1d4   : > { %v6750_v55 = vpop.f32.mrf.mxu1  ;;  %v6760_v44 = vadd.f32 %v4831_v20, %v6630_v34 }
 0x1d5   : > { %v4833_v25 = vpop.f32.mrf.mxu0 }
 0x1d6   : > { %v6755_v3 = vpop.f32.mrf.mxu1  ;;  %7024 = vst [vmem:[#allocation9_spill] sm:$0xff] %v6760_v44  ;;  %v4834_v60 = vadd.f32 %v4833_v25, %v4832_v13 }
 0x1d7   : > { %v4835_v24 = vpop.f32.mrf.mxu0 }
 0x1d8   : > { %v6757_v21 = vpop.f32.mrf.mxu1  ;;  %v6767_v49 = vadd.f32 %v4834_v60, %v6635_v46 }
 0x1d9   : > { %v4836_v1 = vpop.f32.mrf.mxu0 }
 0x1da   : > { %v6762_v8 = vpop.f32.mrf.mxu1  ;;  %7025 = vst [vmem:[#allocation10_spill] sm:$0xff] %v6767_v49  ;;  %v4837_v36 = vadd.f32 %v4836_v1, %v4835_v24 }
 0x1db   : > { %v4838_v6 = vpop.f32.mrf.mxu0 }
 0x1dc   : > { %v6764_v48 = vpop.f32.mrf.mxu1  ;;  %v6774_v34 = vadd.f32 %v4837_v36, %v6641_v27 }
 0x1dd   : > { %v4839_v20 = vpop.f32.mrf.mxu0 }
 0x1de   : > { %v6769_v54 = vpop.f32.mrf.mxu1  ;;  %7026 = vst [vmem:[#allocation11_spill] sm:$0xff] %v6774_v34  ;;  %v4840_v13 = vadd.f32 %v4839_v20, %v4838_v6 }
 0x1df   : > { %v4841_v25 = vpop.f32.mrf.mxu0 }
 0x1e0   : > { %v6771_v52 = vpop.f32.mrf.mxu1  ;;  %v6781_v46 = vadd.f32 %v4840_v13, %v6647_v59 }
 0x1e1   : > { %v4842_v60 = vpop.f32.mrf.mxu0 }
 0x1e2   : > { %v6776_v45 = vpop.f32.mrf.mxu1  ;;  %7027 = vst [vmem:[#allocation12_spill] sm:$0xff] %v6781_v46  ;;  %v4843_v24 = vadd.f32 %v4842_v60, %v4841_v25 }
 0x1e3   : > { %v4844_v1 = vpop.f32.mrf.mxu0 }
 0x1e4   : > { %v6778_v57 = vpop.f32.mrf.mxu1  ;;  %v6788_v27 = vadd.f32 %v4843_v24, %v6653_v63 }
 0x1e5   : > { %v4845_v36 = vpop.f32.mrf.mxu0 }
 0x1e6   : > { %v6783_v49 = vpop.f32.mrf.mxu1  ;;  %7028 = vst [vmem:[#allocation13_spill] sm:$0xff] %v6788_v27  ;;  %v4846_v6 = vadd.f32 %v4845_v36, %v4844_v1 }
 0x1e7   : > { %v4847_v20 = vpop.f32.mrf.mxu0 }
 0x1e8   : > { %v6785_v10 = vpop.f32.mrf.mxu1  ;;  %v6795_v59 = vadd.f32 %v4846_v6, %v6659_v17 }
 0x1e9   : > { %v4848_v13 = vpop.f32.mrf.mxu0 }
 0x1ea   : > { %v6790_v34 = vpop.f32.mrf.mxu1  ;;  %7029 = vst [vmem:[#allocation14_spill] sm:$0xff] %v6795_v59  ;;  %v4849_v25 = vadd.f32 %v4848_v13, %v4847_v20 }
 0x1eb   : > { %v4850_v60 = vpop.f32.mrf.mxu0 }
 0x1ec   : > { %v6792_v44 = vpop.f32.mrf.mxu1  ;;  %v6802_v63 = vadd.f32 %v4849_v25, %v6665_v19  ;;  %v4883_v19 = vadd.f32 %v6699_v0, %v6691_v15 }
 0x1ed   : > { %v4851_v24 = vpop.f32.mrf.mxu0 }
 0x1ee   : > { %v6797_v46 = vpop.f32.mrf.mxu1  ;;  %7030 = vst [vmem:[#allocation15_spill] sm:$0xff] %v6802_v63  ;;  %v4852_v1 = vadd.f32 %v4851_v24, %v4850_v60  ;;  %v4886_v24 = vadd.f32 %v6706_v23, %v6701_v58  ;;  %v4895_v58 = vadd.f32 %v6727_v37, %v6722_v61 }
 0x1ef   : > { %v6806_v36 = vpop.f32.mrf.mxu0 }
 0x1f0   : > { %v6799_v53 = vpop.f32.mrf.mxu1  ;;  %7031 = vst [vmem:[#allocation16_spill] sm:$0xff] %v6806_v36  ;;  %v6811_v17 = vadd.f32 %v4852_v1, %v6671_v30  ;;  %v3721_v30 = vadd.f32 %v4883_v19, %v6628_v14  ;;  %v3724_v23 = vadd.f32 %v4886_v24, %v6633_v33  ;;  %v4889_v19 = vadd.f32 %v6713_v7, %v6708_v50 }
 0x1f1   : > { %v6813_v6 = vpop.f32.mrf.mxu0  ;;  %v3737_v33 = vadd.f32 %v4895_v58, %v6650_v38  ;;  %v4892_v50 = vadd.f32 %v6720_v9, %v6715_v16 }
 0x1f2   : > { %v6804_v27 = vpop.f32.mrf.mxu1  ;;  %7032 = vst [vmem:[#allocation17_spill] sm:$0xff] %v6811_v17  ;;  %7033 = vst [vmem:[#allocation18_spill] sm:$0xff] %v6813_v6  ;;  %v3729_v61 = vadd.f32 %v4889_v19, %v6638_v12 }
 0x1f3   : > { %v6819_v13 = vpop.f32.mrf.mxu0  ;;  %v3732_v19 = vadd.f32 %v4892_v50, %v6644_v29  ;;  %v4904_v50 = vadd.f32 %v6748_v2, %v6743_v42 }
 0x1f4   : > { %v6808_v5 = vpop.f32.mrf.mxu1  ;;  %7034 = vst [vmem:[#allocation19_spill] sm:$0xff] %v6819_v13 }
 0x1f5   : > { %v6823_v63 = vpop.f32.mrf.mxu0 }
 0x1f6   : > { %v6815_v20 = vpop.f32.mrf.mxu1  ;;  %7035 = vst [vmem:[#allocation20_spill] sm:$0xff] %v6823_v63 }
 0x1f7   : > { %v5013_v15 = vpop.f32.mrf.mxu0 }
 0x1f8   : > { %v6821_v25 = vpop.f32.mrf.mxu1  ;;  %v3882_v1 = vadd.f32 %v5013_v15, %v3721_v30  ;;  %v4898_v15 = vadd.f32 %v6734_v51, %v6729_v39 }
 0x1f9   : > { %v3873_v17 = vpop.f32.mrf.mxu0 }
 0x1fa   : > { %v6825_v60 = vpop.f32.mrf.mxu1  ;;  %4002 = vst [vmem:[%s6835_s7 + $0x10] sm:$0xff] %v3882_v1  ;;  %v3874_v14 = vadd.f32 %v3873_v17, %v6689_v18  ;;  %v3740_v38 = vadd.f32 %v4898_v15, %v6656_v47  ;;  %v4071_v16 = vmul.f32 %v3882_v1, %v3882_v1 }
 0x1fb   : > { %v5014_v13 = vpop.f32.mrf.mxu0 }
 0x1fc   : > { %v6837_v0 = vpop.f32.mrf.mxu1  ;;  %4000 = vst [vmem:[%s6835_s7] sm:$0xff] %v3874_v14  ;;  %v3885_v30 = vadd.f32 %v5014_v13, %v3724_v23  ;;  %v4069_v17 = vmul.f32 %v3874_v14, %v3874_v14  ;;  %v4901_v23 = vadd.f32 %v6741_v22, %v6736_v28 }
 0x1fd   : > { %v3876_v6 = vpop.f32.mrf.mxu0 }
 0x1fe   : > { %v6839_v63 = vpop.f32.mrf.mxu1  ;;  %4003 = vst [vmem:[%s6835_s7 + $0x18] sm:$0xff] %v3885_v30  ;;  %v3877_v18 = vadd.f32 %v3876_v6, %v6697_v56  ;;  %v4907_v56 = vadd.f32 %v6755_v3, %v6750_v55  ;;  %v4072_v55 = vmul.f32 %v3885_v30, %v3885_v30 }
 0x1ff   : > { %v5017_v7 = vpop.f32.mrf.mxu0 }
 0x200   : > { %v6848_v59 = vpop.f32.mrf.mxu1  ;;  %4001 = vst [vmem:[%s6835_s7 + $0x8] sm:$0xff] %v3877_v18  ;;  %v4032_v39 = vadd.f32 %v3877_v18, %v3874_v14  ;;  %v4070_v51 = vmul.f32 %v3877_v18, %v3877_v18  ;;  %v3898_v13 = vadd.f32 %v5017_v7, %v3737_v33  ;;  %v3753_v7 = vadd.f32 %v4907_v56, %v6674_v62 }
 0x201   : > { %v3889_v6 = vpop.f32.mrf.mxu0 }
 0x202   : > { %v6853_v36 = vpop.f32.mrf.mxu1  ;;  %v4033_v9 = vadd.f32 %v4032_v39, %v3882_v1  ;;  %v4101_v58 = vadd.f32 %v4070_v51, %v4069_v17  ;;  %4006 = vst [vmem:[%s6835_s7 + $0x30] sm:$0xff] %v3898_v13  ;;  %v3890_v12 = vadd.f32 %v3889_v6, %v3729_v61  ;;  %v4910_v1 = vadd.f32 %v6762_v8, %v6757_v21 }
 0x203   : > { %v5018_v14 = vpop.f32.mrf.mxu0  ;;  %v3745_v39 = vadd.f32 %v4901_v23, %v6662_v4  ;;  %v4919_v6 = vadd.f32 %v6783_v49, %v6778_v57  ;;  %v4075_v42 = vmul.f32 %v3898_v13, %v3898_v13 }
 0x204   : > { %v6861_v37 = vpop.f32.mrf.mxu1  ;;  %v4102_v3 = vadd.f32 %v4101_v58, %v4071_v16  ;;  %4004 = vst [vmem:[%s6835_s7 + $0x20] sm:$0xff] %v3890_v12  ;;  %v4034_v47 = vadd.f32 %v4033_v9, %v3885_v30  ;;  %v3901_v15 = vadd.f32 %v5018_v14, %v3740_v38  ;;  %v4073_v22 = vmul.f32 %v3890_v12, %v3890_v12 }
 0x205   : > { %v3892_v33 = vpop.f32.mrf.mxu0  ;;  %v3756_v16 = vadd.f32 %v4910_v1, %v6680_v41  ;;  %v3748_v14 = vadd.f32 %v4904_v50, %v6668_v35 }
 0x206   : > { %v6867_v24 = vpop.f32.mrf.mxu1  ;;  %v4035_v28 = vadd.f32 %v4034_v47, %v3890_v12  ;;  %v4103_v17 = vadd.f32 %v4102_v3, %v4072_v55  ;;  %4007 = vst [vmem:[%s6835_s7 + $0x38] sm:$0xff] %v3901_v15  ;;  %v3893_v29 = vadd.f32 %v3892_v33, %v3732_v19  ;;  %v4913_v12 = vadd.f32 %v6769_v54, %v6764_v48 }
 0x207   : > { %v5021_v30 = vpop.f32.mrf.mxu0  ;;  %v4076_v57 = vmul.f32 %v3901_v15, %v3901_v15  ;;  %v3769_v47 = vadd.f32 %v4919_v6, %v6704_v43 }
 0x208   : > { %v6873_v18 = vpop.f32.mrf.mxu1  ;;  %v4104_v21 = vadd.f32 %v4103_v17, %v4073_v22  ;;  %4005 = vst [vmem:[%s6835_s7 + $0x28] sm:$0xff] %v3893_v29  ;;  %v4036_v8 = vadd.f32 %v4035_v28, %v3893_v29  ;;  %v4074_v62 = vmul.f32 %v3893_v29, %v3893_v29  ;;  %v3914_v56 = vadd.f32 %v5021_v30, %v3753_v7 }
 0x209   : > { %v3905_v38 = vpop.f32.mrf.mxu0  ;;  %v4916_v7 = vadd.f32 %v6776_v45, %v6771_v52  ;;  %v3761_v28 = vadd.f32 %v4913_v12, %v6686_v31  ;;  %v4931_v29 = vadd.f32 %v6815_v20, %v6808_v5  ;;  %v4928_v12 = vadd.f32 %v6804_v27, %v6799_v53 }
 0x20a   : > { %v6879_v61 = vpop.f32.mrf.mxu1  ;;  %v4037_v2 = vadd.f32 %v4036_v8, %v3898_v13  ;;  %v4105_v58 = vadd.f32 %v4104_v21, %v4074_v62  ;;  %4010 = vst [vmem:[%s6835_s7 + $0x50] sm:$0xff] %v3914_v56  ;;  %v3906_v4 = vadd.f32 %v3905_v38, %v3745_v39  ;;  %v4922_v13 = vadd.f32 %v6790_v34, %v6785_v10 }
 0x20b   : > { %v5022_v23 = vpop.f32.mrf.mxu0  ;;  %v4079_v45 = vmul.f32 %v3914_v56, %v3914_v56  ;;  %v4925_v8 = vadd.f32 %v6797_v46, %v6792_v44  ;;  %v3764_v6 = vadd.f32 %v4916_v7, %v6694_v40 }
 0x20c   : > { %v6885_v51 = vpop.f32.mrf.mxu1  ;;  %v4106_v49 = vadd.f32 %v4105_v58, %v4075_v42  ;;  %4008 = vst [vmem:[%s6835_s7 + $0x40] sm:$0xff] %v3906_v4  ;;  %v4038_v41 = vadd.f32 %v4037_v2, %v3901_v15  ;;  %v3917_v55 = vadd.f32 %v5022_v23, %v3756_v16  ;;  %v4077_v54 = vmul.f32 %v3906_v4, %v3906_v4 }
 0x20d   : > { %v3908_v3 = vpop.f32.mrf.mxu0  ;;  %v3772_v30 = vadd.f32 %v4922_v13, %v6711_v26  ;;  %v3785_v2 = vadd.f32 %v4931_v29, %v6732_v32  ;;  %v7036_v13 = vld [vmem:[#allocation6_spill] sm:$0xff] }
 0x20e   : > { %v6891_v9 = vpop.f32.mrf.mxu1  ;;  %v4039_v48 = vadd.f32 %v4038_v41, %v3906_v4  ;;  %v4107_v33 = vadd.f32 %v4106_v49, %v4076_v57  ;;  %4011 = vst [vmem:[%s6835_s7 + $0x58] sm:$0xff] %v3917_v55  ;;  %v3909_v35 = vadd.f32 %v3908_v3, %v3748_v14  ;;  %v4080_v5 = vmul.f32 %v3917_v55, %v3917_v55 }
 0x20f   : > { %v5025_v15 = vpop.f32.mrf.mxu0  ;;  %v3777_v14 = vadd.f32 %v4925_v8, %v6718_v11  ;;  %v4943_v41 = vadd.f32 %v6867_v24, %v6861_v37 }
 0x210   : > { %v6897_v19 = vpop.f32.mrf.mxu1  ;;  %v4108_v10 = vadd.f32 %v4107_v33, %v4077_v54  ;;  %4009 = vst [vmem:[%s6835_s7 + $0x48] sm:$0xff] %v3909_v35  ;;  %v4040_v34 = vadd.f32 %v4039_v48, %v3909_v35  ;;  %v4078_v43 = vmul.f32 %v3909_v35, %v3909_v35  ;;  %v3930_v17 = vadd.f32 %v5025_v15, %v3769_v47  ;;  %v7037_v35 = vld [vmem:[#allocation5_spill] sm:$0xff] }
 0x211   : > { %v3921_v50 = vpop.f32.mrf.mxu0  ;;  %v4937_v54 = vadd.f32 %v6839_v63, %v6837_v0  ;;  %v3780_v7 = vadd.f32 %v4928_v12, %v7037_v35 }
 0x212   : > { %v6903_v1 = vpop.f32.mrf.mxu1  ;;  %v4041_v52 = vadd.f32 %v4040_v34, %v3914_v56  ;;  %v4109_v21 = vadd.f32 %v4108_v10, %v4078_v43  ;;  %4014 = vst [vmem:[%s6835_s7 + $0x70] sm:$0xff] %v3930_v17  ;;  %v3922_v31 = vadd.f32 %v3921_v50, %v3761_v28  ;;  %v4934_v56 = vadd.f32 %v6825_v60, %v6821_v25 }
 0x213   : > { %v5026_v62 = vpop.f32.mrf.mxu0  ;;  %v4083_v53 = vmul.f32 %v3930_v17, %v3930_v17  ;;  %v4946_v34 = vadd.f32 %v6879_v61, %v6873_v18 }
 0x214   : > { %v6909_v22 = vpop.f32.mrf.mxu1  ;;  %v4110_v20 = vadd.f32 %v4109_v21, %v4079_v45  ;;  %4012 = vst [vmem:[%s6835_s7 + $0x60] sm:$0xff] %v3922_v31  ;;  %v4042_v26 = vadd.f32 %v4041_v52, %v3917_v55  ;;  %v3933_v16 = vadd.f32 %v5026_v62, %v3772_v30  ;;  %v4081_v46 = vmul.f32 %v3922_v31, %v3922_v31 }
 0x215   : > { %v3924_v42 = vpop.f32.mrf.mxu0  ;;  %v3788_v3 = vadd.f32 %v4934_v56, %v7036_v13  ;;  %v4940_v52 = vadd.f32 %v6853_v36, %v6848_v59 }
 0x216   : > { %v6915_v39 = vpop.f32.mrf.mxu1  ;;  %v4043_v44 = vadd.f32 %v4042_v26, %v3922_v31  ;;  %v4111_v4 = vadd.f32 %v4110_v20, %v4080_v5  ;;  %4015 = vst [vmem:[%s6835_s7 + $0x78] sm:$0xff] %v3933_v16  ;;  %v3925_v40 = vadd.f32 %v3924_v42, %v3764_v6  ;;  %v4084_v37 = vmul.f32 %v3933_v16, %v3933_v16  ;;  %v7039_v31 = vld [vmem:[#allocation7_spill] sm:$0xff] }
 0x217   : > { %v5029_v23 = vpop.f32.mrf.mxu0  ;;  %v3793_v8 = vadd.f32 %v4937_v54, %v7039_v31  ;;  %v4955_v18 = vadd.f32 %v6915_v39, %v6909_v22  ;;  %v7041_v39 = vld [vmem:[#allocation8_spill] sm:$0xff]  ;;  %v7046_v54 = vld [vmem:[#allocation14_spill] sm:$0xff] }
 0x218   : > { %v6921_v38 = vpop.f32.mrf.mxu1  ;;  %v4112_v25 = vadd.f32 %v4111_v4, %v4081_v46  ;;  %4013 = vst [vmem:[%s6835_s7 + $0x68] sm:$0xff] %v3925_v40  ;;  %v4044_v60 = vadd.f32 %v4043_v44, %v3925_v40  ;;  %v4082_v32 = vmul.f32 %v3925_v40, %v3925_v40  ;;  %v3946_v49 = vadd.f32 %v5029_v23, %v3785_v2  ;;  %v7042_v40 = vld [vmem:[#allocation13_spill] sm:$0xff]  ;;  %v7050_v31 = vld [vmem:[#allocation12_spill] sm:$0xff] }
 0x219   : > { %v3937_v55 = vpop.f32.mrf.mxu0  ;;  %v4949_v46 = vadd.f32 %v6891_v9, %v6885_v51  ;;  %v3796_v4 = vadd.f32 %v4940_v52, %v7041_v39  ;;  %v3817_v12 = vadd.f32 %v4955_v18, %v7042_v40 }
 0x21a   : > { %v6927_v58 = vpop.f32.mrf.mxu1  ;;  %v4045_v27 = vadd.f32 %v4044_v60, %v3930_v17  ;;  %v4113_v48 = vadd.f32 %v4112_v25, %v4082_v32  ;;  %4018 = vst [vmem:[%s6835_s7 + $0x90] sm:$0xff] %v3946_v49  ;;  %v3938_v11 = vadd.f32 %v3937_v55, %v3777_v14  ;;  %v7038_v17 = vld [vmem:[#allocation9_spill] sm:$0xff]  ;;  %v4087_v2 = vmul.f32 %v3946_v49, %v3946_v49  ;;  %v7044_v55 = vld [vmem:[#allocation18_spill] sm:$0xff] }
 0x21b   : > { %v5030_v33 = vpop.f32.mrf.mxu0  ;;  %v3801_v29 = vadd.f32 %v4943_v41, %v7038_v17  ;;  %v4958_v23 = vadd.f32 %v6927_v58, %v6921_v38  ;;  %v7043_v41 = vld [vmem:[#allocation16_spill] sm:$0xff]  ;;  %v7045_v58 = vld [vmem:[#allocation11_spill] sm:$0xff] }
 0x21c   : > { %v6933_v57 = vpop.f32.mrf.mxu1  ;;  %v4114_v24 = vadd.f32 %v4113_v48, %v4083_v53  ;;  %4016 = vst [vmem:[%s6835_s7 + $0x80] sm:$0xff] %v3938_v11  ;;  %v4046_v28 = vadd.f32 %v4045_v27, %v3933_v16  ;;  %v3949_v10 = vadd.f32 %v5030_v33, %v3788_v3  ;;  %v4085_v0 = vmul.f32 %v3938_v11, %v3938_v11  ;;  %v7040_v16 = vld [vmem:[#allocation10_spill] sm:$0xff]  ;;  %v7048_v17 = vld [vmem:[#allocation19_spill] sm:$0xff] }
 0x21d   : > { %v3940_v43 = vpop.f32.mrf.mxu0  ;;  %v3804_v56 = vadd.f32 %v4946_v34, %v7040_v16  ;;  %v4855_v13 = vadd.f32 %v7044_v55, %v7043_v41  ;;  %v4952_v48 = vadd.f32 %v6903_v1, %v6897_v19  ;;  %v3820_v33 = vadd.f32 %v4958_v23, %v7046_v54  ;;  %v7047_v34 = vld [vmem:[#allocation3_spill] sm:$0xff]  ;;  %v7051_v16 = vld [vmem:[#allocation4_spill] sm:$0xff] }
 0x21e   : > { %v6939_v47 = vpop.f32.mrf.mxu1  ;;  %v4047_v63 = vadd.f32 %v4046_v28, %v3938_v11  ;;  %v4115_v30 = vadd.f32 %v4114_v24, %v4084_v37  ;;  %4019 = vst [vmem:[%s6835_s7 + $0x98] sm:$0xff] %v3949_v10  ;;  %v3941_v45 = vadd.f32 %v3940_v43, %v3780_v7  ;;  %v4088_v14 = vmul.f32 %v3949_v10, %v3949_v10 }
 0x21f   : > { %v5033_v21 = vpop.f32.mrf.mxu0  ;;  %v3809_v11 = vadd.f32 %v4949_v46, %v7045_v58  ;;  %v3672_v43 = vadd.f32 %v4855_v13, %v7047_v34  ;;  %v4961_v1 = vadd.f32 %v6939_v47, %v6933_v57  ;;  %v7052_v47 = vld [vmem:[#allocation15_spill] sm:$0xff] }
 0x220   : > { %v6945_v15 = vpop.f32.mrf.mxu1  ;;  %v4116_v62 = vadd.f32 %v4115_v30, %v4085_v0  ;;  %4017 = vst [vmem:[%s6835_s7 + $0x88] sm:$0xff] %v3941_v45  ;;  %v4048_v6 = vadd.f32 %v4047_v63, %v3941_v45  ;;  %v4086_v5 = vmul.f32 %v3941_v45, %v3941_v45  ;;  %v3962_v20 = vadd.f32 %v5033_v21, %v3801_v29  ;;  %v7049_v29 = vld [vmem:[#allocation20_spill] sm:$0xff] }
 0x221   : > { %v3953_v26 = vpop.f32.mrf.mxu0  ;;  %v4858_v63 = vadd.f32 %v7049_v29, %v7048_v17 }
 0x222   : > { %v6951_v50 = vpop.f32.mrf.mxu1  ;;  %v4049_v59 = vadd.f32 %v4048_v6, %v3946_v49  ;;  %v4117_v36 = vadd.f32 %v4116_v62, %v4086_v5  ;;  %4022 = vst [vmem:[%s6835_s7 + $0xb0] sm:$0xff] %v3962_v20  ;;  %v3954_v44 = vadd.f32 %v3953_v26, %v3793_v8  ;;  %v4091_v0 = vmul.f32 %v3962_v20, %v3962_v20 }
 0x223   : > { %v5034_v22 = vpop.f32.mrf.mxu0  ;;  %v3812_v8 = vadd.f32 %v4952_v48, %v7050_v31 }
 0x224   : > { %v4965_v61 = vpop.f32.mrf.mxu1  ;;  %v4118_v25 = vadd.f32 %v4117_v36, %v4087_v2  ;;  %4020 = vst [vmem:[%s6835_s7 + $0xa0] sm:$0xff] %v3954_v44  ;;  %v4050_v60 = vadd.f32 %v4049_v59, %v3949_v10  ;;  %v3965_v32 = vadd.f32 %v5034_v22, %v3804_v56  ;;  %v4089_v3 = vmul.f32 %v3954_v44, %v3954_v44 }
 0x225   : > { %v3956_v51 = vpop.f32.mrf.mxu0  ;;  %v3675_v56 = vadd.f32 %v4858_v63, %v7051_v16 }
 0x226   : > { %v4966_v42 = vpop.f32.mrf.mxu1  ;;  %v4051_v9 = vadd.f32 %v4050_v60, %v3954_v44  ;;  %v4119_v53 = vadd.f32 %v4118_v25, %v4088_v14  ;;  %4023 = vst [vmem:[%s6835_s7 + $0xb8] sm:$0xff] %v3965_v32  ;;  %v3957_v27 = vadd.f32 %v3956_v51, %v3796_v4  ;;  %v4092_v62 = vmul.f32 %v3965_v32, %v3965_v32  ;;  %v7053_v14 = vld [vmem:[#allocation17_spill] sm:$0xff] }
 0x227   : > { %v5037_v38 = vpop.f32.mrf.mxu0  ;;  %v4967_v35 = vadd.f32 %v4966_v42, %v4965_v61  ;;  %v4964_v42 = vadd.f32 %v6951_v50, %v6945_v15 }
 0x228   : > { %v4968_v49 = vpop.f32.mrf.mxu1  ;;  %v4120_v7 = vadd.f32 %v4119_v53, %v4089_v3  ;;  %4021 = vst [vmem:[%s6835_s7 + $0xa8] sm:$0xff] %v3957_v27  ;;  %v4052_v37 = vadd.f32 %v4051_v9, %v3957_v27  ;;  %v4090_v24 = vmul.f32 %v3957_v27, %v3957_v27  ;;  %v3978_v28 = vadd.f32 %v5037_v38, %v3817_v12 }
 0x229   : > { %v3969_v19 = vpop.f32.mrf.mxu0  ;;  %v3833_v18 = vadd.f32 %v4967_v35, %v3672_v43  ;;  %v3828_v25 = vadd.f32 %v4964_v42, %v7053_v14 }
 0x22a   : > { %v4969_v10 = vpop.f32.mrf.mxu1  ;;  %v4053_v30 = vadd.f32 %v4052_v37, %v3962_v20  ;;  %v4121_v45 = vadd.f32 %v4120_v7, %v4090_v24  ;;  %4026 = vst [vmem:[%s6835_s7 + $0xd0] sm:$0xff] %v3978_v28  ;;  %v3970_v52 = vadd.f32 %v3969_v19, %v3809_v11  ;;  %v3825_v20 = vadd.f32 %v4961_v1, %v7052_v47 }
 0x22b   : > { %v5038_v21 = vpop.f32.mrf.mxu0  ;;  %v4970_v61 = vadd.f32 %v4969_v10, %v4968_v49  ;;  %v4095_v60 = vmul.f32 %v3978_v28, %v3978_v28 }
 0x22c   : > { %v4122_v6 = vadd.f32 %v4121_v45, %v4091_v0  ;;  %4024 = vst [vmem:[%s6835_s7 + $0xc0] sm:$0xff] %v3970_v52  ;;  %v4054_v5 = vadd.f32 %v4053_v30, %v3965_v32  ;;  %v3981_v26 = vadd.f32 %v5038_v21, %v3820_v33  ;;  %v4093_v59 = vmul.f32 %v3970_v52, %v3970_v52 }
 0x22d   : > { %v3972_v57 = vpop.f32.mrf.mxu0  ;;  %v3836_v22 = vadd.f32 %v4970_v61, %v3675_v56 }
 0x22e   : > { %v4055_v2 = vadd.f32 %v4054_v5, %v3970_v52  ;;  %v4123_v36 = vadd.f32 %v4122_v6, %v4092_v62  ;;  %4027 = vst [vmem:[%s6835_s7 + $0xd8] sm:$0xff] %v3981_v26  ;;  %v3973_v44 = vadd.f32 %v3972_v57, %v3812_v8  ;;  %v4096_v49 = vmul.f32 %v3981_v26, %v3981_v26 }
 0x22f   : > { %v5041_v46 = vpop.f32.mrf.mxu0 }
 0x230   : > { %v4124_v39 = vadd.f32 %v4123_v36, %v4093_v59  ;;  %4025 = vst [vmem:[%s6835_s7 + $0xc8] sm:$0xff] %v3973_v44  ;;  %v4056_v4 = vadd.f32 %v4055_v2, %v3973_v44  ;;  %v4094_v40 = vmul.f32 %v3973_v44, %v3973_v44  ;;  %v3994_v12 = vadd.f32 %v5041_v46, %v3833_v18 }
 0x231   : > { %v3985_v23 = vpop.f32.mrf.mxu0 }
 0x232   : > { %v4057_v15 = vadd.f32 %v4056_v4, %v3978_v28  ;;  %v4125_v50 = vadd.f32 %v4124_v39, %v4094_v40  ;;  %v3986_v32 = vadd.f32 %v3985_v23, %v3825_v20  ;;  %4030 = vst [vmem:[%s6835_s7 + $0xf0] sm:$0xff] %v3994_v12  ;;  %v4099_v54 = vmul.f32 %v3994_v12, %v3994_v12 }
 0x233   : > { %v5042_v41 = vpop.f32.mrf.mxu0 }
 0x234   : > { %v4126_v55 = vadd.f32 %v4125_v50, %v4095_v60  ;;  %4028 = vst [vmem:[%s6835_s7 + $0xe0] sm:$0xff] %v3986_v32  ;;  %v4058_v13 = vadd.f32 %v4057_v15, %v3981_v26  ;;  %v4097_v51 = vmul.f32 %v3986_v32, %v3986_v32  ;;  %v3997_v9 = vadd.f32 %v5042_v41, %v3836_v22 }
 0x235   : > { %v3988_v3 = vpop.f32.mrf.mxu0 }
 0x236   : > { %v4059_v53 = vadd.f32 %v4058_v13, %v3986_v32  ;;  %v4127_v27 = vadd.f32 %v4126_v55, %v4096_v49  ;;  %v3989_v48 = vadd.f32 %v3988_v3, %v3828_v25  ;;  %4031 = vst [vmem:[%s6835_s7 + $0xf8] sm:$0xff] %v3997_v9  ;;  %v4100_v7 = vmul.f32 %v3997_v9, %v3997_v9 }
 0x238   : > { %v4128_v38 = vadd.f32 %v4127_v27, %v4097_v51  ;;  %4029 = vst [vmem:[%s6835_s7 + $0xe8] sm:$0xff] %v3989_v48  ;;  %v4060_v58 = vadd.f32 %v4059_v53, %v3989_v48  ;;  %v4098_v11 = vmul.f32 %v3989_v48, %v3989_v48 }
 0x23a   : > { %v4129_v33 = vadd.f32 %v4128_v38, %v4098_v11  ;;  %v4061_v35 = vadd.f32 %v4060_v58, %v3994_v12 }
 0x23c   : > { %v4130_v37 = vadd.f32 %v4129_v33, %v4099_v54  ;;  %v4062_v24 = vadd.f32 %v4061_v35, %v3997_v9 }
 0x23e   : > { %v4063_v28 = vrot.slane %v4062_v24, 4  ;;  %v4131_v10 = vadd.f32 %v4130_v37, %v4100_v7 }
 0x240   : > { %v4064_v34 = vadd.f32 %v4063_v28, %v4062_v24  ;;  %v4132_v43 = vrot.slane %v4131_v10, 4 }
 0x242   : > { %v4065_v17 = vrot.slane %v4064_v34, 2  ;;  %v4133_v29 = vadd.f32 %v4132_v43, %v4131_v10 }
 0x244   : > { %v4066_v63 = vadd.f32 %v4065_v17, %v4064_v34  ;;  %v4134_v19 = vrot.slane %v4133_v29, 2 }
 0x246   : > { %v4067_v1 = vrot.slane %v4066_v63, 1  ;;  %v4135_v0 = vadd.f32 %v4134_v19, %v4133_v29 }
 0x248   : > { %v4136_v30 = vrot.slane %v4135_v0, 1  ;;  %v4068_v45 = vadd.f32 %v4067_v1, %v4066_v63 }
 0x24a   : > { %v4137_v52 = vadd.f32 %v4136_v30, %v4135_v0 }
 0x24c   : > { %v4139_v21 = vsel %vm402_vm0, %v4068_v45, %v4137_v52 }
 0x24d   : > { %4140 = vst [vmem:[%s235_s10] sm:$0x3] %v4139_v21 }
 0x24e PF: > { %s16_s18 = sadd.s32 1, %s5302_s18  }
 0x24f   : > { %p13_p4 = scmp.ge.s32.totalorder %s16_s18, 4  }
 0x251   :  { %15 = sbr.rel (!%p13_p4) target bundleno = 1 (0x1), region = 81 }

</bundles_post_ra>
